<compile_context>
chip_gen: v5e
topology: v5e:2x2
jax: 0.10.0
libtpu: 0.0.40
codegen_flags: <defaults>
</compile_context>

<pallas_src>
import functools

import jax
import jax.numpy as jnp
import numpy as np
from jax import lax
from jax.experimental import pallas as pl
from jax.experimental.pallas import tpu as pltpu

IN_DIM = 2
FC1_DIM = 64
HID_DIM = 128
OUT_DIM = 3
OUT_PAD = 128          # lane-dense fc2 output width (multiple of 128)
SUBLANE = 8            # f32 sublane count
MAX_BATCH_TILE = 64    # rows per recurrence step (vreg-pressure cap)
MAX_CHUNK_ROWS = 2048  # rows of the (rows, 512) f32 gates scratch per chunk (4 MiB)


def _drqn_kernel(x_ref, h0_ref, c0_ref,
                 w1t_ref, b1_ref, wiht_ref, whht_ref, blstm_ref,
                 w2t_ref, b2_ref,
                 y_ref, hn_ref, cn_ref,
                 gates_ref,
                 *, t_total, time_padded, unroll):
    """One (batch_chunk, time_chunk) grid step.

    x_ref:   (TC, BB, 2) time-major input chunk (batch padded to BB).
    y_ref:   (TC, BB, 128) lane-dense fc2 output chunk.
    hn/cn:   (BB, 128) resident across the time axis -> used as the h/c carry.
    gates_ref: (TC*BB, 512) scratch; columns 0:128 are reused as the h history.
    """
    t_chunk = pl.program_id(1)
    tc, bb, _ = x_ref.shape
    rows = tc * bb

    # Initialize the carried state from the (optional) initial hidden state.
    @pl.when(t_chunk == 0)
    def _():
        hn_ref[...] = h0_ref[...]
        cn_ref[...] = c0_ref[...]

    # ---- Phase 1: fc1 via VPU broadcast-FMA (K=2 stays off the MXU), then
    #      one big (rows, 64) @ (64, 512) input projection for all steps. ----
    x = x_ref[...].reshape(rows, IN_DIM)
    a1 = jnp.maximum(
        x[:, 0:1] * w1t_ref[0:1, :] + x[:, 1:2] * w1t_ref[1:2, :] + b1_ref[...],
        0.0)                                                     # (rows, 64)
    gates_ref[...] = (
        jnp.dot(a1, wiht_ref[...], preferred_element_type=jnp.float32)
        + blstm_ref[...])                                        # (rows, 512)

    whht = whht_ref[...]                                         # (128, 512)
    if time_padded:
        n_valid = jnp.minimum(tc, t_total - t_chunk * tc)

    # ---- Phase 2: sequential LSTM recurrence (PyTorch gate order i,f,g,o) --
    def step(t, carry):
        h_prev, c_prev = carry
        row = pl.multiple_of(t * bb, SUBLANE)
        gates = (gates_ref[pl.ds(row, bb), :]
                 + jnp.dot(h_prev, whht, preferred_element_type=jnp.float32))
        i_g = jax.nn.sigmoid(gates[:, 0 * HID_DIM:1 * HID_DIM])
        f_g = jax.nn.sigmoid(gates[:, 1 * HID_DIM:2 * HID_DIM])
        g_g = jnp.tanh(gates[:, 2 * HID_DIM:3 * HID_DIM])
        o_g = jax.nn.sigmoid(gates[:, 3 * HID_DIM:4 * HID_DIM])
        c_new = f_g * c_prev + i_g * g_g
        h_new = o_g * jnp.tanh(c_new)
        # h history aliased into the (already consumed) first 128 gate columns.
        gates_ref[pl.ds(row, bb), 0:HID_DIM] = h_new
        if time_padded:
            valid = t < n_valid          # don't advance the carry on padded steps
            h_new = jnp.where(valid, h_new, h_prev)
            c_new = jnp.where(valid, c_new, c_prev)
        return h_new, c_new

    h_last, c_last = lax.fori_loop(0, tc, step, (hn_ref[...], cn_ref[...]),
                                   unroll=unroll)
    hn_ref[...] = h_last
    cn_ref[...] = c_last

    # ---- Phase 3: batched, lane-dense fc2 for the whole chunk --------------
    h_hist = gates_ref[:, 0:HID_DIM]                             # (rows, 128)
    y = (jnp.dot(h_hist, w2t_ref[...], preferred_element_type=jnp.float32)
         + b2_ref[...])                                          # (rows, 128)
    y_ref[...] = y.reshape(tc, bb, OUT_PAD)


def _round_up(v, m):
    return ((v + m - 1) // m) * m


def drqn_forward(x, params, hidden=None):
    """x: (B, T, 2) f32. Returns (y (B,T,3), (h_n (1,B,128), c_n (1,B,128)))."""
    B, T, _ = x.shape
    w1t, b1, wiht, whht, blstm, w2t_pad, b2_pad = params

    # ---- batch / time tiling -----------------------------------------------
    if B <= MAX_BATCH_TILE:
        bb = _round_up(B, SUBLANE)
        num_bc = 1
    else:
        bb = MAX_BATCH_TILE
        num_bc = (B + bb - 1) // bb
    bp = num_bc * bb

    tc = max(1, min(T, MAX_CHUNK_ROWS // bb))
    num_tc = (T + tc - 1) // tc
    tp = num_tc * tc
    unroll = tc if tc <= 16 else 8

    # ---- pack x into (num_bc, Tp, BB, 2) time-major blocks ------------------
    # TODO(synk): fold this pad/transpose into the x BlockSpec index_map so x
    # is streamed straight from its native (B, T, 2) layout.
    x_pad = jnp.pad(x, ((0, bp - B), (0, tp - T), (0, 0)))
    x_blk = jnp.transpose(x_pad.reshape(num_bc, bb, tp, IN_DIM), (0, 2, 1, 3))

    if hidden is None:
        h0 = jnp.zeros((num_bc, bb, HID_DIM), jnp.float32)
        c0 = jnp.zeros((num_bc, bb, HID_DIM), jnp.float32)
    else:
        h_in, c_in = hidden                                   # (1, B, 128) each
        h0 = (jnp.zeros((bp, HID_DIM), jnp.float32).at[:B].set(h_in[0])
              .reshape(num_bc, bb, HID_DIM))
        c0 = (jnp.zeros((bp, HID_DIM), jnp.float32).at[:B].set(c_in[0])
              .reshape(num_bc, bb, HID_DIM))

    kernel = functools.partial(_drqn_kernel, t_total=T,
                               time_padded=(tp != T), unroll=unroll)

    flops = 2 * tp * bp * (IN_DIM * FC1_DIM + FC1_DIM * 4 * HID_DIM
                           + HID_DIM * 4 * HID_DIM + HID_DIM * OUT_PAD)
    transcendentals = 6 * tp * bp * HID_DIM
    bytes_accessed = 4 * (x_blk.size + 4 * num_bc * bb * HID_DIM
                          + num_bc * tp * bb * OUT_PAD
                          + w1t.size + b1.size + wiht.size + whht.size
                          + blstm.size + w2t_pad.size + b2_pad.size)

    y_blk, h_n, c_n = pl.pallas_call(
        kernel,
        out_shape=(
            jax.ShapeDtypeStruct((num_bc, tp, bb, OUT_PAD), jnp.float32),
            jax.ShapeDtypeStruct((num_bc, bb, HID_DIM), jnp.float32),
            jax.ShapeDtypeStruct((num_bc, bb, HID_DIM), jnp.float32),
        ),
        grid_spec=pltpu.PrefetchScalarGridSpec(
            num_scalar_prefetch=0,
            grid=(num_bc, num_tc),
            in_specs=[
                pl.BlockSpec((None, tc, bb, IN_DIM), lambda b, t: (b, t, 0, 0)),
                pl.BlockSpec((None, bb, HID_DIM), lambda b, t: (b, 0, 0)),
                pl.BlockSpec((None, bb, HID_DIM), lambda b, t: (b, 0, 0)),
                pl.BlockSpec((IN_DIM, FC1_DIM), lambda b, t: (0, 0)),
                pl.BlockSpec((1, FC1_DIM), lambda b, t: (0, 0)),
                pl.BlockSpec((FC1_DIM, 4 * HID_DIM), lambda b, t: (0, 0)),
                pl.BlockSpec((HID_DIM, 4 * HID_DIM), lambda b, t: (0, 0)),
                pl.BlockSpec((1, 4 * HID_DIM), lambda b, t: (0, 0)),
                pl.BlockSpec((HID_DIM, OUT_PAD), lambda b, t: (0, 0)),
                pl.BlockSpec((1, OUT_PAD), lambda b, t: (0, 0)),
            ],
            out_specs=[
                pl.BlockSpec((None, tc, bb, OUT_PAD), lambda b, t: (b, t, 0, 0)),
                pl.BlockSpec((None, bb, HID_DIM), lambda b, t: (b, 0, 0)),
                pl.BlockSpec((None, bb, HID_DIM), lambda b, t: (b, 0, 0)),
            ],
            scratch_shapes=[pltpu.VMEM((tc * bb, 4 * HID_DIM), jnp.float32)],
        ),
        compiler_params=pltpu.CompilerParams(
            dimension_semantics=("parallel", "arbitrary"),
            vmem_limit_bytes=32 * 1024 * 1024),
        cost_estimate=pl.CostEstimate(flops=flops,
                                      transcendentals=transcendentals,
                                      bytes_accessed=bytes_accessed),
    )(x_blk, h0, c0, w1t, b1, wiht, whht, blstm, w2t_pad, b2_pad)

    y = jnp.transpose(y_blk[..., :OUT_DIM], (0, 2, 1, 3))   # (num_bc, BB, Tp, 3)
    y = y.reshape(bp, tp, OUT_DIM)[:B, :T]
    hidden_out = (h_n.reshape(bp, HID_DIM)[None, :B, :],
                  c_n.reshape(bp, HID_DIM)[None, :B, :])
    return y, hidden_out


def init_params(key):
    """Deterministic PyTorch-style uniform init. Returns kernel-layout params."""
    ks = jax.random.split(key, 8)

    def unif(k, shape, fan_in):
        bound = 1.0 / np.sqrt(fan_in)
        return jax.random.uniform(k, shape, jnp.float32, -bound, bound)

    # PyTorch native shapes
    w1 = unif(ks[0], (FC1_DIM, IN_DIM), IN_DIM)          # fc1.weight
    b1 = unif(ks[1], (FC1_DIM,), IN_DIM)                 # fc1.bias
    wih = unif(ks[2], (4 * HID_DIM, FC1_DIM), HID_DIM)   # lstm.weight_ih_l0
    whh = unif(ks[3], (4 * HID_DIM, HID_DIM), HID_DIM)   # lstm.weight_hh_l0
    bih = unif(ks[4], (4 * HID_DIM,), HID_DIM)
    bhh = unif(ks[5], (4 * HID_DIM,), HID_DIM)
    w2 = unif(ks[6], (OUT_DIM, HID_DIM), HID_DIM)        # fc2.weight
    b2 = unif(ks[7], (OUT_DIM,), HID_DIM)                # fc2.bias

    # Kernel layout: transposed weights, 2-D biases, fused LSTM bias, and
    # fc2 zero-padded to OUT_PAD lanes for lane-dense output stores.
    w2t_pad = jnp.zeros((HID_DIM, OUT_PAD), jnp.float32).at[:, :OUT_DIM].set(w2.T)
    b2_pad = jnp.zeros((1, OUT_PAD), jnp.float32).at[0, :OUT_DIM].set(b2)
    return (
        w1.T,                       # (2, 64)
        b1[None, :],                # (1, 64)
        wih.T,                      # (64, 512)
        whh.T,                      # (128, 512)
        (bih + bhh)[None, :],       # (1, 512)
        w2t_pad,                    # (128, 128)
        b2_pad,                     # (1, 128)
    )


def reference_forward(x, params, hidden=None):
    """Pure-JAX reference mirroring the PyTorch forward."""
    w1t, b1, wiht, whht, blstm, w2t_pad, b2_pad = params
    w2t = w2t_pad[:, :OUT_DIM]
    b2 = b2_pad[0, :OUT_DIM]
    B, T, _ = x.shape
    a1 = jnp.maximum(x @ w1t + b1[0], 0.0)  # (B, T, 64)

    if hidden is None:
        h0 = jnp.zeros((B, HID_DIM), jnp.float32)
        c0 = jnp.zeros((B, HID_DIM), jnp.float32)
    else:
        h0, c0 = hidden[0][0], hidden[1][0]

    def step(carry, a_t):
        h, c = carry
        gates = a_t @ wiht + h @ whht + blstm[0]
        i = jax.nn.sigmoid(gates[:, 0 * HID_DIM:1 * HID_DIM])
        f = jax.nn.sigmoid(gates[:, 1 * HID_DIM:2 * HID_DIM])
        g = jnp.tanh(gates[:, 2 * HID_DIM:3 * HID_DIM])
        o = jax.nn.sigmoid(gates[:, 3 * HID_DIM:4 * HID_DIM])
        c = f * c + i * g
        h = o * jnp.tanh(c)
        return (h, c), h @ w2t + b2

    (h_n, c_n), ys = lax.scan(step, (h0, c0), jnp.transpose(a1, (1, 0, 2)))
    return jnp.transpose(ys, (1, 0, 2)), (h_n[None], c_n[None])


if __name__ == "__main__":
    key = jax.random.PRNGKey(0)
    pkey, xkey = jax.random.split(key)
    params = init_params(pkey)

    B, T = 2, 8
    x = jax.random.normal(xkey, (B, T, IN_DIM), jnp.float32)

    fwd = jax.jit(drqn_forward)

    # hidden = None path (matches PyTorch forward default)
    y, (h_n, c_n) = fwd(x, params)
    jax.block_until_ready((y, h_n, c_n))

    y_ref, (h_ref, c_ref) = reference_forward(x, params)
    np.testing.assert_allclose(np.asarray(y), np.asarray(y_ref), rtol=1e-5, atol=1e-5)
    np.testing.assert_allclose(np.asarray(h_n), np.asarray(h_ref), rtol=1e-5, atol=1e-5)
    np.testing.assert_allclose(np.asarray(c_n), np.asarray(c_ref), rtol=1e-5, atol=1e-5)

    # explicit-hidden path (second PyTorch branch)
    y2, (h2, c2) = fwd(x, params, (h_n, c_n))
    jax.block_until_ready((y2, h2, c2))
    y2_ref, (h2_ref, c2_ref) = reference_forward(x, params, (h_ref, c_ref))
    np.testing.assert_allclose(np.asarray(y2), np.asarray(y2_ref), rtol=1e-5, atol=1e-5)
    np.testing.assert_allclose(np.asarray(h2), np.asarray(h2_ref), rtol=1e-5, atol=1e-5)
    np.testing.assert_allclose(np.asarray(c2), np.asarray(c2_ref), rtol=1e-5, atol=1e-5)

    assert y.shape == (B, T, OUT_DIM)
    assert h_n.shape == (1, B, HID_DIM) and c_n.shape == (1, B, HID_DIM)
    print("KERNEL_OK")
</pallas_src>

<mosaic_0001>
module attributes {stable_mosaic.version = 11 : i64} {
  func.func @_drqn_kernel(%arg0: i32, %arg1: i32, %arg2: memref<1x8x8x2xf32, #tpu.memory_space<vmem>>, %arg3: memref<1x8x128xf32, #tpu.memory_space<vmem>>, %arg4: memref<1x8x128xf32, #tpu.memory_space<vmem>>, %arg5: memref<2x64xf32, #tpu.memory_space<vmem>>, %arg6: memref<1x64xf32, #tpu.memory_space<vmem>>, %arg7: memref<64x512xf32, #tpu.memory_space<vmem>>, %arg8: memref<128x512xf32, #tpu.memory_space<vmem>>, %arg9: memref<1x512xf32, #tpu.memory_space<vmem>>, %arg10: memref<128x128xf32, #tpu.memory_space<vmem>>, %arg11: memref<1x128xf32, #tpu.memory_space<vmem>>, %arg12: memref<1x8x8x128xf32, #tpu.memory_space<vmem>>, %arg13: memref<1x8x128xf32, #tpu.memory_space<vmem>>, %arg14: memref<1x8x128xf32, #tpu.memory_space<vmem>>, %arg15: memref<64x512xf32, #tpu.memory_space<vmem>>) attributes {dimension_semantics = [#tpu.dimension_semantics<parallel>, #tpu.dimension_semantics<arbitrary>], iteration_bounds = array<i64: 1, 1>, scalar_prefetch = 0 : i64, scratch_operands = 1 : i64, tpu.core_type = #tpu.core_type<tc>, window_params = [{transform_indices = @transform_0, window_bounds = array<i64: 1, 8, 8, 2>}, {transform_indices = @transform_1, window_bounds = array<i64: 1, 8, 128>}, {transform_indices = @transform_2, window_bounds = array<i64: 1, 8, 128>}, {pipeline_mode = #tpu.pipeline_mode<synchronous>, transform_indices = @transform_3, window_bounds = array<i64: 2, 64>}, {pipeline_mode = #tpu.pipeline_mode<synchronous>, transform_indices = @transform_4, window_bounds = array<i64: 1, 64>}, {pipeline_mode = #tpu.pipeline_mode<synchronous>, transform_indices = @transform_5, window_bounds = array<i64: 64, 512>}, {pipeline_mode = #tpu.pipeline_mode<synchronous>, transform_indices = @transform_6, window_bounds = array<i64: 128, 512>}, {pipeline_mode = #tpu.pipeline_mode<synchronous>, transform_indices = @transform_7, window_bounds = array<i64: 1, 512>}, {pipeline_mode = #tpu.pipeline_mode<synchronous>, transform_indices = @transform_8, window_bounds = array<i64: 128, 128>}, {pipeline_mode = #tpu.pipeline_mode<synchronous>, transform_indices = @transform_9, window_bounds = array<i64: 1, 128>}, {transform_indices = @transform_10, window_bounds = array<i64: 1, 8, 8, 128>}, {transform_indices = @transform_11, window_bounds = array<i64: 1, 8, 128>}, {transform_indices = @transform_12, window_bounds = array<i64: 1, 8, 128>}]} {
    %c0_i32 = arith.constant 0 : i32
    %0 = arith.cmpi eq, %arg1, %c0_i32 : i32
    %1 = arith.extui %0 : i1 to i32
    %c0_i32_0 = arith.constant 0 : i32
    %2 = arith.cmpi ne, %1, %c0_i32_0 : i32
    scf.if %2 {
      %c0_98 = arith.constant 0 : index
      %c0_99 = arith.constant 0 : index
      %c0_100 = arith.constant 0 : index
      %313 = vector.load %arg3[%c0_98, %c0_99, %c0_100] : memref<1x8x128xf32, #tpu.memory_space<vmem>>, vector<1x8x128xf32>
      %314 = vector.shape_cast %313 : vector<1x8x128xf32> to vector<8x128xf32>
      %c0_101 = arith.constant 0 : index
      %c0_102 = arith.constant 0 : index
      %c0_103 = arith.constant 0 : index
      %315 = vector.load %arg13[%c0_101, %c0_102, %c0_103] : memref<1x8x128xf32, #tpu.memory_space<vmem>>, vector<1x8x128xf32>
      %316 = vector.shape_cast %315 : vector<1x8x128xf32> to vector<8x128xf32>
      %317 = vector.shape_cast %314 : vector<8x128xf32> to vector<1x8x128xf32>
      tpu.vector_store %arg13[%c0_101, %c0_102, %c0_103], %317 {strides = array<i32>} : memref<1x8x128xf32, #tpu.memory_space<vmem>>, vector<1x8x128xf32>,
      %c0_104 = arith.constant 0 : index
      %c0_105 = arith.constant 0 : index
      %c0_106 = arith.constant 0 : index
      %318 = vector.load %arg4[%c0_104, %c0_105, %c0_106] : memref<1x8x128xf32, #tpu.memory_space<vmem>>, vector<1x8x128xf32>
      %319 = vector.shape_cast %318 : vector<1x8x128xf32> to vector<8x128xf32>
      %c0_107 = arith.constant 0 : index
      %c0_108 = arith.constant 0 : index
      %c0_109 = arith.constant 0 : index
      %320 = vector.load %arg14[%c0_107, %c0_108, %c0_109] : memref<1x8x128xf32, #tpu.memory_space<vmem>>, vector<1x8x128xf32>
      %321 = vector.shape_cast %320 : vector<1x8x128xf32> to vector<8x128xf32>
      %322 = vector.shape_cast %319 : vector<8x128xf32> to vector<1x8x128xf32>
      tpu.vector_store %arg14[%c0_107, %c0_108, %c0_109], %322 {strides = array<i32>} : memref<1x8x128xf32, #tpu.memory_space<vmem>>, vector<1x8x128xf32>,
    } else {
    }
    %c0 = arith.constant 0 : index
    %c0_1 = arith.constant 0 : index
    %c0_2 = arith.constant 0 : index
    %c0_3 = arith.constant 0 : index
    %3 = vector.load %arg2[%c0, %c0_1, %c0_2, %c0_3] : memref<1x8x8x2xf32, #tpu.memory_space<vmem>>, vector<1x8x8x2xf32>
    %4 = vector.shape_cast %3 : vector<1x8x8x2xf32> to vector<8x8x2xf32>
    %5 = vector.shape_cast %4 : vector<8x8x2xf32> to vector<64x2xf32>
    %6 = vector.extract_strided_slice %5 {offsets = [0, 0], sizes = [64, 1], strides = [1, 1]} : vector<64x2xf32> to vector<64x1xf32>
    %c0_4 = arith.constant 0 : index
    %c0_5 = arith.constant 0 : index
    %7 = vector.load %arg5[%c0_4, %c0_5] : memref<2x64xf32, #tpu.memory_space<vmem>>, vector<1x64xf32>
    %8 = vector.broadcast %6 : vector<64x1xf32> to vector<64x64xf32>
    %9 = vector.broadcast %7 : vector<1x64xf32> to vector<64x64xf32>
    %10 = arith.mulf %8, %9 : vector<64x64xf32>
    %11 = vector.extract_strided_slice %5 {offsets = [0, 1], sizes = [64, 1], strides = [1, 1]} : vector<64x2xf32> to vector<64x1xf32>
    %c1 = arith.constant 1 : index
    %c0_6 = arith.constant 0 : index
    %12 = vector.load %arg5[%c1, %c0_6] : memref<2x64xf32, #tpu.memory_space<vmem>>, vector<1x64xf32>
    %13 = vector.broadcast %11 : vector<64x1xf32> to vector<64x64xf32>
    %14 = vector.broadcast %12 : vector<1x64xf32> to vector<64x64xf32>
    %15 = arith.mulf %13, %14 : vector<64x64xf32>
    %16 = arith.addf %10, %15 : vector<64x64xf32>
    %c0_7 = arith.constant 0 : index
    %c0_8 = arith.constant 0 : index
    %17 = vector.load %arg6[%c0_7, %c0_8] : memref<1x64xf32, #tpu.memory_space<vmem>>, vector<1x64xf32>
    %18 = vector.broadcast %17 : vector<1x64xf32> to vector<64x64xf32>
    %19 = arith.addf %16, %18 : vector<64x64xf32>
    %cst = arith.constant 0.000000e+00 : f32
    %20 = vector.broadcast %cst : f32 to vector<64x64xf32>
    %21 = arith.maximumf %19, %20 : vector<64x64xf32>
    %c0_9 = arith.constant 0 : index
    %c0_10 = arith.constant 0 : index
    %22 = vector.load %arg7[%c0_9, %c0_10] : memref<64x512xf32, #tpu.memory_space<vmem>>, vector<64x512xf32>
    %cst_11 = arith.constant dense<0.000000e+00> : vector<64x512xf32>
    %23 = tpu.matmul %21, %22, %cst_11 {dimension_numbers = #tpu.dot_dimension_numbers<[1], [0], [0], [1], [0, 0, 1, 1], [], []>} : vector<64x64xf32>, vector<64x512xf32>, vector<64x512xf32> -> vector<64x512xf32>
    %c0_12 = arith.constant 0 : index
    %c0_13 = arith.constant 0 : index
    %24 = vector.load %arg9[%c0_12, %c0_13] : memref<1x512xf32, #tpu.memory_space<vmem>>, vector<1x512xf32>
    %25 = vector.broadcast %24 : vector<1x512xf32> to vector<64x512xf32>
    %26 = arith.addf %23, %25 : vector<64x512xf32>
    %c0_14 = arith.constant 0 : index
    %c0_15 = arith.constant 0 : index
    %27 = vector.load %arg15[%c0_14, %c0_15] : memref<64x512xf32, #tpu.memory_space<vmem>>, vector<64x512xf32>
    tpu.vector_store %arg15[%c0_14, %c0_15], %26 {strides = array<i32>} : memref<64x512xf32, #tpu.memory_space<vmem>>, vector<64x512xf32>,
    %c0_16 = arith.constant 0 : index
    %c0_17 = arith.constant 0 : index
    %28 = vector.load %arg8[%c0_16, %c0_17] : memref<128x512xf32, #tpu.memory_space<vmem>>, vector<128x512xf32>
    %c0_18 = arith.constant 0 : index
    %c0_19 = arith.constant 0 : index
    %c0_20 = arith.constant 0 : index
    %29 = vector.load %arg13[%c0_18, %c0_19, %c0_20] : memref<1x8x128xf32, #tpu.memory_space<vmem>>, vector<1x8x128xf32>
    %30 = vector.shape_cast %29 : vector<1x8x128xf32> to vector<8x128xf32>
    %c0_21 = arith.constant 0 : index
    %c0_22 = arith.constant 0 : index
    %c0_23 = arith.constant 0 : index
    %31 = vector.load %arg14[%c0_21, %c0_22, %c0_23] : memref<1x8x128xf32, #tpu.memory_space<vmem>>, vector<1x8x128xf32>
    %32 = vector.shape_cast %31 : vector<1x8x128xf32> to vector<8x128xf32>
    %c0_i32_24 = arith.constant 0 : i32
    %c8_i32 = arith.constant 8 : i32
    %33 = arith.muli %c0_i32_24, %c8_i32 : i32
    %34 = tpu.assume_multiple %33, 8 : i32
    %35 = arith.index_cast %34 : i32 to index
    %c0_25 = arith.constant 0 : index
    %36 = vector.load %arg15[%35, %c0_25] : memref<64x512xf32, #tpu.memory_space<vmem>>, vector<8x512xf32>
    %cst_26 = arith.constant dense<0.000000e+00> : vector<8x512xf32>
    %37 = tpu.matmul %30, %28, %cst_26 {dimension_numbers = #tpu.dot_dimension_numbers<[1], [0], [0], [1], [0, 0, 1, 1], [], []>} : vector<8x128xf32>, vector<128x512xf32>, vector<8x512xf32> -> vector<8x512xf32>
    %38 = arith.addf %36, %37 : vector<8x512xf32>
    %39 = vector.extract_strided_slice %38 {offsets = [0, 0], sizes = [8, 128], strides = [1, 1]} : vector<8x512xf32> to vector<8x128xf32>
    %40 = arith.negf %39 : vector<8x128xf32>
    %41 = math.exp %40 : vector<8x128xf32>
    %cst_27 = arith.constant 1.000000e+00 : f32
    %42 = vector.broadcast %cst_27 : f32 to vector<8x128xf32>
    %43 = arith.addf %42, %41 : vector<8x128xf32>
    %44 = arith.divf %42, %43 : vector<8x128xf32>
    %45 = vector.extract_strided_slice %38 {offsets = [0, 128], sizes = [8, 128], strides = [1, 1]} : vector<8x512xf32> to vector<8x128xf32>
    %46 = arith.negf %45 : vector<8x128xf32>
    %47 = math.exp %46 : vector<8x128xf32>
    %cst_28 = arith.constant 1.000000e+00 : f32
    %48 = vector.broadcast %cst_28 : f32 to vector<8x128xf32>
    %49 = arith.addf %48, %47 : vector<8x128xf32>
    %50 = arith.divf %48, %49 : vector<8x128xf32>
    %51 = vector.extract_strided_slice %38 {offsets = [0, 256], sizes = [8, 128], strides = [1, 1]} : vector<8x512xf32> to vector<8x128xf32>
    %52 = math.tanh %51 : vector<8x128xf32>
    %53 = vector.extract_strided_slice %38 {offsets = [0, 384], sizes = [8, 128], strides = [1, 1]} : vector<8x512xf32> to vector<8x128xf32>
    %54 = arith.negf %53 : vector<8x128xf32>
    %55 = math.exp %54 : vector<8x128xf32>
    %cst_29 = arith.constant 1.000000e+00 : f32
    %56 = vector.broadcast %cst_29 : f32 to vector<8x128xf32>
    %57 = arith.addf %56, %55 : vector<8x128xf32>
    %58 = arith.divf %56, %57 : vector<8x128xf32>
    %59 = arith.mulf %50, %32 : vector<8x128xf32>
    %60 = arith.mulf %44, %52 : vector<8x128xf32>
    %61 = arith.addf %59, %60 : vector<8x128xf32>
    %62 = math.tanh %61 : vector<8x128xf32>
    %63 = arith.mulf %58, %62 : vector<8x128xf32>
    %64 = arith.index_cast %34 : i32 to index
    %c0_30 = arith.constant 0 : index
    %65 = vector.load %arg15[%64, %c0_30] : memref<64x512xf32, #tpu.memory_space<vmem>>, vector<8x128xf32>
    tpu.vector_store %arg15[%64, %c0_30], %63 {strides = array<i32>} : memref<64x512xf32, #tpu.memory_space<vmem>>, vector<8x128xf32>,
    %c1_i32 = arith.constant 1 : i32
    %c8_i32_31 = arith.constant 8 : i32
    %66 = arith.muli %c1_i32, %c8_i32_31 : i32
    %67 = tpu.assume_multiple %66, 8 : i32
    %68 = arith.index_cast %67 : i32 to index
    %c0_32 = arith.constant 0 : index
    %69 = vector.load %arg15[%68, %c0_32] : memref<64x512xf32, #tpu.memory_space<vmem>>, vector<8x512xf32>
    %cst_33 = arith.constant dense<0.000000e+00> : vector<8x512xf32>
    %70 = tpu.matmul %63, %28, %cst_33 {dimension_numbers = #tpu.dot_dimension_numbers<[1], [0], [0], [1], [0, 0, 1, 1], [], []>} : vector<8x128xf32>, vector<128x512xf32>, vector<8x512xf32> -> vector<8x512xf32>
    %71 = arith.addf %69, %70 : vector<8x512xf32>
    %72 = vector.extract_strided_slice %71 {offsets = [0, 0], sizes = [8, 128], strides = [1, 1]} : vector<8x512xf32> to vector<8x128xf32>
    %73 = arith.negf %72 : vector<8x128xf32>
    %74 = math.exp %73 : vector<8x128xf32>
    %cst_34 = arith.constant 1.000000e+00 : f32
    %75 = vector.broadcast %cst_34 : f32 to vector<8x128xf32>
    %76 = arith.addf %75, %74 : vector<8x128xf32>
    %77 = arith.divf %75, %76 : vector<8x128xf32>
    %78 = vector.extract_strided_slice %71 {offsets = [0, 128], sizes = [8, 128], strides = [1, 1]} : vector<8x512xf32> to vector<8x128xf32>
    %79 = arith.negf %78 : vector<8x128xf32>
    %80 = math.exp %79 : vector<8x128xf32>
    %cst_35 = arith.constant 1.000000e+00 : f32
    %81 = vector.broadcast %cst_35 : f32 to vector<8x128xf32>
    %82 = arith.addf %81, %80 : vector<8x128xf32>
    %83 = arith.divf %81, %82 : vector<8x128xf32>
    %84 = vector.extract_strided_slice %71 {offsets = [0, 256], sizes = [8, 128], strides = [1, 1]} : vector<8x512xf32> to vector<8x128xf32>
    %85 = math.tanh %84 : vector<8x128xf32>
    %86 = vector.extract_strided_slice %71 {offsets = [0, 384], sizes = [8, 128], strides = [1, 1]} : vector<8x512xf32> to vector<8x128xf32>
    %87 = arith.negf %86 : vector<8x128xf32>
    %88 = math.exp %87 : vector<8x128xf32>
    %cst_36 = arith.constant 1.000000e+00 : f32
    %89 = vector.broadcast %cst_36 : f32 to vector<8x128xf32>
    %90 = arith.addf %89, %88 : vector<8x128xf32>
    %91 = arith.divf %89, %90 : vector<8x128xf32>
    %92 = arith.mulf %83, %61 : vector<8x128xf32>
    %93 = arith.mulf %77, %85 : vector<8x128xf32>
    %94 = arith.addf %92, %93 : vector<8x128xf32>
    %95 = math.tanh %94 : vector<8x128xf32>
    %96 = arith.mulf %91, %95 : vector<8x128xf32>
    %97 = arith.index_cast %67 : i32 to index
    %c0_37 = arith.constant 0 : index
    %98 = vector.load %arg15[%97, %c0_37] : memref<64x512xf32, #tpu.memory_space<vmem>>, vector<8x128xf32>
    tpu.vector_store %arg15[%97, %c0_37], %96 {strides = array<i32>} : memref<64x512xf32, #tpu.memory_space<vmem>>, vector<8x128xf32>,
    %c2_i32 = arith.constant 2 : i32
    %c8_i32_38 = arith.constant 8 : i32
    %99 = arith.muli %c2_i32, %c8_i32_38 : i32
    %100 = tpu.assume_multiple %99, 8 : i32
    %101 = arith.index_cast %100 : i32 to index
    %c0_39 = arith.constant 0 : index
    %102 = vector.load %arg15[%101, %c0_39] : memref<64x512xf32, #tpu.memory_space<vmem>>, vector<8x512xf32>
    %cst_40 = arith.constant dense<0.000000e+00> : vector<8x512xf32>
    %103 = tpu.matmul %96, %28, %cst_40 {dimension_numbers = #tpu.dot_dimension_numbers<[1], [0], [0], [1], [0, 0, 1, 1], [], []>} : vector<8x128xf32>, vector<128x512xf32>, vector<8x512xf32> -> vector<8x512xf32>
    %104 = arith.addf %102, %103 : vector<8x512xf32>
    %105 = vector.extract_strided_slice %104 {offsets = [0, 0], sizes = [8, 128], strides = [1, 1]} : vector<8x512xf32> to vector<8x128xf32>
    %106 = arith.negf %105 : vector<8x128xf32>
    %107 = math.exp %106 : vector<8x128xf32>
    %cst_41 = arith.constant 1.000000e+00 : f32
    %108 = vector.broadcast %cst_41 : f32 to vector<8x128xf32>
    %109 = arith.addf %108, %107 : vector<8x128xf32>
    %110 = arith.divf %108, %109 : vector<8x128xf32>
    %111 = vector.extract_strided_slice %104 {offsets = [0, 128], sizes = [8, 128], strides = [1, 1]} : vector<8x512xf32> to vector<8x128xf32>
    %112 = arith.negf %111 : vector<8x128xf32>
    %113 = math.exp %112 : vector<8x128xf32>
    %cst_42 = arith.constant 1.000000e+00 : f32
    %114 = vector.broadcast %cst_42 : f32 to vector<8x128xf32>
    %115 = arith.addf %114, %113 : vector<8x128xf32>
    %116 = arith.divf %114, %115 : vector<8x128xf32>
    %117 = vector.extract_strided_slice %104 {offsets = [0, 256], sizes = [8, 128], strides = [1, 1]} : vector<8x512xf32> to vector<8x128xf32>
    %118 = math.tanh %117 : vector<8x128xf32>
    %119 = vector.extract_strided_slice %104 {offsets = [0, 384], sizes = [8, 128], strides = [1, 1]} : vector<8x512xf32> to vector<8x128xf32>
    %120 = arith.negf %119 : vector<8x128xf32>
    %121 = math.exp %120 : vector<8x128xf32>
    %cst_43 = arith.constant 1.000000e+00 : f32
    %122 = vector.broadcast %cst_43 : f32 to vector<8x128xf32>
    %123 = arith.addf %122, %121 : vector<8x128xf32>
    %124 = arith.divf %122, %123 : vector<8x128xf32>
    %125 = arith.mulf %116, %94 : vector<8x128xf32>
    %126 = arith.mulf %110, %118 : vector<8x128xf32>
    %127 = arith.addf %125, %126 : vector<8x128xf32>
    %128 = math.tanh %127 : vector<8x128xf32>
    %129 = arith.mulf %124, %128 : vector<8x128xf32>
    %130 = arith.index_cast %100 : i32 to index
    %c0_44 = arith.constant 0 : index
    %131 = vector.load %arg15[%130, %c0_44] : memref<64x512xf32, #tpu.memory_space<vmem>>, vector<8x128xf32>
    tpu.vector_store %arg15[%130, %c0_44], %129 {strides = array<i32>} : memref<64x512xf32, #tpu.memory_space<vmem>>, vector<8x128xf32>,
    %c3_i32 = arith.constant 3 : i32
    %c8_i32_45 = arith.constant 8 : i32
    %132 = arith.muli %c3_i32, %c8_i32_45 : i32
    %133 = tpu.assume_multiple %132, 8 : i32
    %134 = arith.index_cast %133 : i32 to index
    %c0_46 = arith.constant 0 : index
    %135 = vector.load %arg15[%134, %c0_46] : memref<64x512xf32, #tpu.memory_space<vmem>>, vector<8x512xf32>
    %cst_47 = arith.constant dense<0.000000e+00> : vector<8x512xf32>
    %136 = tpu.matmul %129, %28, %cst_47 {dimension_numbers = #tpu.dot_dimension_numbers<[1], [0], [0], [1], [0, 0, 1, 1], [], []>} : vector<8x128xf32>, vector<128x512xf32>, vector<8x512xf32> -> vector<8x512xf32>
    %137 = arith.addf %135, %136 : vector<8x512xf32>
    %138 = vector.extract_strided_slice %137 {offsets = [0, 0], sizes = [8, 128], strides = [1, 1]} : vector<8x512xf32> to vector<8x128xf32>
    %139 = arith.negf %138 : vector<8x128xf32>
    %140 = math.exp %139 : vector<8x128xf32>
    %cst_48 = arith.constant 1.000000e+00 : f32
    %141 = vector.broadcast %cst_48 : f32 to vector<8x128xf32>
    %142 = arith.addf %141, %140 : vector<8x128xf32>
    %143 = arith.divf %141, %142 : vector<8x128xf32>
    %144 = vector.extract_strided_slice %137 {offsets = [0, 128], sizes = [8, 128], strides = [1, 1]} : vector<8x512xf32> to vector<8x128xf32>
    %145 = arith.negf %144 : vector<8x128xf32>
    %146 = math.exp %145 : vector<8x128xf32>
    %cst_49 = arith.constant 1.000000e+00 : f32
    %147 = vector.broadcast %cst_49 : f32 to vector<8x128xf32>
    %148 = arith.addf %147, %146 : vector<8x128xf32>
    %149 = arith.divf %147, %148 : vector<8x128xf32>
    %150 = vector.extract_strided_slice %137 {offsets = [0, 256], sizes = [8, 128], strides = [1, 1]} : vector<8x512xf32> to vector<8x128xf32>
    %151 = math.tanh %150 : vector<8x128xf32>
    %152 = vector.extract_strided_slice %137 {offsets = [0, 384], sizes = [8, 128], strides = [1, 1]} : vector<8x512xf32> to vector<8x128xf32>
    %153 = arith.negf %152 : vector<8x128xf32>
    %154 = math.exp %153 : vector<8x128xf32>
    %cst_50 = arith.constant 1.000000e+00 : f32
    %155 = vector.broadcast %cst_50 : f32 to vector<8x128xf32>
    %156 = arith.addf %155, %154 : vector<8x128xf32>
    %157 = arith.divf %155, %156 : vector<8x128xf32>
    %158 = arith.mulf %149, %127 : vector<8x128xf32>
    %159 = arith.mulf %143, %151 : vector<8x128xf32>
    %160 = arith.addf %158, %159 : vector<8x128xf32>
    %161 = math.tanh %160 : vector<8x128xf32>
    %162 = arith.mulf %157, %161 : vector<8x128xf32>
    %163 = arith.index_cast %133 : i32 to index
    %c0_51 = arith.constant 0 : index
    %164 = vector.load %arg15[%163, %c0_51] : memref<64x512xf32, #tpu.memory_space<vmem>>, vector<8x128xf32>
    tpu.vector_store %arg15[%163, %c0_51], %162 {strides = array<i32>} : memref<64x512xf32, #tpu.memory_space<vmem>>, vector<8x128xf32>,
    %c4_i32 = arith.constant 4 : i32
    %c8_i32_52 = arith.constant 8 : i32
    %165 = arith.muli %c4_i32, %c8_i32_52 : i32
    %166 = tpu.assume_multiple %165, 8 : i32
    %167 = arith.index_cast %166 : i32 to index
    %c0_53 = arith.constant 0 : index
    %168 = vector.load %arg15[%167, %c0_53] : memref<64x512xf32, #tpu.memory_space<vmem>>, vector<8x512xf32>
    %cst_54 = arith.constant dense<0.000000e+00> : vector<8x512xf32>
    %169 = tpu.matmul %162, %28, %cst_54 {dimension_numbers = #tpu.dot_dimension_numbers<[1], [0], [0], [1], [0, 0, 1, 1], [], []>} : vector<8x128xf32>, vector<128x512xf32>, vector<8x512xf32> -> vector<8x512xf32>
    %170 = arith.addf %168, %169 : vector<8x512xf32>
    %171 = vector.extract_strided_slice %170 {offsets = [0, 0], sizes = [8, 128], strides = [1, 1]} : vector<8x512xf32> to vector<8x128xf32>
    %172 = arith.negf %171 : vector<8x128xf32>
    %173 = math.exp %172 : vector<8x128xf32>
    %cst_55 = arith.constant 1.000000e+00 : f32
    %174 = vector.broadcast %cst_55 : f32 to vector<8x128xf32>
    %175 = arith.addf %174, %173 : vector<8x128xf32>
    %176 = arith.divf %174, %175 : vector<8x128xf32>
    %177 = vector.extract_strided_slice %170 {offsets = [0, 128], sizes = [8, 128], strides = [1, 1]} : vector<8x512xf32> to vector<8x128xf32>
    %178 = arith.negf %177 : vector<8x128xf32>
    %179 = math.exp %178 : vector<8x128xf32>
    %cst_56 = arith.constant 1.000000e+00 : f32
    %180 = vector.broadcast %cst_56 : f32 to vector<8x128xf32>
    %181 = arith.addf %180, %179 : vector<8x128xf32>
    %182 = arith.divf %180, %181 : vector<8x128xf32>
    %183 = vector.extract_strided_slice %170 {offsets = [0, 256], sizes = [8, 128], strides = [1, 1]} : vector<8x512xf32> to vector<8x128xf32>
    %184 = math.tanh %183 : vector<8x128xf32>
    %185 = vector.extract_strided_slice %170 {offsets = [0, 384], sizes = [8, 128], strides = [1, 1]} : vector<8x512xf32> to vector<8x128xf32>
    %186 = arith.negf %185 : vector<8x128xf32>
    %187 = math.exp %186 : vector<8x128xf32>
    %cst_57 = arith.constant 1.000000e+00 : f32
    %188 = vector.broadcast %cst_57 : f32 to vector<8x128xf32>
    %189 = arith.addf %188, %187 : vector<8x128xf32>
    %190 = arith.divf %188, %189 : vector<8x128xf32>
    %191 = arith.mulf %182, %160 : vector<8x128xf32>
    %192 = arith.mulf %176, %184 : vector<8x128xf32>
    %193 = arith.addf %191, %192 : vector<8x128xf32>
    %194 = math.tanh %193 : vector<8x128xf32>
    %195 = arith.mulf %190, %194 : vector<8x128xf32>
    %196 = arith.index_cast %166 : i32 to index
    %c0_58 = arith.constant 0 : index
    %197 = vector.load %arg15[%196, %c0_58] : memref<64x512xf32, #tpu.memory_space<vmem>>, vector<8x128xf32>
    tpu.vector_store %arg15[%196, %c0_58], %195 {strides = array<i32>} : memref<64x512xf32, #tpu.memory_space<vmem>>, vector<8x128xf32>,
    %c5_i32 = arith.constant 5 : i32
    %c8_i32_59 = arith.constant 8 : i32
    %198 = arith.muli %c5_i32, %c8_i32_59 : i32
    %199 = tpu.assume_multiple %198, 8 : i32
    %200 = arith.index_cast %199 : i32 to index
    %c0_60 = arith.constant 0 : index
    %201 = vector.load %arg15[%200, %c0_60] : memref<64x512xf32, #tpu.memory_space<vmem>>, vector<8x512xf32>
    %cst_61 = arith.constant dense<0.000000e+00> : vector<8x512xf32>
    %202 = tpu.matmul %195, %28, %cst_61 {dimension_numbers = #tpu.dot_dimension_numbers<[1], [0], [0], [1], [0, 0, 1, 1], [], []>} : vector<8x128xf32>, vector<128x512xf32>, vector<8x512xf32> -> vector<8x512xf32>
    %203 = arith.addf %201, %202 : vector<8x512xf32>
    %204 = vector.extract_strided_slice %203 {offsets = [0, 0], sizes = [8, 128], strides = [1, 1]} : vector<8x512xf32> to vector<8x128xf32>
    %205 = arith.negf %204 : vector<8x128xf32>
    %206 = math.exp %205 : vector<8x128xf32>
    %cst_62 = arith.constant 1.000000e+00 : f32
    %207 = vector.broadcast %cst_62 : f32 to vector<8x128xf32>
    %208 = arith.addf %207, %206 : vector<8x128xf32>
    %209 = arith.divf %207, %208 : vector<8x128xf32>
    %210 = vector.extract_strided_slice %203 {offsets = [0, 128], sizes = [8, 128], strides = [1, 1]} : vector<8x512xf32> to vector<8x128xf32>
    %211 = arith.negf %210 : vector<8x128xf32>
    %212 = math.exp %211 : vector<8x128xf32>
    %cst_63 = arith.constant 1.000000e+00 : f32
    %213 = vector.broadcast %cst_63 : f32 to vector<8x128xf32>
    %214 = arith.addf %213, %212 : vector<8x128xf32>
    %215 = arith.divf %213, %214 : vector<8x128xf32>
    %216 = vector.extract_strided_slice %203 {offsets = [0, 256], sizes = [8, 128], strides = [1, 1]} : vector<8x512xf32> to vector<8x128xf32>
    %217 = math.tanh %216 : vector<8x128xf32>
    %218 = vector.extract_strided_slice %203 {offsets = [0, 384], sizes = [8, 128], strides = [1, 1]} : vector<8x512xf32> to vector<8x128xf32>
    %219 = arith.negf %218 : vector<8x128xf32>
    %220 = math.exp %219 : vector<8x128xf32>
    %cst_64 = arith.constant 1.000000e+00 : f32
    %221 = vector.broadcast %cst_64 : f32 to vector<8x128xf32>
    %222 = arith.addf %221, %220 : vector<8x128xf32>
    %223 = arith.divf %221, %222 : vector<8x128xf32>
    %224 = arith.mulf %215, %193 : vector<8x128xf32>
    %225 = arith.mulf %209, %217 : vector<8x128xf32>
    %226 = arith.addf %224, %225 : vector<8x128xf32>
    %227 = math.tanh %226 : vector<8x128xf32>
    %228 = arith.mulf %223, %227 : vector<8x128xf32>
    %229 = arith.index_cast %199 : i32 to index
    %c0_65 = arith.constant 0 : index
    %230 = vector.load %arg15[%229, %c0_65] : memref<64x512xf32, #tpu.memory_space<vmem>>, vector<8x128xf32>
    tpu.vector_store %arg15[%229, %c0_65], %228 {strides = array<i32>} : memref<64x512xf32, #tpu.memory_space<vmem>>, vector<8x128xf32>,
    %c6_i32 = arith.constant 6 : i32
    %c8_i32_66 = arith.constant 8 : i32
    %231 = arith.muli %c6_i32, %c8_i32_66 : i32
    %232 = tpu.assume_multiple %231, 8 : i32
    %233 = arith.index_cast %232 : i32 to index
    %c0_67 = arith.constant 0 : index
    %234 = vector.load %arg15[%233, %c0_67] : memref<64x512xf32, #tpu.memory_space<vmem>>, vector<8x512xf32>
    %cst_68 = arith.constant dense<0.000000e+00> : vector<8x512xf32>
    %235 = tpu.matmul %228, %28, %cst_68 {dimension_numbers = #tpu.dot_dimension_numbers<[1], [0], [0], [1], [0, 0, 1, 1], [], []>} : vector<8x128xf32>, vector<128x512xf32>, vector<8x512xf32> -> vector<8x512xf32>
    %236 = arith.addf %234, %235 : vector<8x512xf32>
    %237 = vector.extract_strided_slice %236 {offsets = [0, 0], sizes = [8, 128], strides = [1, 1]} : vector<8x512xf32> to vector<8x128xf32>
    %238 = arith.negf %237 : vector<8x128xf32>
    %239 = math.exp %238 : vector<8x128xf32>
    %cst_69 = arith.constant 1.000000e+00 : f32
    %240 = vector.broadcast %cst_69 : f32 to vector<8x128xf32>
    %241 = arith.addf %240, %239 : vector<8x128xf32>
    %242 = arith.divf %240, %241 : vector<8x128xf32>
    %243 = vector.extract_strided_slice %236 {offsets = [0, 128], sizes = [8, 128], strides = [1, 1]} : vector<8x512xf32> to vector<8x128xf32>
    %244 = arith.negf %243 : vector<8x128xf32>
    %245 = math.exp %244 : vector<8x128xf32>
    %cst_70 = arith.constant 1.000000e+00 : f32
    %246 = vector.broadcast %cst_70 : f32 to vector<8x128xf32>
    %247 = arith.addf %246, %245 : vector<8x128xf32>
    %248 = arith.divf %246, %247 : vector<8x128xf32>
    %249 = vector.extract_strided_slice %236 {offsets = [0, 256], sizes = [8, 128], strides = [1, 1]} : vector<8x512xf32> to vector<8x128xf32>
    %250 = math.tanh %249 : vector<8x128xf32>
    %251 = vector.extract_strided_slice %236 {offsets = [0, 384], sizes = [8, 128], strides = [1, 1]} : vector<8x512xf32> to vector<8x128xf32>
    %252 = arith.negf %251 : vector<8x128xf32>
    %253 = math.exp %252 : vector<8x128xf32>
    %cst_71 = arith.constant 1.000000e+00 : f32
    %254 = vector.broadcast %cst_71 : f32 to vector<8x128xf32>
    %255 = arith.addf %254, %253 : vector<8x128xf32>
    %256 = arith.divf %254, %255 : vector<8x128xf32>
    %257 = arith.mulf %248, %226 : vector<8x128xf32>
    %258 = arith.mulf %242, %250 : vector<8x128xf32>
    %259 = arith.addf %257, %258 : vector<8x128xf32>
    %260 = math.tanh %259 : vector<8x128xf32>
    %261 = arith.mulf %256, %260 : vector<8x128xf32>
    %262 = arith.index_cast %232 : i32 to index
    %c0_72 = arith.constant 0 : index
    %263 = vector.load %arg15[%262, %c0_72] : memref<64x512xf32, #tpu.memory_space<vmem>>, vector<8x128xf32>
    tpu.vector_store %arg15[%262, %c0_72], %261 {strides = array<i32>} : memref<64x512xf32, #tpu.memory_space<vmem>>, vector<8x128xf32>,
    %c7_i32 = arith.constant 7 : i32
    %c8_i32_73 = arith.constant 8 : i32
    %264 = arith.muli %c7_i32, %c8_i32_73 : i32
    %265 = tpu.assume_multiple %264, 8 : i32
    %266 = arith.index_cast %265 : i32 to index
    %c0_74 = arith.constant 0 : index
    %267 = vector.load %arg15[%266, %c0_74] : memref<64x512xf32, #tpu.memory_space<vmem>>, vector<8x512xf32>
    %cst_75 = arith.constant dense<0.000000e+00> : vector<8x512xf32>
    %268 = tpu.matmul %261, %28, %cst_75 {dimension_numbers = #tpu.dot_dimension_numbers<[1], [0], [0], [1], [0, 0, 1, 1], [], []>} : vector<8x128xf32>, vector<128x512xf32>, vector<8x512xf32> -> vector<8x512xf32>
    %269 = arith.addf %267, %268 : vector<8x512xf32>
    %270 = vector.extract_strided_slice %269 {offsets = [0, 0], sizes = [8, 128], strides = [1, 1]} : vector<8x512xf32> to vector<8x128xf32>
    %271 = arith.negf %270 : vector<8x128xf32>
    %272 = math.exp %271 : vector<8x128xf32>
    %cst_76 = arith.constant 1.000000e+00 : f32
    %273 = vector.broadcast %cst_76 : f32 to vector<8x128xf32>
    %274 = arith.addf %273, %272 : vector<8x128xf32>
    %275 = arith.divf %273, %274 : vector<8x128xf32>
    %276 = vector.extract_strided_slice %269 {offsets = [0, 128], sizes = [8, 128], strides = [1, 1]} : vector<8x512xf32> to vector<8x128xf32>
    %277 = arith.negf %276 : vector<8x128xf32>
    %278 = math.exp %277 : vector<8x128xf32>
    %cst_77 = arith.constant 1.000000e+00 : f32
    %279 = vector.broadcast %cst_77 : f32 to vector<8x128xf32>
    %280 = arith.addf %279, %278 : vector<8x128xf32>
    %281 = arith.divf %279, %280 : vector<8x128xf32>
    %282 = vector.extract_strided_slice %269 {offsets = [0, 256], sizes = [8, 128], strides = [1, 1]} : vector<8x512xf32> to vector<8x128xf32>
    %283 = math.tanh %282 : vector<8x128xf32>
    %284 = vector.extract_strided_slice %269 {offsets = [0, 384], sizes = [8, 128], strides = [1, 1]} : vector<8x512xf32> to vector<8x128xf32>
    %285 = arith.negf %284 : vector<8x128xf32>
    %286 = math.exp %285 : vector<8x128xf32>
    %cst_78 = arith.constant 1.000000e+00 : f32
    %287 = vector.broadcast %cst_78 : f32 to vector<8x128xf32>
    %288 = arith.addf %287, %286 : vector<8x128xf32>
    %289 = arith.divf %287, %288 : vector<8x128xf32>
    %290 = arith.mulf %281, %259 : vector<8x128xf32>
    %291 = arith.mulf %275, %283 : vector<8x128xf32>
    %292 = arith.addf %290, %291 : vector<8x128xf32>
    %293 = math.tanh %292 : vector<8x128xf32>
    %294 = arith.mulf %289, %293 : vector<8x128xf32>
    %295 = arith.index_cast %265 : i32 to index
    %c0_79 = arith.constant 0 : index
    %296 = vector.load %arg15[%295, %c0_79] : memref<64x512xf32, #tpu.memory_space<vmem>>, vector<8x128xf32>
    tpu.vector_store %arg15[%295, %c0_79], %294 {strides = array<i32>} : memref<64x512xf32, #tpu.memory_space<vmem>>, vector<8x128xf32>,
    %c8_i32_80 = arith.constant 8 : i32
    %c0_81 = arith.constant 0 : index
    %c0_82 = arith.constant 0 : index
    %c0_83 = arith.constant 0 : index
    %297 = vector.load %arg13[%c0_81, %c0_82, %c0_83] : memref<1x8x128xf32, #tpu.memory_space<vmem>>, vector<1x8x128xf32>
    %298 = vector.shape_cast %297 : vector<1x8x128xf32> to vector<8x128xf32>
    %299 = vector.shape_cast %294 : vector<8x128xf32> to vector<1x8x128xf32>
    tpu.vector_store %arg13[%c0_81, %c0_82, %c0_83], %299 {strides = array<i32>} : memref<1x8x128xf32, #tpu.memory_space<vmem>>, vector<1x8x128xf32>,
    %c0_84 = arith.constant 0 : index
    %c0_85 = arith.constant 0 : index
    %c0_86 = arith.constant 0 : index
    %300 = vector.load %arg14[%c0_84, %c0_85, %c0_86] : memref<1x8x128xf32, #tpu.memory_space<vmem>>, vector<1x8x128xf32>
    %301 = vector.shape_cast %300 : vector<1x8x128xf32> to vector<8x128xf32>
    %302 = vector.shape_cast %292 : vector<8x128xf32> to vector<1x8x128xf32>
    tpu.vector_store %arg14[%c0_84, %c0_85, %c0_86], %302 {strides = array<i32>} : memref<1x8x128xf32, #tpu.memory_space<vmem>>, vector<1x8x128xf32>,
    %c0_87 = arith.constant 0 : index
    %c0_88 = arith.constant 0 : index
    %303 = vector.load %arg15[%c0_87, %c0_88] : memref<64x512xf32, #tpu.memory_space<vmem>>, vector<64x128xf32>
    %c0_89 = arith.constant 0 : index
    %c0_90 = arith.constant 0 : index
    %304 = vector.load %arg10[%c0_89, %c0_90] : memref<128x128xf32, #tpu.memory_space<vmem>>, vector<128x128xf32>
    %cst_91 = arith.constant dense<0.000000e+00> : vector<64x128xf32>
    %305 = tpu.matmul %303, %304, %cst_91 {dimension_numbers = #tpu.dot_dimension_numbers<[1], [0], [0], [1], [0, 0, 1, 1], [], []>} : vector<64x128xf32>, vector<128x128xf32>, vector<64x128xf32> -> vector<64x128xf32>
    %c0_92 = arith.constant 0 : index
    %c0_93 = arith.constant 0 : index
    %306 = vector.load %arg11[%c0_92, %c0_93] : memref<1x128xf32, #tpu.memory_space<vmem>>, vector<1x128xf32>
    %307 = vector.broadcast %306 : vector<1x128xf32> to vector<64x128xf32>
    %308 = arith.addf %305, %307 : vector<64x128xf32>
    %309 = vector.shape_cast %308 : vector<64x128xf32> to vector<8x8x128xf32>
    %c0_94 = arith.constant 0 : index
    %c0_95 = arith.constant 0 : index
    %c0_96 = arith.constant 0 : index
    %c0_97 = arith.constant 0 : index
    %310 = vector.load %arg12[%c0_94, %c0_95, %c0_96, %c0_97] : memref<1x8x8x128xf32, #tpu.memory_space<vmem>>, vector<1x8x8x128xf32>
    %311 = vector.shape_cast %310 : vector<1x8x8x128xf32> to vector<8x8x128xf32>
    %312 = vector.shape_cast %309 : vector<8x8x128xf32> to vector<1x8x8x128xf32>
    tpu.vector_store %arg12[%c0_94, %c0_95, %c0_96, %c0_97], %312 {strides = array<i32>} : memref<1x8x8x128xf32, #tpu.memory_space<vmem>>, vector<1x8x8x128xf32>,
    return
  }
  func.func @transform_0(%arg0: i32, %arg1: i32) -> (i32, i32, i32, i32) {
    %c0_i32 = arith.constant 0 : i32
    %c0_i32_0 = arith.constant 0 : i32
    %c0_i32_1 = arith.constant 0 : i32
    return %arg0, %arg1, %c0_i32, %c0_i32_0 : i32, i32, i32, i32
  }
  func.func @transform_1(%arg0: i32, %arg1: i32) -> (i32, i32, i32) {
    %c0_i32 = arith.constant 0 : i32
    %c0_i32_0 = arith.constant 0 : i32
    %c0_i32_1 = arith.constant 0 : i32
    return %arg0, %c0_i32, %c0_i32_0 : i32, i32, i32
  }
  func.func @transform_2(%arg0: i32, %arg1: i32) -> (i32, i32, i32) {
    %c0_i32 = arith.constant 0 : i32
    %c0_i32_0 = arith.constant 0 : i32
    %c0_i32_1 = arith.constant 0 : i32
    return %arg0, %c0_i32, %c0_i32_0 : i32, i32, i32
  }
  func.func @transform_3(%arg0: i32, %arg1: i32) -> (i32, i32) {
    %c0_i32 = arith.constant 0 : i32
    %c0_i32_0 = arith.constant 0 : i32
    %c0_i32_1 = arith.constant 0 : i32
    return %c0_i32, %c0_i32_0 : i32, i32
  }
  func.func @transform_4(%arg0: i32, %arg1: i32) -> (i32, i32) {
    %c0_i32 = arith.constant 0 : i32
    %c0_i32_0 = arith.constant 0 : i32
    %c0_i32_1 = arith.constant 0 : i32
    return %c0_i32, %c0_i32_0 : i32, i32
  }
  func.func @transform_5(%arg0: i32, %arg1: i32) -> (i32, i32) {
    %c0_i32 = arith.constant 0 : i32
    %c0_i32_0 = arith.constant 0 : i32
    %c0_i32_1 = arith.constant 0 : i32
    return %c0_i32, %c0_i32_0 : i32, i32
  }
  func.func @transform_6(%arg0: i32, %arg1: i32) -> (i32, i32) {
    %c0_i32 = arith.constant 0 : i32
    %c0_i32_0 = arith.constant 0 : i32
    %c0_i32_1 = arith.constant 0 : i32
    return %c0_i32, %c0_i32_0 : i32, i32
  }
  func.func @transform_7(%arg0: i32, %arg1: i32) -> (i32, i32) {
    %c0_i32 = arith.constant 0 : i32
    %c0_i32_0 = arith.constant 0 : i32
    %c0_i32_1 = arith.constant 0 : i32
    return %c0_i32, %c0_i32_0 : i32, i32
  }
  func.func @transform_8(%arg0: i32, %arg1: i32) -> (i32, i32) {
    %c0_i32 = arith.constant 0 : i32
    %c0_i32_0 = arith.constant 0 : i32
    %c0_i32_1 = arith.constant 0 : i32
    return %c0_i32, %c0_i32_0 : i32, i32
  }
  func.func @transform_9(%arg0: i32, %arg1: i32) -> (i32, i32) {
    %c0_i32 = arith.constant 0 : i32
    %c0_i32_0 = arith.constant 0 : i32
    %c0_i32_1 = arith.constant 0 : i32
    return %c0_i32, %c0_i32_0 : i32, i32
  }
  func.func @transform_10(%arg0: i32, %arg1: i32) -> (i32, i32, i32, i32) {
    %c0_i32 = arith.constant 0 : i32
    %c0_i32_0 = arith.constant 0 : i32
    %c0_i32_1 = arith.constant 0 : i32
    return %arg0, %arg1, %c0_i32, %c0_i32_0 : i32, i32, i32, i32
  }
  func.func @transform_11(%arg0: i32, %arg1: i32) -> (i32, i32, i32) {
    %c0_i32 = arith.constant 0 : i32
    %c0_i32_0 = arith.constant 0 : i32
    %c0_i32_1 = arith.constant 0 : i32
    return %arg0, %c0_i32, %c0_i32_0 : i32, i32, i32
  }
  func.func @transform_12(%arg0: i32, %arg1: i32) -> (i32, i32, i32) {
    %c0_i32 = arith.constant 0 : i32
    %c0_i32_0 = arith.constant 0 : i32
    %c0_i32_1 = arith.constant 0 : i32
    return %arg0, %c0_i32, %c0_i32_0 : i32, i32, i32
  }
}

</mosaic_0001>

<bundles_post_ra>
// kernel: drqn_forward.1
= control target key start
LH: loop header
LB: loop body
LE: loop exit
PB: predicated region body
PF: predicated region fallthrough
CT: control target
= control target key end

     0   :  { %18 = vsyncpa [#allocation4], 0  ;;  %s3473_s0 = inlined_call_operand.vmem [shape: f32[1,8,8,2], index: 0, kind: input, shape index: {}]   ;;  %s3474_s1 = inlined_call_operand.vmem [shape: f32[1,8,128], index: 1, kind: input, shape index: {}, may-alias: {1,2}]   ;;  %s3475_s2 = inlined_call_operand.vmem [shape: f32[1,8,128], index: 2, kind: input, shape index: {}, may-alias: {1,2}]   ;;  %s3476_s3 = inlined_call_operand.vmem [shape: f32[2,64], index: 3, kind: input, shape index: {}]   ;;  %s3477_s4 = inlined_call_operand.vmem [shape: f32[1,64], index: 4, kind: input, shape index: {}]   ;;  %s3478_s5 = inlined_call_operand.hbm [shape: f32[64,512], index: 5, kind: input, shape index: {}]   ;;  %s3479_s6 = inlined_call_operand.hbm [shape: f32[128,512], index: 6, kind: input, shape index: {}]   ;;  %s3480_s7 = inlined_call_operand.vmem [shape: f32[1,512], index: 7, kind: input, shape index: {}]   ;;  %s3481_s8 = inlined_call_operand.hbm [shape: f32[128,128], index: 8, kind: input, shape index: {}]   ;;  %s3482_s9 = inlined_call_operand.vmem [shape: f32[1,128], index: 9, kind: input, shape index: {}]   ;;  %s3483_s10 = inlined_call_operand.vmem [shape: f32[1,8,8,128], index: 10, kind: output, shape index: {0}]   ;;  %s3484_s11 = inlined_call_operand.vmem [shape: f32[1,8,128], index: 11, kind: output, shape index: {1}]   ;;  %s3485_s12 = inlined_call_operand.vmem [shape: f32[1,8,128], index: 12, kind: output, shape index: {2}]  }
   0x1   :  { %19 = vsyncpa [#allocation6], 0  ;;  %s47_s23 = sshll.u32 %s3479_s6, 4  ;;  %s2256_s24 = smov [#allocation5]   ;;  %s48_s23 = int_to_ptr.hbm [resolvable:$true] %s47_s23 }
   0x2   :  { %s49_s25 = sshll.u32 %s2256_s24, 4  ;;  %s34_s28 = sshll.u32 %s3478_s5, 4  ;;  %s50_s25 = int_to_ptr.vmem [resolvable:$true] %s49_s25  ;;  %s35_s28 = int_to_ptr.hbm [resolvable:$true] %s34_s28 }
   0x3   :  { %s2257_s29 = smov 512   ;;  %s2258_s30 = smov 32  }
   0x4   :  { %55 = dma.hbm_to_vmem [thread:$0]  %s48_s23, 8192, %s50_s25, [#allocation6], %s2257_s29, %s2257_s29, %s2258_s30  }
   0x5   :  { %s2259_s13 = smov [#allocation3]   ;;  %s62_s17 = sshll.u32 %s3481_s8, 4  ;;  %s63_s17 = int_to_ptr.hbm [resolvable:$true] %s62_s17 }
   0x6   :  { %s36_s14 = sshll.u32 %s2259_s13, 4  ;;  %s2260_s6 = smov [#allocation7]   ;;  %s37_s14 = int_to_ptr.vmem [resolvable:$true] %s36_s14 }
   0x7   :  { %42 = dma.hbm_to_vmem [thread:$0]  %s35_s28, 4096, %s37_s14, [#allocation4], %s2257_s29, %s2257_s29, %s2258_s30  }
   0x8   :  { %s64_s18 = sshll.u32 %s2260_s6, 4  ;;  %s2261_s19 = smov 128   ;;  %s65_s18 = int_to_ptr.vmem [resolvable:$true] %s64_s18 }
   0x9   :  { %s2262_s20 = smov 8  }
   0xa   :  { %70 = dma.hbm_to_vmem [thread:$0]  %s63_s17, 2048, %s65_s18, [#allocation6], %s2261_s19, %s2261_s19, %s2262_s20  }
   0xb   :  { %2252 = dma.done.wait [#allocation4], 4096  }
   0xc   :  { %2253 = vsyncadd [#allocation4], 4294963200 }
   0xd   :  { %2254 = dma.done.wait [#allocation6], 10240  }
   0xe   :  { %2255 = vsyncadd [#allocation6], 4294957056  ;;  %v2263_v0 = vmov 0   ;;  %v99_v1 = vld [vmem:[%s3473_s0 + $0x30] sm:$0xff]  ;;  %v97_v2 = vld [vmem:[%s3473_s0 + $0x20] sm:$0xff]  ;;  %v2264_v4 = vmov 1  }
   0xf   :  { %1973 = vset.pattern.permute.xlu1 %v2263_v0  ;;  %1971 = vset.pattern.permute.xlu0 %v2263_v0  ;;  %v98_v3 = vld [vmem:[%s3473_s0 + $0x28] sm:$0xff]  ;;  %v93_v5 = vld [vmem:[%s3473_s0] sm:$0xff]  ;;  %v100_v6 = vld [vmem:[%s3473_s0 + $0x38] sm:$0xff]  ;;  %vm263_vm0 = vcmask 523264  }
  0x10   :  { %1975 = vset.pattern.permute.xlu2 %v2263_v0  ;;  %134 = vperm.xlu1 %1973, %v99_v1   ;;  %v95_v7 = vld [vmem:[%s3473_s0 + $0x10] sm:$0xff]  ;;  %v94_v8 = vld [vmem:[%s3473_s0 + $0x8] sm:$0xff]  ;;  %v96_v9 = vld [vmem:[%s3473_s0 + $0x18] sm:$0xff] }
  0x11   :  { %124 = vperm.xlu0 %1971, %v97_v2   ;;  %129 = vperm.xlu2 %1975, %v98_v3   ;;  %v249_v10 = vld [vmem:[#allocation3 + $0xe0] sm:$0xff]  ;;  %v251_v15 = vld [vmem:[#allocation3 + $0xf0] sm:$0xff]  ;;  %v250_v22 = vld [vmem:[#allocation3 + $0xe8] sm:$0xff] }
  0x12   :  { %v245_v11 = vld [vmem:[#allocation3 + $0xc0] sm:$0xff]  ;;  %1946 = vmatpush.msra.mxu1 %v249_v10  ;;  %1947 = vmatpush.msra.mxu3 %v249_v10  ;;  %v247_v17 = vld [vmem:[#allocation3 + $0xd0] sm:$0xff]  ;;  %v246_v24 = vld [vmem:[#allocation3 + $0xc8] sm:$0xff] }
  0x13   :  { %v241_v12 = vld [vmem:[#allocation3 + $0xa0] sm:$0xff]  ;;  %296 = vmatpush.msra.mxu0 %v249_v10  ;;  %378 = vmatpush.msra.mxu2 %v251_v15  ;;  %v243_v19 = vld [vmem:[#allocation3 + $0xb0] sm:$0xff]  ;;  %v242_v26 = vld [vmem:[#allocation3 + $0xa8] sm:$0xff] }
  0x14   :  { %1948 = vmatpush.msra.mxu1 %v245_v11  ;;  %1949 = vmatpush.msra.mxu3 %v245_v11  ;;  %v237_v13 = vld [vmem:[#allocation3 + $0x80] sm:$0xff]  ;;  %v239_v21 = vld [vmem:[#allocation3 + $0x90] sm:$0xff]  ;;  %v238_v28 = vld [vmem:[#allocation3 + $0x88] sm:$0xff] }
  0x15   :  { %297 = vmatpush.msra.mxu0 %v245_v11  ;;  %v233_v14 = vld [vmem:[#allocation3 + $0x60] sm:$0xff]  ;;  %379 = vmatpush.msra.mxu2 %v247_v17  ;;  %v235_v23 = vld [vmem:[#allocation3 + $0x70] sm:$0xff]  ;;  %v234_v31 = vld [vmem:[#allocation3 + $0x68] sm:$0xff] }
  0x16   :  { %1950 = vmatpush.msra.mxu1 %v241_v12  ;;  %1951 = vmatpush.msra.mxu3 %v241_v12  ;;  %v229_v16 = vld [vmem:[#allocation3 + $0x40] sm:$0xff]  ;;  %v231_v25 = vld [vmem:[#allocation3 + $0x50] sm:$0xff]  ;;  %v230_v32 = vld [vmem:[#allocation3 + $0x48] sm:$0xff] }
  0x17   :  { %298 = vmatpush.msra.mxu0 %v241_v12  ;;  %v225_v18 = vld [vmem:[#allocation3 + $0x20] sm:$0xff]  ;;  %380 = vmatpush.msra.mxu2 %v243_v19  ;;  %v227_v27 = vld [vmem:[#allocation3 + $0x30] sm:$0xff]  ;;  %v252_v33 = vld [vmem:[#allocation3 + $0xf8] sm:$0xff] }
  0x18   :  { %1974 = vset.pattern.permute.xlu1 %v2264_v4  ;;  %1952 = vmatpush.msra.mxu1 %v237_v13  ;;  %v221_v20 = vld [vmem:[#allocation3] sm:$0xff]  ;;  %v223_v30 = vld [vmem:[#allocation3 + $0x10] sm:$0xff]  ;;  %v226_v34 = vld [vmem:[#allocation3 + $0x28] sm:$0xff] }
  0x19   :  { %1972 = vset.pattern.permute.xlu0 %v2264_v4  ;;  %177 = vperm.xlu1 %1974, %v99_v1   ;;  %v248_v35 = vld [vmem:[#allocation3 + $0xd8] sm:$0xff]  ;;  %v222_v38 = vld [vmem:[#allocation3 + $0x8] sm:$0xff]  ;;  %v2366_v43 = vld [vmem:[%s3476_s3] ss:$0 sm:$0xff] }
  0x1a   :  { %169 = vperm.xlu0 %1972, %v97_v2   ;;  %1976 = vset.pattern.permute.xlu2 %v2264_v4  ;;  %v244_v39 = vld [vmem:[#allocation3 + $0xb8] sm:$0xff]  ;;  %v2371_v44 = vld [vmem:[%s3476_s3 + $0x1] ss:$0 sm:$0xff]  ;;  %v2378_v51 = vld [vmem:[%s3477_s4] ss:$0 sm:$0xff] }
  0x1b   :  { %173 = vperm.xlu2 %1976, %v98_v3   ;;  %1953 = vmatpush.msra.mxu3 %v237_v13  ;;  %v240_v40 = vld [vmem:[#allocation3 + $0x98] sm:$0xff]  ;;  %v2382_v54 = vld [vmem:[#allocation5 + $0x1e0] sm:$0xff]  ;;  %v2432_v17 = vld [vmem:[#allocation5 + $0x188] sm:$0xff] }
  0x1c   :  { %299 = vmatpush.msra.mxu0 %v237_v13  ;;  %1954 = vmatpush.msra.mxu1 %v233_v14  ;;  %v236_v42 = vld [vmem:[#allocation3 + $0x78] sm:$0xff]  ;;  %v2384_v55 = vld [vmem:[#allocation5 + $0x1c0] sm:$0xff]  ;;  %v2423_v13 = vld [vmem:[#allocation5 + $0x1a8] sm:$0xff] }
  0x1d   :  { %1955 = vmatpush.msra.mxu3 %v233_v14  ;;  %381 = vmatpush.msra.mxu2 %v239_v21  ;;  %v232_v45 = vld [vmem:[#allocation3 + $0x58] sm:$0xff]  ;;  %v2391_v62 = vld [vmem:[#allocation5 + $0x1a0] sm:$0xff] }
  0x1e   :  { %300 = vmatpush.msra.mxu0 %v233_v14  ;;  %1956 = vmatpush.msra.mxu1 %v229_v16  ;;  %v228_v47 = vld [vmem:[#allocation3 + $0x38] sm:$0xff]  ;;  %v2396_v1 = vld [vmem:[#allocation5 + $0x180] sm:$0xff] }
  0x1f   :  { %1957 = vmatpush.msra.mxu3 %v229_v16  ;;  %382 = vmatpush.msra.mxu2 %v235_v23  ;;  %v224_v56 = vld [vmem:[#allocation3 + $0x18] sm:$0xff]  ;;  %v2427_v15 = vld [vmem:[#allocation5 + $0x160] sm:$0xff] }
  0x20   :  { %301 = vmatpush.msra.mxu0 %v229_v16  ;;  %1958 = vmatpush.msra.mxu1 %v225_v18  ;;  %v2417_v10 = vld [vmem:[#allocation5 + $0x1d8] sm:$0xff]  ;;  %3585 = vst [vmem:[#allocation10_spill] sm:$0xff] %v2427_v15 }
  0x21   :  { %1977 = vset.pattern.permute.xlu1 %v2263_v0  ;;  %1959 = vmatpush.msra.mxu3 %v225_v18  ;;  %v2429_v16 = vld [vmem:[#allocation5 + $0x1b8] sm:$0xff] }
  0x22   :  { %1978 = vset.pattern.permute.xlu0 %v2263_v0  ;;  %104 = vperm.xlu1 %1977, %v93_v5   ;;  %v2442_v23 = vld [vmem:[#allocation5 + $0x198] sm:$0xff] }
  0x23   :  { %139 = vperm.xlu0 %1978, %v100_v6   ;;  %153 = vperm.xlu2 %1976, %v93_v5   ;;  %v2404_v5 = vld [vmem:[#allocation5 + $0x1e8] sm:$0xff] }
  0x24   :  { %302 = vmatpush.msra.mxu0 %v225_v18  ;;  %1960 = vmatpush.msra.mxu1 %v221_v20  ;;  %v2434_v18 = vld [vmem:[#allocation5 + $0x140] sm:$0xff] }
  0x25   :  { %1961 = vmatpush.msra.mxu3 %v221_v20  ;;  %383 = vmatpush.msra.mxu2 %v231_v25  ;;  %3586 = vst [vmem:[#allocation11_spill] sm:$0xff] %v2434_v18 }
  0x26   :  { %303 = vmatpush.msra.mxu0 %v221_v20  ;;  %337 = vmatpush.msrb.mxu1 %v250_v22  ;;  %v2440_v22 = vld [vmem:[#allocation5 + $0x120] sm:$0xff] }
  0x27   :  { %384 = vmatpush.msra.mxu2 %v227_v27  ;;  %419 = vmatpush.msrb.mxu3 %v252_v33  ;;  %3587 = vst [vmem:[#allocation12_spill] sm:$0xff] %v2440_v22  ;;  %v2472_v33 = vld [vmem:[#allocation5 + $0x178] sm:$0xff] }
  0x28   :  { %338 = vmatpush.msrb.mxu1 %v246_v24  ;;  %712 = vmatpush.msrb.mxu0 %v2382_v54 }
  0x29   :  { %385 = vmatpush.msra.mxu2 %v223_v30  ;;  %420 = vmatpush.msrb.mxu3 %v248_v35  ;;  %v2464_v30 = vld [vmem:[#allocation5 + $0x100] sm:$0xff] }
  0x2a   :  { %1979 = vset.pattern.permute.xlu1 %v2264_v4  ;;  %339 = vmatpush.msrb.mxu1 %v242_v26  ;;  %v2451_v26 = vld [vmem:[#allocation5 + $0x168] sm:$0xff]  ;;  %3588 = vst [vmem:[#allocation13_spill] sm:$0xff] %v2464_v30  ;;  %v2476_v35 = vld [vmem:[#allocation5 + $0xc0] sm:$0xff] }
  0x2b   :  { %1981 = vset.pattern.permute.xlu0 %v2264_v4  ;;  %181 = vperm.xlu1 %1979, %v100_v6   ;;  %v2406_v6 = vld [vmem:[#allocation5 + $0x1f8] sm:$0xff] }
  0x2c   :  { %161 = vperm.xlu0 %1981, %v95_v7   ;;  %1980 = vset.pattern.permute.xlu2 %v2263_v0 }
  0x2d   :  { %109 = vperm.xlu2 %1980, %v94_v8   ;;  %340 = vmatpush.msrb.mxu1 %v238_v28 }
  0x2e   :  { %421 = vmatpush.msrb.mxu3 %v244_v39  ;;  %557 = vmatpush.msrb.mxu2 %v2382_v54  ;;  %v2485_v39 = vld [vmem:[#allocation5 + $0xa0] sm:$0xff] }
  0x2f   :  { %341 = vmatpush.msrb.mxu1 %v234_v31  ;;  %713 = vmatpush.msrb.mxu0 %v2384_v55  ;;  %v2468_v31 = vld [vmem:[#allocation5 + $0xe0] sm:$0xff] }
  0x30   :  { %422 = vmatpush.msrb.mxu3 %v240_v40  ;;  %558 = vmatpush.msrb.mxu2 %v2384_v55 }
  0x31   :  { %342 = vmatpush.msrb.mxu1 %v230_v32  ;;  %714 = vmatpush.msrb.mxu0 %v2391_v62  ;;  %v2470_v32 = vld [vmem:[#allocation5 + $0x148] sm:$0xff] }
  0x32   :  { %423 = vmatpush.msrb.mxu3 %v236_v42  ;;  %559 = vmatpush.msrb.mxu2 %v2391_v62 }
  0x33   :  { %157 = vperm.xlu1 %1979, %v94_v8   ;;  %343 = vmatpush.msrb.mxu1 %v226_v34 }
  0x34   :  { %424 = vmatpush.msrb.mxu3 %v232_v45  ;;  %560 = vmatpush.msrb.mxu2 %v2396_v1 }
  0x35   :  { %114 = vperm.xlu2 %1980, %v95_v7   ;;  %344 = vmatpush.msrb.mxu1 %v222_v38 }
  0x36   :  { %425 = vmatpush.msrb.mxu3 %v228_v47  ;;  %715 = vmatpush.msrb.mxu0 %v2396_v1 }
  0x37   :  { %561 = vmatpush.msrb.mxu2 %v2427_v15 }
  0x38   :  { %426 = vmatpush.msrb.mxu3 %v224_v56  ;;  %716 = vmatpush.msrb.mxu0 %v2427_v15 }
  0x39   :  { %562 = vmatpush.msrb.mxu2 %v2434_v18 }
  0x3a   :  { %717 = vmatpush.msrb.mxu0 %v2434_v18 }
  0x3b   :  { %1982 = vset.pattern.permute.xlu1 %v2263_v0  ;;  %563 = vmatpush.msrb.mxu2 %v2440_v22 }
  0x3c   :  { %119 = vperm.xlu1 %1982, %v96_v9   ;;  %718 = vmatpush.msrb.mxu0 %v2440_v22 }
  0x3d   :  { %1983 = vset.pattern.permute.xlu2 %v2264_v4  ;;  %564 = vmatpush.msrb.mxu2 %v2464_v30 }
  0x3e   :  { %165 = vperm.xlu2 %1983, %v96_v9   ;;  %v2415_v9 = vld [vmem:[#allocation5 + $0x1c8] sm:$0xff]  ;;  %719 = vmatpush.msrb.mxu0 %v2464_v30 }
  0x3f   :  { %565 = vmatpush.msrb.mxu2 %v2468_v31 }
  0x40   :  { %720 = vmatpush.msrb.mxu0 %v2468_v31 }
  0x41   :  { %566 = vmatpush.msrb.mxu2 %v2476_v35 }
  0x42   :  { %721 = vmatpush.msrb.mxu0 %v2476_v35 }
  0x43   :  { %567 = vmatpush.msrb.mxu2 %v2485_v39 }
  0x44   :  { %722 = vmatpush.msrb.mxu0 %v2485_v39 }
  0x6b   :  { %v130_v29 = vpop.permute.xlu2 %129 }
  0x6c   :  { %v148_v57 = vmul.f32 %v2366_v43, %v130_v29 }
  0x75   :  { %v174_v41 = vpop.permute.xlu2 %173 }
  0x76   :  { %v190_v58 = vmul.f32 %v2371_v44, %v174_v41 }
  0x78   :  { %v198_v2 = vadd.f32 %v190_v58, %v148_v57  ;;  %v2515_v58 = vld [vmem:[#allocation5 + $0x40] sm:$0xff] }
  0x79   :  { %3590 = vst [vmem:[#allocation15_spill] sm:$0xff] %v2515_v58 }
  0x7a   :  { %v210_v12 = vadd.f32 %v2378_v51, %v198_v2 }
  0x7c   :  { %v2444_v24 = vmax.f32 %v210_v12, 0.0  ;;  %v2535_v12 = vld [vmem:[#allocation5] sm:$0xff] }
  0x7d   :  { %v154_v61 = vpop.permute.xlu2 %153  ;;  %3592 = vst [vmem:[#allocation17_spill] sm:$0xff] %v2535_v12 }
  0x7e   :  { %v185_v7 = vmul.f32 %v2371_v44, %v154_v61 }
  0x82   :  { %v135_v36 = vpop.permute.xlu1 %134 }
  0x83   :  { %v125_v37 = vpop.permute.xlu0 %124  ;;  %v149_v50 = vmul.f32 %v2366_v43, %v135_v36  ;;  %v2478_v36 = vld [vmem:[#allocation5 + $0x128] sm:$0xff] }
  0x84   :  { %v147_v46 = vmul.f32 %v2366_v43, %v125_v37  ;;  %v2481_v37 = vld [vmem:[#allocation5 + $0x158] sm:$0xff] }
  0x87   :  { %v110_v21 = vpop.permute.xlu2 %109 }
  0x88   :  { %v144_v41 = vmul.f32 %v2366_v43, %v110_v21 }
  0x8b   :  { %v178_v48 = vpop.permute.xlu1 %177 }
  0x8c   :  { %v170_v49 = vpop.permute.xlu0 %169  ;;  %v191_v52 = vmul.f32 %v2371_v44, %v178_v48  ;;  %v2501_v48 = vld [vmem:[#allocation5 + $0x80] sm:$0xff] }
  0x8d   :  { %v189_v53 = vmul.f32 %v2371_v44, %v170_v49  ;;  %568 = vmatpush.msrb.mxu2 %v2501_v48  ;;  %v2504_v49 = vld [vmem:[#allocation5 + $0x60] sm:$0xff]  ;;  %723 = vmatpush.msrb.mxu0 %v2501_v48 }
  0x8e   :  { %v199_v59 = vadd.f32 %v191_v52, %v149_v50  ;;  %3589 = vst [vmem:[#allocation14_spill] sm:$0xff] %v2504_v49  ;;  %v2506_v50 = vld [vmem:[#allocation5 + $0x108] sm:$0xff]  ;;  %v2508_v52 = vld [vmem:[#allocation5 + $0x138] sm:$0xff] }
  0x8f   :  { %v197_v60 = vadd.f32 %v189_v53, %v147_v46  ;;  %v115_v40 = vpop.permute.xlu2 %114  ;;  %569 = vmatpush.msrb.mxu2 %v2504_v49  ;;  %724 = vmatpush.msrb.mxu0 %v2504_v49 }
  0x90   :  { %v211_v63 = vadd.f32 %v2378_v51, %v199_v59  ;;  %v145_v56 = vmul.f32 %v2366_v43, %v115_v40  ;;  %v2517_v59 = vld [vmem:[#allocation5 + $0xe8] sm:$0xff] }
  0x91   :  { %v209_v0 = vadd.f32 %v2378_v51, %v197_v60  ;;  %v2520_v60 = vld [vmem:[#allocation5 + $0x118] sm:$0xff]  ;;  %570 = vmatpush.msrb.mxu2 %v2515_v58  ;;  %725 = vmatpush.msrb.mxu0 %v2515_v58 }
  0x92   :  { %v2400_v3 = vmax.f32 %v211_v63, 0.0  ;;  %v2524_v63 = vld [vmem:[#allocation5 + $0x20] sm:$0xff] }
  0x93   :  { %v2402_v4 = vmax.f32 %v209_v0, 0.0  ;;  %3591 = vst [vmem:[#allocation16_spill] sm:$0xff] %v2524_v63  ;;  %571 = vmatpush.msrb.mxu2 %v2524_v63  ;;  %726 = vmatpush.msrb.mxu0 %v2524_v63 }
  0x94   :  { %1896 = vmatmul.msk.f32.vlgmr.msra.gmra.mxu3 %vm263_vm0, %v2400_v3  ;;  %v105_v8 = vpop.permute.xlu1 %104 }
  0x95   :  { %1894 = vmatmul.msk.f32.vlgmr.msra.gmra.mxu1 %vm263_vm0, %v2402_v4  ;;  %v143_v11 = vmul.f32 %v2366_v43, %v105_v8  ;;  %617 = vmatpush.msra.mxu3 %v2406_v6  ;;  %v140_v20 = vpop.permute.xlu0 %139 }
  0x96   :  { %577 = vmatpush.msra.mxu1 %v2404_v5  ;;  %v150_v27 = vmul.f32 %v2366_v43, %v140_v20  ;;  %v2543_v20 = vld [vmem:[#allocation5 + $0xc8] sm:$0xff]  ;;  %572 = vmatpush.msrb.mxu2 %v2535_v12 }
  0x97   :  { %v193_v14 = vadd.f32 %v185_v7, %v143_v11  ;;  %618 = vmatpush.msra.mxu3 %v2417_v10  ;;  %727 = vmatpush.msrb.mxu0 %v2535_v12 }
  0x98   :  { %578 = vmatpush.msra.mxu1 %v2415_v9  ;;  %v166_v0 = vpop.permute.xlu2 %165 }
  0x99   :  { %v205_v19 = vadd.f32 %v2378_v51, %v193_v14  ;;  %619 = vmatpush.msra.mxu3 %v2429_v16  ;;  %v188_v8 = vmul.f32 %v2371_v44, %v166_v0  ;;  %v2604_v0 = vld [vmem:[#allocation5 + $0x48] sm:$0xff] }
  0x9a   :  { %579 = vmatpush.msra.mxu1 %v2423_v13  ;;  %3596 = vst [vmem:[#allocation21_spill] sm:$0xff] %v2604_v0 }
  0x9b   :  { %v2448_v25 = vmax.f32 %v205_v19, 0.0  ;;  %620 = vmatpush.msra.mxu3 %v2442_v23  ;;  %v2541_v19 = vld [vmem:[#allocation5 + $0x1f0] sm:$0xff] }
  0x9c   :  { %580 = vmatpush.msra.mxu1 %v2432_v17 }
  0x9d   :  { %1895 = vmatmul.msk.f32.gmra.mxu1 %vm263_vm0, %v2444_v24  ;;  %1890 = vmatmul.msk.f32.vlgmr.msra.gmra.mxu0 %vm263_vm0, %v2448_v25  ;;  %v182_v28 = vpop.permute.xlu1 %181 }
  0x9e   :  { %1906 = vmatmul.msk.f32.vlgmr.msra.gmra.mxu2 %vm263_vm0, %v2448_v25  ;;  %v192_v29 = vmul.f32 %v2371_v44, %v182_v28  ;;  %581 = vmatpush.msra.mxu1 %v2451_v26  ;;  %v162_v45 = vpop.permute.xlu0 %161  ;;  %v2552_v28 = vld [vmem:[#allocation5 + $0xa8] sm:$0xff] }
  0x9f   :  { %621 = vmatpush.msra.mxu3 %v2472_v33  ;;  %v187_v53 = vmul.f32 %v2371_v44, %v162_v45  ;;  %597 = vmatpush.msra.mxu2 %v2541_v19  ;;  %v2576_v45 = vld [vmem:[#allocation5 + $0x88] sm:$0xff] }
  0xa0   :  { %v200_v34 = vadd.f32 %v192_v29, %v150_v27  ;;  %582 = vmatpush.msra.mxu1 %v2470_v32  ;;  %v2550_v27 = vld [vmem:[#allocation5 + $0xf8] sm:$0xff]  ;;  %v2558_v29 = vld [vmem:[#allocation5 + $0x1b0] sm:$0xff]  ;;  %867 = vmatpush.msra.mxu0 %v2382_v54  ;;  %3593 = vst [vmem:[#allocation18_spill] sm:$0xff] %v2576_v45 }
  0xa1   :  { %622 = vmatpush.msra.mxu3 %v2481_v37  ;;  %v195_v2 = vadd.f32 %v187_v53, %v145_v56  ;;  %v2587_v53 = vld [vmem:[#allocation5 + $0x98] sm:$0xff] }
  0xa2   :  { %v212_v38 = vadd.f32 %v2378_v51, %v200_v34  ;;  %583 = vmatpush.msra.mxu1 %v2478_v36  ;;  %3595 = vst [vmem:[#allocation20_spill] sm:$0xff] %v2587_v53  ;;  %868 = vmatpush.msra.mxu0 %v2384_v55 }
  0xa3   :  { %623 = vmatpush.msra.mxu3 %v2508_v52  ;;  %v207_v21 = vadd.f32 %v2378_v51, %v195_v2  ;;  %v2608_v2 = vld [vmem:[#allocation5 + $0x78] sm:$0xff] }
  0xa4   :  { %v2492_v42 = vmax.f32 %v212_v38, 0.0  ;;  %584 = vmatpush.msra.mxu1 %v2506_v50  ;;  %v2566_v38 = vld [vmem:[#allocation5 + $0x190] sm:$0xff]  ;;  %869 = vmatpush.msra.mxu0 %v2391_v62  ;;  %3597 = vst [vmem:[#allocation22_spill] sm:$0xff] %v2608_v2 }
  0xa5   :  { %1898 = vmatmul.msk.f32.vlgmr.msrb.gmra.mxu1 %vm263_vm0, %v2448_v25  ;;  %v158_v46 = vpop.permute.xlu1 %157  ;;  %624 = vmatpush.msra.mxu3 %v2520_v60  ;;  %v215_v34 = vmax.f32 %v207_v21, 0.0  ;;  %v2622_v21 = vld [vmem:[#allocation5 + $0xd0] sm:$0xff] }
  0xa6   :  { %v186_v47 = vmul.f32 %v2371_v44, %v158_v46  ;;  %1897 = vmatmul.msk.f32.gmra.mxu3 %vm263_vm0, %v2492_v42  ;;  %585 = vmatpush.msra.mxu1 %v2517_v59  ;;  %v2548_v44 = vld [vmem:[#allocation5 + $0x1d0] sm:$0xff]  ;;  %v2580_v46 = vld [vmem:[#allocation5 + $0xb8] sm:$0xff] }
  0xa7   :  { %625 = vmatpush.msra.mxu3 %v2550_v27  ;;  %598 = vmatpush.msra.mxu2 %v2548_v44 }
  0xa8   :  { %v194_v57 = vadd.f32 %v186_v47, %v144_v41  ;;  %586 = vmatpush.msra.mxu1 %v2543_v20  ;;  %v2574_v41 = vld [vmem:[#allocation5 + $0x170] sm:$0xff]  ;;  %v2582_v47 = vld [vmem:[#allocation5 + $0x68] sm:$0xff]  ;;  %870 = vmatpush.msra.mxu0 %v2396_v1 }
  0xa9   :  { %599 = vmatpush.msra.mxu2 %v2558_v29  ;;  %3594 = vst [vmem:[#allocation19_spill] sm:$0xff] %v2582_v47 }
  0xaa   :  { %v206_v61 = vadd.f32 %v2378_v51, %v194_v57  ;;  %587 = vmatpush.msra.mxu1 %v2552_v28  ;;  %v2595_v57 = vld [vmem:[#allocation5 + $0x130] sm:$0xff]  ;;  %871 = vmatpush.msra.mxu0 %v2427_v15 }
  0xab   :  { %600 = vmatpush.msra.mxu2 %v2566_v38  ;;  %v2658_v15 = vld [vmem:[#allocation5 + $0x30] sm:$0xff] }
  0xac   :  { %v214_v7 = vmax.f32 %v206_v61, 0.0  ;;  %588 = vmatpush.msra.mxu1 %v2576_v45  ;;  %v2602_v61 = vld [vmem:[#allocation5 + $0x110] sm:$0xff]  ;;  %872 = vmatpush.msra.mxu0 %v2434_v18  ;;  %v2644_v18 = vld [vmem:[#allocation5 + $0x18] sm:$0xff]  ;;  %3606 = vst [vmem:[#allocation31_spill] sm:$0xff] %v2658_v15 }
  0xad   :  { %601 = vmatpush.msra.mxu2 %v2574_v41  ;;  %3603 = vst [vmem:[#allocation28_spill] sm:$0xff] %v2644_v18 }
  0xae   :  { %1891 = vmatmul.msk.f32.gmra.mxu0 %vm263_vm0, %v214_v7  ;;  %1899 = vmatmul.msk.f32.gmra.mxu1 %vm263_vm0, %v214_v7  ;;  %v120_v11 = vpop.permute.xlu1 %119 }
  0xaf   :  { %1907 = vmatmul.msk.f32.gmra.mxu2 %vm263_vm0, %v214_v7  ;;  %1914 = vmatmul.msk.f32.vlgmr.msrb.gmra.mxu3 %vm263_vm0, %v2448_v25  ;;  %v146_v14 = vmul.f32 %v2366_v43, %v120_v11  ;;  %v2556_v43 = vld [vmem:[#allocation5 + $0xd8] sm:$0xff]  ;;  %v2615_v11 = vld [vmem:[#allocation5 + $0x8] sm:$0xff] }
  0xb0   :  { %626 = vmatpush.msra.mxu3 %v2556_v43  ;;  %589 = vmatpush.msra.mxu1 %v2582_v47  ;;  %3599 = vst [vmem:[#allocation24_spill] sm:$0xff] %v2615_v11 }
  0xb1   :  { %v196_v25 = vadd.f32 %v188_v8, %v146_v14  ;;  %v2612_v8 = vld [vmem:[#allocation5 + $0xf0] sm:$0xff]  ;;  %v2617_v14 = vld [vmem:[#allocation5 + $0x58] sm:$0xff]  ;;  %873 = vmatpush.msra.mxu0 %v2440_v22 }
  0xb2   :  { %627 = vmatpush.msra.mxu3 %v2580_v46  ;;  %590 = vmatpush.msra.mxu1 %v2604_v0  ;;  %3600 = vst [vmem:[#allocation25_spill] sm:$0xff] %v2617_v14  ;;  %v2646_v22 = vld [vmem:[#allocation5 + $0x70] sm:$0xff] }
  0xb3   :  { %v208_v40 = vadd.f32 %v2378_v51, %v196_v25  ;;  %v2584_v51 = vld [vmem:[#allocation5 + $0x150] sm:$0xff]  ;;  %3604 = vst [vmem:[#allocation29_spill] sm:$0xff] %v2646_v22  ;;  %874 = vmatpush.msra.mxu0 %v2464_v30 }
  0xb4   :  { %628 = vmatpush.msra.mxu3 %v2587_v53  ;;  %602 = vmatpush.msra.mxu2 %v2584_v51  ;;  %v2628_v25 = vld [vmem:[#allocation5 + $0xb0] sm:$0xff] }
  0xb5   :  { %v216_v56 = vmax.f32 %v208_v40, 0.0  ;;  %v2640_v40 = vld [vmem:[#allocation5 + $0x38] sm:$0xff]  ;;  %875 = vmatpush.msra.mxu0 %v2468_v31  ;;  %v2669_v30 = vld [vmem:[#allocation5 + $0x10] sm:$0xff] }
  0xb6   :  { %1892 = vmatmul.msk.f32.gmra.mxu0 %vm263_vm0, %v215_v34  ;;  %1900 = vmatmul.msk.f32.gmra.mxu1 %vm263_vm0, %v215_v34  ;;  %3602 = vst [vmem:[#allocation27_spill] sm:$0xff] %v2640_v40 }
  0xb7   :  { %1908 = vmatmul.msk.f32.gmra.mxu2 %vm263_vm0, %v215_v34  ;;  %1915 = vmatmul.msk.f32.gmra.mxu3 %vm263_vm0, %v214_v7  ;;  %v2610_v7 = vld [vmem:[#allocation5 + $0x28] sm:$0xff]  ;;  %3607 = vst [vmem:[#allocation32_spill] sm:$0xff] %v2669_v30 }
  0xb8   :  { %603 = vmatpush.msra.mxu2 %v2595_v57  ;;  %3598 = vst [vmem:[#allocation23_spill] sm:$0xff] %v2610_v7  ;;  %629 = vmatpush.msra.mxu3 %v2608_v2 }
  0xb9   :  { %591 = vmatpush.msra.mxu1 %v2610_v7  ;;  %876 = vmatpush.msra.mxu0 %v2476_v35 }
  0xba   :  { %604 = vmatpush.msra.mxu2 %v2602_v61  ;;  %630 = vmatpush.msra.mxu3 %v2617_v14 }
  0xbb   :  { %592 = vmatpush.msra.mxu1 %v2615_v11  ;;  %877 = vmatpush.msra.mxu0 %v2485_v39 }
  0xbc   :  { %605 = vmatpush.msra.mxu2 %v2612_v8  ;;  %631 = vmatpush.msra.mxu3 %v2640_v40 }
  0xbd   :  { %732 = vmatpush.msrb.mxu1 %v2404_v5  ;;  %878 = vmatpush.msra.mxu0 %v2501_v48 }
  0xbe   :  { %1893 = vmatmul.msk.f32.gmra.mxu0 %vm263_vm0, %v216_v56  ;;  %1901 = vmatmul.msk.f32.gmra.mxu1 %vm263_vm0, %v216_v56 }
  0xbf   :  { %1909 = vmatmul.msk.f32.gmra.mxu2 %vm263_vm0, %v216_v56  ;;  %1916 = vmatmul.msk.f32.gmra.mxu3 %vm263_vm0, %v215_v34  ;;  %v2638_v34 = vld [vmem:[#allocation5 + $0x90] sm:$0xff] }
  0xc0   :  { %606 = vmatpush.msra.mxu2 %v2622_v21  ;;  %3601 = vst [vmem:[#allocation26_spill] sm:$0xff] %v2638_v34  ;;  %733 = vmatpush.msrb.mxu1 %v2415_v9 }
  0xc1   :  { %632 = vmatpush.msra.mxu3 %v2644_v18  ;;  %879 = vmatpush.msra.mxu0 %v2504_v49 }
  0xc2   :  { %607 = vmatpush.msra.mxu2 %v2628_v25  ;;  %734 = vmatpush.msrb.mxu1 %v2423_v13 }
  0xc3   :  { %772 = vmatpush.msrb.mxu3 %v2406_v6  ;;  %880 = vmatpush.msra.mxu0 %v2515_v58 }
  0xc4   :  { %608 = vmatpush.msra.mxu2 %v2638_v34  ;;  %735 = vmatpush.msrb.mxu1 %v2432_v17 }
  0xc5   :  { %773 = vmatpush.msrb.mxu3 %v2417_v10  ;;  %881 = vmatpush.msra.mxu0 %v2524_v63 }
  0xc6   :  { %1902 = vmatmul.msk.f32.gmra.mxu1 %vm263_vm0, %v2402_v4  ;;  %609 = vmatpush.msra.mxu2 %v2646_v22 }
  0xc7   :  { %1910 = vmatmul.msk.f32.gmra.mxu2 %vm263_vm0, %v2402_v4  ;;  %1917 = vmatmul.msk.f32.gmra.mxu3 %vm263_vm0, %v216_v56  ;;  %v2652_v56 = vld [vmem:[#allocation5 + $0x50] sm:$0xff] }
  0xc8   :  { %3605 = vst [vmem:[#allocation30_spill] sm:$0xff] %v2652_v56  ;;  %610 = vmatpush.msra.mxu2 %v2652_v56  ;;  %774 = vmatpush.msrb.mxu3 %v2429_v16 }
  0xc9   :  { %736 = vmatpush.msrb.mxu1 %v2451_v26  ;;  %882 = vmatpush.msra.mxu0 %v2535_v12 }
  0xca   :  { %611 = vmatpush.msra.mxu2 %v2658_v15  ;;  %775 = vmatpush.msrb.mxu3 %v2442_v23 }
  0xcb   :  { %737 = vmatpush.msrb.mxu1 %v2470_v32 }
  0xcc   :  { %612 = vmatpush.msra.mxu2 %v2669_v30  ;;  %776 = vmatpush.msrb.mxu3 %v2472_v33 }
  0xcd   :  { %738 = vmatpush.msrb.mxu1 %v2478_v36 }
  0xce   :  { %1903 = vmatmul.msk.f32.gmra.mxu1 %vm263_vm0, %v2444_v24  ;;  %777 = vmatpush.msrb.mxu3 %v2481_v37 }
  0xcf   :  { %1911 = vmatmul.msk.f32.gmra.mxu2 %vm263_vm0, %v2444_v24  ;;  %1918 = vmatmul.msk.f32.gmra.mxu3 %vm263_vm0, %v2402_v4  ;;  %v89_v4 = vld [vmem:[%s3474_s1] sm:$0xff] }
  0xd0   :  { %778 = vmatpush.msrb.mxu3 %v2508_v52  ;;  %739 = vmatpush.msrb.mxu1 %v2506_v50 }
  0xd2   :  { %779 = vmatpush.msrb.mxu3 %v2520_v60  ;;  %740 = vmatpush.msrb.mxu1 %v2517_v59 }
  0xd4   :  { %780 = vmatpush.msrb.mxu3 %v2550_v27  ;;  %741 = vmatpush.msrb.mxu1 %v2543_v20 }
  0xd6   :  { %1904 = vmatmul.msk.f32.gmra.mxu1 %vm263_vm0, %v2400_v3  ;;  %781 = vmatpush.msrb.mxu3 %v2556_v43 }
  0xd7   :  { %1912 = vmatmul.msk.f32.gmra.mxu2 %vm263_vm0, %v2400_v3  ;;  %1919 = vmatmul.msk.f32.gmra.mxu3 %vm263_vm0, %v2444_v24 }
  0xd8   :  { %742 = vmatpush.msrb.mxu1 %v2552_v28  ;;  %782 = vmatpush.msrb.mxu3 %v2580_v46 }
  0xda   :  { %743 = vmatpush.msrb.mxu1 %v2576_v45  ;;  %783 = vmatpush.msrb.mxu3 %v2587_v53 }
  0xdc   :  { %744 = vmatpush.msrb.mxu1 %v2582_v47  ;;  %784 = vmatpush.msrb.mxu3 %v2608_v2 }
  0xde   :  { %1905 = vmatmul.msk.f32.gmra.mxu1 %vm263_vm0, %v2492_v42  ;;  %785 = vmatpush.msrb.mxu3 %v2617_v14 }
  0xdf   :  { %1913 = vmatmul.msk.f32.gmra.mxu2 %vm263_vm0, %v2492_v42  ;;  %1920 = vmatmul.msk.f32.gmra.mxu3 %vm263_vm0, %v2400_v3  ;;  %v2772_v3 = vld [vmem:[%s3480_s7] sm:$0xf] }
  0xe0   :  { %745 = vmatpush.msrb.mxu1 %v2604_v0  ;;  %786 = vmatpush.msrb.mxu3 %v2640_v40  ;;  %v2780_v24 = vperm.slane %v2772_v3, 0 }
  0xe2   :  { %746 = vmatpush.msrb.mxu1 %v2610_v7  ;;  %787 = vmatpush.msrb.mxu3 %v2644_v18  ;;  %3608 = vst [vmem:[#allocation33_spill] sm:$0xff] %v2780_v24 }
  0xe4   :  { %747 = vmatpush.msrb.mxu1 %v2615_v11 }
  0xe6   :  { %593 = vmatmul.f32.vlgmr.msra.gmra.mxu1 %v89_v4 }
  0xe7   :  { %1921 = vmatmul.msk.f32.gmra.mxu3 %vm263_vm0, %v2492_v42  ;;  %573 = vmatmul.f32.vlgmr.msrb.gmra.mxu2 %v89_v4 }
  0xe8   :  { %752 = vmatpush.msrb.mxu2 %v2541_v19  ;;  %887 = vmatpush.msra.mxu1 %v2404_v5 }
  0xea   :  { %753 = vmatpush.msrb.mxu2 %v2548_v44  ;;  %888 = vmatpush.msra.mxu1 %v2415_v9 }
  0xec   :  { %754 = vmatpush.msrb.mxu2 %v2558_v29  ;;  %889 = vmatpush.msra.mxu1 %v2423_v13 }
  0xee   :  { %755 = vmatpush.msrb.mxu2 %v2566_v38  ;;  %890 = vmatpush.msra.mxu1 %v2432_v17 }
  0xef   :  { %613 = vmatmul.f32.vlgmr.msra.gmra.mxu2 %v89_v4  ;;  %633 = vmatmul.f32.vlgmr.msra.gmra.mxu3 %v89_v4 }
  0xf0   :  { %756 = vmatpush.msrb.mxu2 %v2574_v41  ;;  %927 = vmatpush.msra.mxu3 %v2406_v6 }
  0xf1   :  { %891 = vmatpush.msra.mxu1 %v2451_v26 }
  0xf2   :  { %757 = vmatpush.msrb.mxu2 %v2584_v51  ;;  %928 = vmatpush.msra.mxu3 %v2417_v10 }
  0xf3   :  { %892 = vmatpush.msra.mxu1 %v2470_v32 }
  0xf4   :  { %758 = vmatpush.msrb.mxu2 %v2595_v57  ;;  %929 = vmatpush.msra.mxu3 %v2429_v16 }
  0xf5   :  { %893 = vmatpush.msra.mxu1 %v2478_v36 }
  0xf6   :  { %759 = vmatpush.msrb.mxu2 %v2602_v61  ;;  %930 = vmatpush.msra.mxu3 %v2442_v23 }
  0xf7   :  { %894 = vmatpush.msra.mxu1 %v2506_v50 }
  0xf8   :  { %760 = vmatpush.msrb.mxu2 %v2612_v8  ;;  %931 = vmatpush.msra.mxu3 %v2472_v33 }
  0xf9   :  { %895 = vmatpush.msra.mxu1 %v2517_v59 }
  0xfa   :  { %761 = vmatpush.msrb.mxu2 %v2622_v21  ;;  %932 = vmatpush.msra.mxu3 %v2481_v37 }
  0xfb   :  { %896 = vmatpush.msra.mxu1 %v2543_v20 }
  0xfc   :  { %762 = vmatpush.msrb.mxu2 %v2628_v25  ;;  %933 = vmatpush.msra.mxu3 %v2508_v52 }
  0xfd   :  { %897 = vmatpush.msra.mxu1 %v2552_v28 }
  0xfe   :  { %763 = vmatpush.msrb.mxu2 %v2638_v34  ;;  %934 = vmatpush.msra.mxu3 %v2520_v60 }
  0xff   :  { %898 = vmatpush.msra.mxu1 %v2576_v45 }
 0x100   :  { %764 = vmatpush.msrb.mxu2 %v2646_v22  ;;  %935 = vmatpush.msra.mxu3 %v2550_v27 }
 0x101   :  { %899 = vmatpush.msra.mxu1 %v2582_v47 }
 0x102   :  { %765 = vmatpush.msrb.mxu2 %v2652_v56  ;;  %936 = vmatpush.msra.mxu3 %v2556_v43 }
 0x103   :  { %900 = vmatpush.msra.mxu1 %v2604_v0 }
 0x104   :  { %766 = vmatpush.msrb.mxu2 %v2658_v15  ;;  %937 = vmatpush.msra.mxu3 %v2580_v46 }
 0x105   :  { %901 = vmatpush.msra.mxu1 %v2610_v7 }
 0x106   :  { %767 = vmatpush.msrb.mxu2 %v2669_v30  ;;  %938 = vmatpush.msra.mxu3 %v2587_v53 }
 0x107   :  { %902 = vmatpush.msra.mxu1 %v2615_v11 }
 0x108   :  { %907 = vmatpush.msra.mxu2 %v2541_v19  ;;  %939 = vmatpush.msra.mxu3 %v2608_v2 }
 0x10a   :  { %908 = vmatpush.msra.mxu2 %v2548_v44  ;;  %940 = vmatpush.msra.mxu3 %v2617_v14 }
 0x10c   :  { %909 = vmatpush.msra.mxu2 %v2558_v29  ;;  %941 = vmatpush.msra.mxu3 %v2640_v40 }
 0x10e   :  { %910 = vmatpush.msra.mxu2 %v2566_v38  ;;  %942 = vmatpush.msra.mxu3 %v2644_v18 }
 0x110   :  { %911 = vmatpush.msra.mxu2 %v2574_v41 }
 0x112   :  { %v317_v42 = vpop.f32.mrf.mxu1  ;;  %912 = vmatpush.msra.mxu2 %v2584_v51 }
 0x113   :  { %v2786_v4 = vadd.f32 %v317_v42, %v2780_v24 }
 0x114   :  { %913 = vmatpush.msra.mxu2 %v2595_v57 }
 0x115   :  { %3609 = vst [vmem:[#allocation34_spill] sm:$0xff] %v2786_v4 }
 0x116   :  { %914 = vmatpush.msra.mxu2 %v2602_v61 }
 0x117   :  { %v323_v12 = vpop.f32.mrf.mxu3 }
 0x118   :  { %915 = vmatpush.msra.mxu2 %v2612_v8  ;;  %v2792_v11 = vadd.f32 %v323_v12, %v2780_v24 }
 0x11a   :  { %3610 = vst [vmem:[#allocation35_spill] sm:$0xff] %v2792_v11  ;;  %v320_v40 = vpop.f32.mrf.mxu1  ;;  %916 = vmatpush.msra.mxu2 %v2622_v21  ;;  %v305_v42 = vpop.f32.mrf.mxu0 }
 0x11b   :  { %v2796_v18 = vadd.f32 %v320_v40, %v2780_v24  ;;  %v256_v40 = vperm.slane %v2772_v3, 1 }
 0x11c   :  { %917 = vmatpush.msra.mxu2 %v2628_v25 }
 0x11d   :  { %3611 = vst [vmem:[#allocation36_spill] sm:$0xff] %v2796_v18 }
 0x11e   :  { %918 = vmatpush.msra.mxu2 %v2638_v34 }
 0x120   :  { %919 = vmatpush.msra.mxu2 %v2646_v22  ;;  %v258_v22 = vperm.slane %v2772_v3, 3 }
 0x121   :  { %v2804_v11 = vpop.f32.mrf.mxu2 }
 0x122   :  { %920 = vmatpush.msra.mxu2 %v2652_v56  ;;  %v346_v4 = vpop.f32.mrf.mxu1 }
 0x124   :  { %921 = vmatpush.msra.mxu2 %v2658_v15 }
 0x126   :  { %922 = vmatpush.msra.mxu2 %v2669_v30 }
 0x129   :  { %v326_v12 = vpop.f32.mrf.mxu3 }
 0x12a   :  { %v2808_v18 = vadd.f32 %v326_v12, %v2780_v24 }
 0x12b   :  { %v2810_v7 = vpop.f32.mrf.mxu0  ;;  %v349_v63 = vpop.f32.mrf.mxu1 }
 0x12c   :  { %3612 = vst [vmem:[#allocation37_spill] sm:$0xff] %v2808_v18  ;;  %v2812_v14 = vadd.f32 %v349_v63, %v256_v40 }
 0x12d   :  { %3613 = vst [vmem:[#allocation38_spill] sm:$0xff] %v2810_v7 }
 0x12e   :  { %3614 = vst [vmem:[#allocation39_spill] sm:$0xff] %v2812_v14 }
 0x132   :  { %v2814_v56 = vpop.f32.mrf.mxu2  ;;  %v428_v0 = vpop.f32.mrf.mxu3 }
 0x133   :  { %3615 = vst [vmem:[#allocation40_spill] sm:$0xff] %v2814_v56  ;;  %v311_v58 = vpop.f32.mrf.mxu0  ;;  %v352_v15 = vpop.f32.mrf.mxu1 }
 0x134   :  { %v2817_v30 = vadd.f32 %v311_v58, %v2780_v24  ;;  %v2819_v2 = vadd.f32 %v352_v15, %v256_v40 }
 0x136   :  { %3616 = vst [vmem:[#allocation41_spill] sm:$0xff] %v2817_v30 }
 0x137   :  { %3617 = vst [vmem:[#allocation42_spill] sm:$0xff] %v2819_v2 }
 0x13a   :  { %v2822_v47 = vpop.f32.mrf.mxu2  ;;  %v431_v12 = vpop.f32.mrf.mxu3 }
 0x13b   :  { %3618 = vst [vmem:[#allocation43_spill] sm:$0xff] %v2822_v47  ;;  %v2824_v18 = vadd.f32 %v431_v12, %v258_v22  ;;  %v355_v7 = vpop.f32.mrf.mxu1 }
 0x13c   :  { %v2826_v63 = vadd.f32 %v355_v7, %v256_v40 }
 0x13d   :  { %3619 = vst [vmem:[#allocation44_spill] sm:$0xff] %v2824_v18 }
 0x13e   :  { %3620 = vst [vmem:[#allocation45_spill] sm:$0xff] %v2826_v63 }
 0x142   :  { %v2828_v14 = vpop.f32.mrf.mxu2  ;;  %v434_v56 = vpop.f32.mrf.mxu3 }
 0x143   :  { %3621 = vst [vmem:[#allocation46_spill] sm:$0xff] %v2828_v14  ;;  %v2830_v49 = vadd.f32 %v434_v56, %v258_v22  ;;  %v358_v53 = vpop.f32.mrf.mxu1 }
 0x144   :  { %v2832_v58 = vadd.f32 %v358_v53, %v256_v40 }
 0x145   :  { %3622 = vst [vmem:[#allocation47_spill] sm:$0xff] %v2830_v49 }
 0x146   :  { %3623 = vst [vmem:[#allocation48_spill] sm:$0xff] %v2832_v58 }
 0x14a   :  { %v2834_v15 = vpop.f32.mrf.mxu2  ;;  %v437_v2 = vpop.f32.mrf.mxu3 }
 0x14b   :  { %3624 = vst [vmem:[#allocation49_spill] sm:$0xff] %v2834_v15  ;;  %v2836_v30 = vadd.f32 %v437_v2, %v258_v22  ;;  %v361_v47 = vpop.f32.mrf.mxu1  ;;  %v347_v2 = vadd.f32 %v346_v4, %v256_v40  ;;  %v429_v4 = vadd.f32 %v428_v0, %v258_v22 }
 0x14c   :  { %v2838_v34 = vadd.f32 %v361_v47, %v256_v40 }
 0x14d   :  { %3625 = vst [vmem:[#allocation50_spill] sm:$0xff] %v2836_v30 }
 0x14e   :  { %3626 = vst [vmem:[#allocation51_spill] sm:$0xff] %v2838_v34 }
 0x152   :  { %v2840_v12 = vpop.f32.mrf.mxu2  ;;  %v440_v7 = vpop.f32.mrf.mxu3 }
 0x153   :  { %3627 = vst [vmem:[#allocation52_spill] sm:$0xff] %v2840_v12  ;;  %v2842_v63 = vadd.f32 %v440_v7, %v258_v22  ;;  %v364_v14 = vpop.f32.mrf.mxu1 }
 0x154   :  { %v2844_v18 = vadd.f32 %v364_v14, %v256_v40  ;;  %v306_v14 = vadd.f32 %v305_v42, %v2780_v24  ;;  %v2860_v42 = vperm.slane %v2772_v3, 2 }
 0x155   :  { %3628 = vst [vmem:[#allocation53_spill] sm:$0xff] %v2842_v63 }
 0x156   :  { %3629 = vst [vmem:[#allocation54_spill] sm:$0xff] %v2844_v18 }
 0x157   :  { %3636 = vst [vmem:[#allocation61_spill] sm:$0xff] %v2860_v42 }
 0x15a   :  { %v2846_v56 = vpop.f32.mrf.mxu2  ;;  %v443_v53 = vpop.f32.mrf.mxu3 }
 0x15b   :  { %3630 = vst [vmem:[#allocation55_spill] sm:$0xff] %v2846_v56  ;;  %v2848_v58 = vadd.f32 %v443_v53, %v258_v22  ;;  %v367_v15 = vpop.f32.mrf.mxu1 }
 0x15c   :  { %v2850_v49 = vadd.f32 %v367_v15, %v256_v40 }
 0x15d   :  { %3631 = vst [vmem:[#allocation56_spill] sm:$0xff] %v2848_v58 }
 0x15e   :  { %3632 = vst [vmem:[#allocation57_spill] sm:$0xff] %v2850_v49 }
 0x162   :  { %v2852_v30 = vpop.f32.mrf.mxu2  ;;  %v446_v47 = vpop.f32.mrf.mxu3 }
 0x163   :  { %3633 = vst [vmem:[#allocation58_spill] sm:$0xff] %v2852_v30  ;;  %v2854_v34 = vadd.f32 %v446_v47, %v258_v22  ;;  %v594_v12 = vpop.f32.mrf.mxu1 }
 0x164   :  { %v638_v7 = vadd.f32 %v594_v12, %v347_v2 }
 0x165   :  { %3634 = vst [vmem:[#allocation59_spill] sm:$0xff] %v2854_v34 }
 0x166   :  { %v1923_v63 = vmul.f32 -1.442695, %v638_v7  ;;  %v388_v7 = vadd.f32 %v2804_v11, %v2860_v42 }
 0x168   :  { %1988 = vpow2.f32 %v1923_v63 }
 0x16a   :  { %v449_v18 = vpop.f32.mrf.mxu3  ;;  %v574_v56 = vpop.f32.mrf.mxu2 }
 0x16b   :  { %v2857_v45 = vadd.f32 %v449_v18, %v258_v22  ;;  %v637_v53 = vadd.f32 %v574_v56, %v306_v14 }
 0x16d   :  { %3635 = vst [vmem:[#allocation60_spill] sm:$0xff] %v2857_v45  ;;  %v1922_v58 = vmul.f32 -1.442695, %v637_v53 }
 0x16e   :  { %v1989_v15 = vpop.eup %1988 }
 0x16f   :  { %v663_v49 = vadd.f32 1.0, %v1989_v15  ;;  %1990 = vpow2.f32 %v1922_v58 }
 0x171   :  { %1992 = vrcp.f32 %v663_v49  ;;  %vm669_vm2 = vweird.f32 %v663_v49  ;;  %v673_v3 = vand.u32 2147483647, %v663_v49 }
 0x172   :  { %v634_v40 = vpop.f32.mrf.mxu3  ;;  %v614_v56 = vpop.f32.mrf.mxu2 }
 0x173   :  { %v640_v47 = vadd.f32 %v634_v40, %v429_v4  ;;  %v639_v14 = vadd.f32 %v614_v56, %v388_v7  ;;  %v675_v4 = vand.u32 2147483648, %v663_v49  ;;  %vm674_vm6 = vcmp.eq.f32.partialorder %v673_v3, 8.507059e+37 }
 0x175   :  { %v1991_v30 = vpop.eup %1990  ;;  %v1924_v34 = vmul.f32 -1.442695, %v640_v47  ;;  %v676_v56 = vor.u32 1.1754944e-38, %v675_v4 }
 0x176   :  { %v644_v12 = vadd.f32 1.0, %v1991_v30 }
 0x177   :  { %v1993_v2 = vpop.eup %1992  ;;  %1994 = vpow2.f32 %v1924_v34 }
 0x178   :  { %v665_v63 = vmul.f32 %v1993_v2, %v663_v49  ;;  %1996 = vrcp.f32 %v644_v12  ;;  %vm670_vm1 = vweird.f32 %v1993_v2  ;;  %v656_v47 = vand.u32 2147483648, %v644_v12  ;;  %v91_v49 = vld [vmem:[%s3475_s2] sm:$0xff] }
 0x179   :  { %vm2864_vm3 = vmor %vm669_vm2, %vm670_vm1  ;;  %vm650_vm5 = vweird.f32 %v644_v12 }
 0x17a   :  { %v666_v18 = vsub.f32 1.0, %v665_v63  ;;  %v654_v63 = vand.u32 2147483647, %v644_v12 }
 0x17c   :  { %v667_v58 = vmul.f32 %v1993_v2, %v666_v18  ;;  %vm655_vm8 = vcmp.eq.f32.partialorder %v654_v63, 8.507059e+37 }
 0x17d   :  { %v1995_v22 = vpop.eup %1994 }
 0x17e   :  { %v1997_v0 = vpop.eup %1996  ;;  %v683_v53 = vadd.f32 1.0, %v1995_v22  ;;  %v668_v30 = vadd.f32 %v1993_v2, %v667_v58  ;;  %v657_v22 = vor.u32 1.1754944e-38, %v656_v47 }
 0x17f   :  { %v646_v15 = vmul.f32 %v1997_v0, %v644_v12  ;;  %vm651_vm4 = vweird.f32 %v1997_v0 }
 0x180   :  { %1998 = vrcp.f32 %v683_v53  ;;  %v672_v18 = vsel %vm2864_vm3, %v1993_v2, %v668_v30  ;;  %vm652_vm7 = vmor %vm650_vm5, %vm651_vm4  ;;  %v695_v4 = vand.u32 2147483648, %v683_v53  ;;  %vm689_vm10 = vweird.f32 %v683_v53 }
 0x181   :  { %v647_v34 = vsub.f32 1.0, %v646_v15  ;;  %2000 = vtanh.f32 %v639_v14  ;;  %v677_v15 = vsel %vm674_vm6, %v676_v56, %v672_v18 }
 0x182   :  { %v699_v24 = vmul.f32 %v677_v15, %v91_v49  ;;  %v3667_v49 = vld [vmem:[#allocation44_spill] sm:$0xff] }
 0x183   :  { %v648_v11 = vmul.f32 %v1997_v0, %v647_v34 }
 0x185   :  { %v649_v7 = vadd.f32 %v1997_v0, %v648_v11  ;;  %v693_v11 = vand.u32 2147483647, %v683_v53 }
 0x186   :  { %v1999_v58 = vpop.eup %1998 }
 0x187   :  { %v653_v45 = vsel %vm652_vm7, %v1997_v0, %v649_v7  ;;  %v685_v14 = vmul.f32 %v1999_v58, %v683_v53  ;;  %v2001_v34 = vpop.eup %2000  ;;  %vm690_vm9 = vweird.f32 %v1999_v58  ;;  %v696_v0 = vor.u32 1.1754944e-38, %v695_v4 }
 0x188   :  { %v658_v42 = vsel %vm655_vm8, %v657_v22, %v653_v45  ;;  %vm691_vm11 = vmor %vm689_vm10, %vm690_vm9  ;;  %vm694_vm12 = vcmp.eq.f32.partialorder %v693_v11, 8.507059e+37  ;;  %v3669_v11 = vld [vmem:[#allocation40_spill] sm:$0xff] }
 0x189   :  { %v700_v40 = vmul.f32 %v2001_v34, %v658_v42  ;;  %v686_v2 = vsub.f32 1.0, %v685_v14  ;;  %v3666_v42 = vld [vmem:[#allocation39_spill] sm:$0xff] }
 0x18b   :  { %v2873_v30 = vadd.f32 %v700_v40, %v699_v24  ;;  %v687_v12 = vmul.f32 %v1999_v58, %v686_v2 }
 0x18d   :  { %2002 = vtanh.f32 %v2873_v30  ;;  %v688_v3 = vadd.f32 %v1999_v58, %v687_v12 }
 0x18f   :  { %v692_v47 = vsel %vm691_vm11, %v1999_v58, %v688_v3  ;;  %v3668_v3 = vld [vmem:[#allocation61_spill] sm:$0xff] }
 0x190   :  { %v697_v18 = vsel %vm694_vm12, %v696_v0, %v692_v47  ;;  %v391_v47 = vadd.f32 %v3669_v11, %v3668_v3 }
 0x193   :  { %v2003_v63 = vpop.eup %2002 }
 0x194   :  { %v2876_v45 = vmul.f32 %v2003_v63, %v697_v18 }
 0x196   :  { %3639 = vst [vmem:[#allocation62_spill] sm:$0xff] %v2876_v45  ;;  %728 = vmatmul.f32.vlgmr.msrb.gmra.mxu0 %v2876_v45  ;;  %748 = vmatmul.f32.vlgmr.msrb.gmra.mxu1 %v2876_v45 }
 0x197   :  { %768 = vmatmul.f32.vlgmr.msrb.gmra.mxu2 %v2876_v45  ;;  %788 = vmatmul.f32.vlgmr.msrb.gmra.mxu3 %v2876_v45 }
 0x198   :  { %1022 = vmatpush.msrb.mxu0 %v2382_v54  ;;  %1042 = vmatpush.msrb.mxu1 %v2404_v5  ;;  %v3640_v54 = vld [vmem:[#allocation10_spill] sm:$0xff] }
 0x199   :  { %1062 = vmatpush.msrb.mxu2 %v2541_v19  ;;  %1082 = vmatpush.msrb.mxu3 %v2406_v6  ;;  %v3644_v5 = vld [vmem:[#allocation18_spill] sm:$0xff] }
 0x19a   :  { %1023 = vmatpush.msrb.mxu0 %v2384_v55  ;;  %1043 = vmatpush.msrb.mxu1 %v2415_v9  ;;  %v3641_v55 = vld [vmem:[#allocation11_spill] sm:$0xff]  ;;  %v3645_v6 = vld [vmem:[#allocation26_spill] sm:$0xff]  ;;  %v3646_v9 = vld [vmem:[#allocation20_spill] sm:$0xff] }
 0x19b   :  { %1063 = vmatpush.msrb.mxu2 %v2548_v44  ;;  %1083 = vmatpush.msrb.mxu3 %v2417_v10  ;;  %v3647_v10 = vld [vmem:[#allocation14_spill] sm:$0xff] }
 0x19c   :  { %1024 = vmatpush.msrb.mxu0 %v2391_v62  ;;  %1044 = vmatpush.msrb.mxu1 %v2423_v13  ;;  %v3642_v62 = vld [vmem:[#allocation12_spill] sm:$0xff]  ;;  %v3648_v13 = vld [vmem:[#allocation19_spill] sm:$0xff] }
 0x19d   :  { %1064 = vmatpush.msrb.mxu2 %v2558_v29  ;;  %1084 = vmatpush.msrb.mxu3 %v2429_v16  ;;  %v3649_v16 = vld [vmem:[#allocation29_spill] sm:$0xff] }
 0x19e   :  { %1025 = vmatpush.msrb.mxu0 %v2396_v1  ;;  %1045 = vmatpush.msrb.mxu1 %v2432_v17  ;;  %v3643_v1 = vld [vmem:[#allocation13_spill] sm:$0xff]  ;;  %v3650_v17 = vld [vmem:[#allocation22_spill] sm:$0xff] }
 0x19f   :  { %1065 = vmatpush.msrb.mxu2 %v2566_v38  ;;  %1085 = vmatpush.msrb.mxu3 %v2442_v23  ;;  %v3651_v23 = vld [vmem:[#allocation15_spill] sm:$0xff] }
 0x1a0   :  { %1026 = vmatpush.msrb.mxu0 %v3640_v54  ;;  %1046 = vmatpush.msrb.mxu1 %v2451_v26  ;;  %v3652_v26 = vld [vmem:[#allocation21_spill] sm:$0xff] }
 0x1a1   :  { %1066 = vmatpush.msrb.mxu2 %v2574_v41  ;;  %1086 = vmatpush.msrb.mxu3 %v2472_v33  ;;  %v3655_v33 = vld [vmem:[#allocation16_spill] sm:$0xff] }
 0x1a2   :  { %1027 = vmatpush.msrb.mxu0 %v3641_v55  ;;  %1047 = vmatpush.msrb.mxu1 %v2470_v32  ;;  %v3654_v32 = vld [vmem:[#allocation25_spill] sm:$0xff] }
 0x1a3   :  { %1067 = vmatpush.msrb.mxu2 %v2584_v51  ;;  %1087 = vmatpush.msrb.mxu3 %v2481_v37  ;;  %v3658_v37 = vld [vmem:[#allocation27_spill] sm:$0xff] }
 0x1a4   :  { %1028 = vmatpush.msrb.mxu0 %v3642_v62  ;;  %1048 = vmatpush.msrb.mxu1 %v2478_v36  ;;  %v3657_v36 = vld [vmem:[#allocation31_spill] sm:$0xff] }
 0x1a5   :  { %1068 = vmatpush.msrb.mxu2 %v2595_v57  ;;  %1088 = vmatpush.msrb.mxu3 %v2508_v52  ;;  %v3662_v52 = vld [vmem:[#allocation28_spill] sm:$0xff] }
 0x1a6   :  { %1029 = vmatpush.msrb.mxu0 %v3643_v1  ;;  %1049 = vmatpush.msrb.mxu1 %v2506_v50  ;;  %v3661_v50 = vld [vmem:[#allocation32_spill] sm:$0xff] }
 0x1a7   :  { %1069 = vmatpush.msrb.mxu2 %v2602_v61  ;;  %1089 = vmatpush.msrb.mxu3 %v2520_v60  ;;  %v3664_v60 = vld [vmem:[#allocation33_spill] sm:$0xff] }
 0x1a8   :  { %1030 = vmatpush.msrb.mxu0 %v2468_v31  ;;  %1050 = vmatpush.msrb.mxu1 %v2517_v59  ;;  %v3653_v31 = vld [vmem:[#allocation30_spill] sm:$0xff]  ;;  %v2946_v59 = vpop.f32.mrf.mxu0 }
 0x1a9   :  { %1070 = vmatpush.msrb.mxu2 %v2612_v8  ;;  %1090 = vmatpush.msrb.mxu3 %v2550_v27  ;;  %3663 = vst [vmem:[#allocation10_spill] sm:$0xff] %v2946_v59 }
 0x1aa   :  { %1031 = vmatpush.msrb.mxu0 %v2476_v35  ;;  %1051 = vmatpush.msrb.mxu1 %v2543_v20  ;;  %v3656_v35 = vld [vmem:[#allocation23_spill] sm:$0xff]  ;;  %v3665_v20 = vld [vmem:[#allocation38_spill] sm:$0xff] }
 0x1ab   :  { %1071 = vmatpush.msrb.mxu2 %v2622_v21  ;;  %1091 = vmatpush.msrb.mxu3 %v2556_v43  ;;  %v309_v27 = vadd.f32 %v3665_v20, %v3664_v60 }
 0x1ac   :  { %1032 = vmatpush.msrb.mxu0 %v2485_v39  ;;  %1052 = vmatpush.msrb.mxu1 %v2552_v28  ;;  %v3659_v39 = vld [vmem:[#allocation17_spill] sm:$0xff] }
 0x1ad   :  { %1072 = vmatpush.msrb.mxu2 %v2628_v25  ;;  %1092 = vmatpush.msrb.mxu3 %v2580_v46 }
 0x1ae   :  { %1033 = vmatpush.msrb.mxu0 %v2501_v48  ;;  %1053 = vmatpush.msrb.mxu1 %v3644_v5  ;;  %v3660_v48 = vld [vmem:[#allocation24_spill] sm:$0xff] }
 0x1af   :  { %1073 = vmatpush.msrb.mxu2 %v3645_v6  ;;  %1093 = vmatpush.msrb.mxu3 %v3646_v9 }
 0x1b0   :  { %1034 = vmatpush.msrb.mxu0 %v3647_v10  ;;  %1054 = vmatpush.msrb.mxu1 %v3648_v13 }
 0x1b1   :  { %1074 = vmatpush.msrb.mxu2 %v3649_v16  ;;  %1094 = vmatpush.msrb.mxu3 %v3650_v17 }
 0x1b2   :  { %1035 = vmatpush.msrb.mxu0 %v3651_v23  ;;  %1055 = vmatpush.msrb.mxu1 %v3652_v26 }
 0x1b3   :  { %1075 = vmatpush.msrb.mxu2 %v3653_v31  ;;  %1095 = vmatpush.msrb.mxu3 %v3654_v32 }
 0x1b4   :  { %1036 = vmatpush.msrb.mxu0 %v3655_v33  ;;  %1056 = vmatpush.msrb.mxu1 %v3656_v35 }
 0x1b5   :  { %1076 = vmatpush.msrb.mxu2 %v3657_v36  ;;  %1096 = vmatpush.msrb.mxu3 %v3658_v37 }
 0x1b6   :  { %1037 = vmatpush.msrb.mxu0 %v3659_v39  ;;  %1057 = vmatpush.msrb.mxu1 %v3660_v48 }
 0x1b7   :  { %1077 = vmatpush.msrb.mxu2 %v3661_v50  ;;  %1097 = vmatpush.msrb.mxu3 %v3662_v52 }
 0x213   :  { %v729_v28 = vpop.f32.mrf.mxu0  ;;  %v749_v43 = vpop.f32.mrf.mxu1 }
 0x214   :  { %v792_v24 = vadd.f32 %v729_v28, %v309_v27  ;;  %v793_v53 = vadd.f32 %v749_v43, %v3666_v42 }
 0x216   :  { %v1925_v56 = vmul.f32 -1.442695, %v792_v24  ;;  %v1926_v7 = vmul.f32 -1.442695, %v793_v53 }
 0x218   :  { %2004 = vpow2.f32 %v1925_v56 }
 0x219   :  { %2006 = vpow2.f32 %v1926_v7 }
 0x21a   :  { %v789_v58 = vpop.f32.mrf.mxu3  ;;  %v769_v12 = vpop.f32.mrf.mxu2 }
 0x21b   :  { %v795_v22 = vadd.f32 %v789_v58, %v3667_v49  ;;  %v794_v18 = vadd.f32 %v769_v12, %v391_v47 }
 0x21d   :  { %v1927_v15 = vmul.f32 -1.442695, %v795_v22 }
 0x21e   :  { %v2005_v14 = vpop.eup %2004 }
 0x21f   :  { %v2007_v34 = vpop.eup %2006  ;;  %v799_v40 = vadd.f32 1.0, %v2005_v14  ;;  %2008 = vpow2.f32 %v1927_v15 }
 0x220   :  { %v818_v2 = vadd.f32 1.0, %v2007_v34 }
 0x221   :  { %2010 = vrcp.f32 %v799_v40  ;;  %v811_v23 = vand.u32 2147483648, %v799_v40  ;;  %v809_v20 = vand.u32 2147483647, %v799_v40  ;;  %vm805_vm15 = vweird.f32 %v799_v40 }
 0x222   :  { %2012 = vrcp.f32 %v818_v2  ;;  %v830_v33 = vand.u32 2147483648, %v818_v2  ;;  %v828_v28 = vand.u32 2147483647, %v818_v2  ;;  %vm824_vm0 = vweird.f32 %v818_v2 }
 0x223   :  { %v812_v42 = vor.u32 1.1754944e-38, %v811_v23  ;;  %vm810_vm3 = vcmp.eq.f32.partialorder %v809_v20, 8.507059e+37  ;;  %v2974_v23 = vld [vmem:[#allocation5 + $0x1c0] sm:$0xff] }
 0x224   :  { %v831_v7 = vor.u32 1.1754944e-38, %v830_v33  ;;  %vm829_vm4 = vcmp.eq.f32.partialorder %v828_v28, 8.507059e+37  ;;  %v2977_v33 = vld [vmem:[#allocation5 + $0x1c8] sm:$0xff]  ;;  %v2984_v20 = vld [vmem:[#allocation5 + $0x1a0] sm:$0xff] }
 0x225   :  { %v2009_v4 = vpop.eup %2008  ;;  %v2994_v28 = vld [vmem:[#allocation5 + $0x180] sm:$0xff] }
 0x226   :  { %v838_v0 = vadd.f32 1.0, %v2009_v4 }
 0x227   :  { %v2011_v63 = vpop.eup %2010 }
 0x228   :  { %v2013_v54 = vpop.eup %2012  ;;  %v801_v55 = vmul.f32 %v2011_v63, %v799_v40  ;;  %2014 = vrcp.f32 %v838_v0  ;;  %vm806_vm13 = vweird.f32 %v2011_v63  ;;  %v850_v47 = vand.u32 2147483648, %v838_v0 }
 0x229   :  { %v820_v62 = vmul.f32 %v2013_v54, %v818_v2  ;;  %2016 = vtanh.f32 %v794_v18  ;;  %vm825_vm14 = vweird.f32 %v2013_v54  ;;  %vm807_vm1 = vmor %vm805_vm15, %vm806_vm13  ;;  %vm844_vm6 = vweird.f32 %v838_v0 }
 0x22a   :  { %v802_v1 = vsub.f32 1.0, %v801_v55  ;;  %vm826_vm2 = vmor %vm824_vm0, %vm825_vm14  ;;  %v851_v55 = vor.u32 1.1754944e-38, %v850_v47 }
 0x22b   :  { %v821_v10 = vsub.f32 1.0, %v820_v62 }
 0x22c   :  { %v803_v39 = vmul.f32 %v2011_v63, %v802_v1 }
 0x22d   :  { %v822_v27 = vmul.f32 %v2013_v54, %v821_v10  ;;  %v2971_v10 = vld [vmem:[#allocation5 + $0x1f8] sm:$0xff] }
 0x22e   :  { %v2015_v43 = vpop.eup %2014  ;;  %v804_v24 = vadd.f32 %v2011_v63, %v803_v39  ;;  %v2981_v39 = vld [vmem:[#allocation5 + $0x1d8] sm:$0xff] }
 0x22f   :  { %v823_v53 = vadd.f32 %v2013_v54, %v822_v27  ;;  %v840_v56 = vmul.f32 %v2015_v43, %v838_v0  ;;  %v2017_v49 = vpop.eup %2016  ;;  %vm845_vm5 = vweird.f32 %v2015_v43  ;;  %v2991_v27 = vld [vmem:[#allocation5 + $0x1b8] sm:$0xff] }
 0x230   :  { %v808_v58 = vsel %vm807_vm1, %v2011_v63, %v804_v24  ;;  %v848_v63 = vand.u32 2147483647, %v838_v0  ;;  %vm846_vm7 = vmor %vm844_vm6, %vm845_vm5  ;;  %v2967_v0 = vld [vmem:[#allocation5 + $0x1e8] sm:$0xff]  ;;  %v3004_v24 = vld [vmem:[#allocation5 + $0x160] sm:$0xff] }
 0x231   :  { %v813_v22 = vsel %vm810_vm3, %v812_v42, %v808_v58  ;;  %v827_v15 = vsel %vm826_vm2, %v2013_v54, %v823_v53  ;;  %v841_v14 = vsub.f32 1.0, %v840_v56  ;;  %v3011_v42 = vld [vmem:[#allocation5 + $0x178] sm:$0xff]  ;;  %v3014_v53 = vld [vmem:[#allocation5 + $0x140] sm:$0xff] }
 0x232   :  { %v832_v34 = vsel %vm829_vm4, %v831_v7, %v827_v15  ;;  %v855_v12 = vmul.f32 %v2017_v49, %v813_v22  ;;  %vm849_vm8 = vcmp.eq.f32.partialorder %v848_v63, 8.507059e+37  ;;  %v3021_v56 = vld [vmem:[#allocation5 + $0x158] sm:$0xff]  ;;  %v3024_v7 = vld [vmem:[#allocation5 + $0x120] sm:$0xff] }
 0x233   :  { %v854_v4 = vmul.f32 %v832_v34, %v2873_v30  ;;  %v842_v11 = vmul.f32 %v2015_v43, %v841_v14  ;;  %v2964_v30 = vld [vmem:[#allocation5 + $0x1e0] sm:$0xff]  ;;  %v3031_v58 = vld [vmem:[#allocation5 + $0x138] sm:$0xff] }
 0x234   :  { %v3034_v49 = vld [vmem:[#allocation5 + $0x100] sm:$0xff]  ;;  %v3041_v22 = vld [vmem:[#allocation5 + $0x118] sm:$0xff] }
 0x235   :  { %v2955_v40 = vadd.f32 %v855_v12, %v854_v4  ;;  %v843_v2 = vadd.f32 %v2015_v43, %v842_v11  ;;  %v3044_v15 = vld [vmem:[#allocation5 + $0xe0] sm:$0xff]  ;;  %v3051_v14 = vld [vmem:[#allocation5 + $0xf8] sm:$0xff] }
 0x236   :  { %v3054_v34 = vld [vmem:[#allocation5 + $0xc0] sm:$0xff]  ;;  %v3061_v12 = vld [vmem:[#allocation5 + $0xd8] sm:$0xff] }
 0x237   :  { %2018 = vtanh.f32 %v2955_v40  ;;  %v847_v18 = vsel %vm846_vm7, %v2015_v43, %v843_v2  ;;  %v3001_v43 = vld [vmem:[#allocation5 + $0x198] sm:$0xff]  ;;  %3671 = vst [vmem:[#allocation12_spill] sm:$0xff] %v3061_v12  ;;  %v3064_v4 = vld [vmem:[#allocation5 + $0xa0] sm:$0xff] }
 0x238   :  { %v852_v62 = vsel %vm849_vm8, %v851_v55, %v847_v18  ;;  %3672 = vst [vmem:[#allocation13_spill] sm:$0xff] %v3064_v4  ;;  %v3072_v11 = vld [vmem:[#allocation5 + $0x80] sm:$0xff]  ;;  %v3682_v55 = vld [vmem:[#allocation43_spill] sm:$0xff] }
 0x239   :  { %3674 = vst [vmem:[#allocation26_spill] sm:$0xff] %v3072_v11 }
 0x23d   :  { %v2019_v54 = vpop.eup %2018 }
 0x23e   :  { %v2958_v1 = vmul.f32 %v2019_v54, %v852_v62  ;;  %v394_v54 = vadd.f32 %v3682_v55, %v3668_v3 }
 0x240   :  { %3670 = vst [vmem:[#allocation11_spill] sm:$0xff] %v2958_v1  ;;  %883 = vmatmul.f32.vlgmr.msra.gmra.mxu0 %v2958_v1  ;;  %903 = vmatmul.f32.vlgmr.msra.gmra.mxu1 %v2958_v1 }
 0x241   :  { %923 = vmatmul.f32.vlgmr.msra.gmra.mxu2 %v2958_v1  ;;  %943 = vmatmul.f32.vlgmr.msra.gmra.mxu3 %v2958_v1 }
 0x242   :  { %1177 = vmatpush.msra.mxu0 %v2964_v30  ;;  %1197 = vmatpush.msra.mxu1 %v2967_v0 }
 0x243   :  { %1217 = vmatpush.msra.mxu2 %v2541_v19  ;;  %1237 = vmatpush.msra.mxu3 %v2971_v10  ;;  %v2987_v19 = vld [vmem:[#allocation5 + $0x1a8] sm:$0xff] }
 0x244   :  { %1178 = vmatpush.msra.mxu0 %v2974_v23  ;;  %1198 = vmatpush.msra.mxu1 %v2977_v33 }
 0x245   :  { %1218 = vmatpush.msra.mxu2 %v2548_v44  ;;  %1238 = vmatpush.msra.mxu3 %v2981_v39  ;;  %v2997_v44 = vld [vmem:[#allocation5 + $0x188] sm:$0xff] }
 0x246   :  { %1179 = vmatpush.msra.mxu0 %v2984_v20  ;;  %1199 = vmatpush.msra.mxu1 %v2987_v19 }
 0x247   :  { %1219 = vmatpush.msra.mxu2 %v2558_v29  ;;  %1239 = vmatpush.msra.mxu3 %v2991_v27  ;;  %v3007_v29 = vld [vmem:[#allocation5 + $0x168] sm:$0xff] }
 0x248   :  { %1180 = vmatpush.msra.mxu0 %v2994_v28  ;;  %1200 = vmatpush.msra.mxu1 %v2997_v44 }
 0x249   :  { %1220 = vmatpush.msra.mxu2 %v2566_v38  ;;  %1240 = vmatpush.msra.mxu3 %v3001_v43  ;;  %v3017_v38 = vld [vmem:[#allocation5 + $0x148] sm:$0xff] }
 0x24a   :  { %1181 = vmatpush.msra.mxu0 %v3004_v24  ;;  %1201 = vmatpush.msra.mxu1 %v3007_v29 }
 0x24b   :  { %1221 = vmatpush.msra.mxu2 %v2574_v41  ;;  %1241 = vmatpush.msra.mxu3 %v3011_v42  ;;  %v3027_v41 = vld [vmem:[#allocation5 + $0x128] sm:$0xff] }
 0x24c   :  { %1182 = vmatpush.msra.mxu0 %v3014_v53  ;;  %1202 = vmatpush.msra.mxu1 %v3017_v38 }
 0x24d   :  { %1222 = vmatpush.msra.mxu2 %v2584_v51  ;;  %1242 = vmatpush.msra.mxu3 %v3021_v56  ;;  %v3037_v51 = vld [vmem:[#allocation5 + $0x108] sm:$0xff] }
 0x24e   :  { %1183 = vmatpush.msra.mxu0 %v3024_v7  ;;  %1203 = vmatpush.msra.mxu1 %v3027_v41 }
 0x24f   :  { %1223 = vmatpush.msra.mxu2 %v2595_v57  ;;  %1243 = vmatpush.msra.mxu3 %v3031_v58  ;;  %v3047_v57 = vld [vmem:[#allocation5 + $0xe8] sm:$0xff] }
 0x250   :  { %1184 = vmatpush.msra.mxu0 %v3034_v49  ;;  %1204 = vmatpush.msra.mxu1 %v3037_v51 }
 0x251   :  { %1224 = vmatpush.msra.mxu2 %v2602_v61  ;;  %1244 = vmatpush.msra.mxu3 %v3041_v22  ;;  %v3057_v61 = vld [vmem:[#allocation5 + $0xc8] sm:$0xff] }
 0x252   :  { %1185 = vmatpush.msra.mxu0 %v3044_v15  ;;  %1205 = vmatpush.msra.mxu1 %v3047_v57 }
 0x253   :  { %1225 = vmatpush.msra.mxu2 %v2612_v8  ;;  %1245 = vmatpush.msra.mxu3 %v3051_v14  ;;  %v3067_v8 = vld [vmem:[#allocation5 + $0xa8] sm:$0xff] }
 0x254   :  { %1186 = vmatpush.msra.mxu0 %v3054_v34  ;;  %1206 = vmatpush.msra.mxu1 %v3057_v61  ;;  %3673 = vst [vmem:[#allocation18_spill] sm:$0xff] %v3067_v8 }
 0x255   :  { %1226 = vmatpush.msra.mxu2 %v2622_v21  ;;  %1246 = vmatpush.msra.mxu3 %v3061_v12  ;;  %v3078_v21 = vld [vmem:[#allocation5 + $0x60] sm:$0xff] }
 0x256   :  { %1187 = vmatpush.msra.mxu0 %v3064_v4  ;;  %1207 = vmatpush.msra.mxu1 %v3067_v8  ;;  %3675 = vst [vmem:[#allocation20_spill] sm:$0xff] %v3078_v21 }
 0x257   :  { %1227 = vmatpush.msra.mxu2 %v2628_v25  ;;  %1247 = vmatpush.msra.mxu3 %v2580_v46  ;;  %v3084_v46 = vld [vmem:[#allocation5 + $0x40] sm:$0xff] }
 0x258   :  { %1188 = vmatpush.msra.mxu0 %v3072_v11  ;;  %1208 = vmatpush.msra.mxu1 %v3644_v5  ;;  %3676 = vst [vmem:[#allocation14_spill] sm:$0xff] %v3084_v46  ;;  %v3090_v25 = vld [vmem:[#allocation5 + $0x20] sm:$0xff] }
 0x259   :  { %1228 = vmatpush.msra.mxu2 %v3645_v6  ;;  %1248 = vmatpush.msra.mxu3 %v3646_v9  ;;  %3677 = vst [vmem:[#allocation19_spill] sm:$0xff] %v3090_v25  ;;  %v3096_v5 = vld [vmem:[#allocation5] sm:$0xff] }
 0x25a   :  { %1189 = vmatpush.msra.mxu0 %v3078_v21  ;;  %1209 = vmatpush.msra.mxu1 %v3648_v13  ;;  %3678 = vst [vmem:[#allocation29_spill] sm:$0xff] %v3096_v5  ;;  %v3679_v13 = vld [vmem:[#allocation41_spill] sm:$0xff] }
 0x25b   :  { %1229 = vmatpush.msra.mxu2 %v3649_v16  ;;  %1249 = vmatpush.msra.mxu3 %v3650_v17  ;;  %v3680_v17 = vld [vmem:[#allocation42_spill] sm:$0xff] }
 0x25c   :  { %1190 = vmatpush.msra.mxu0 %v3084_v46  ;;  %1210 = vmatpush.msra.mxu1 %v3652_v26 }
 0x25d   :  { %1230 = vmatpush.msra.mxu2 %v3653_v31  ;;  %1250 = vmatpush.msra.mxu3 %v3654_v32 }
 0x25e   :  { %1191 = vmatpush.msra.mxu0 %v3090_v25  ;;  %1211 = vmatpush.msra.mxu1 %v3656_v35 }
 0x25f   :  { %1231 = vmatpush.msra.mxu2 %v3657_v36  ;;  %1251 = vmatpush.msra.mxu3 %v3658_v37  ;;  %v3681_v36 = vld [vmem:[#allocation47_spill] sm:$0xff] }
 0x260   :  { %1192 = vmatpush.msra.mxu0 %v3096_v5  ;;  %1212 = vmatpush.msra.mxu1 %v3660_v48 }
 0x261   :  { %1232 = vmatpush.msra.mxu2 %v3661_v50  ;;  %1252 = vmatpush.msra.mxu3 %v3662_v52 }
 0x2bd   :  { %v884_v6 = vpop.f32.mrf.mxu0  ;;  %v904_v9 = vpop.f32.mrf.mxu1 }
 0x2be   :  { %v947_v16 = vadd.f32 %v884_v6, %v3679_v13  ;;  %v948_v26 = vadd.f32 %v904_v9, %v3680_v17 }
 0x2c0   :  { %v1928_v31 = vmul.f32 -1.442695, %v947_v16  ;;  %v1929_v32 = vmul.f32 -1.442695, %v948_v26 }
 0x2c2   :  { %2020 = vpow2.f32 %v1928_v31 }
 0x2c3   :  { %2022 = vpow2.f32 %v1929_v32 }
 0x2c4   :  { %v944_v35 = vpop.f32.mrf.mxu3  ;;  %v924_v52 = vpop.f32.mrf.mxu2 }
 0x2c5   :  { %v950_v37 = vadd.f32 %v944_v35, %v3681_v36  ;;  %v949_v9 = vadd.f32 %v924_v52, %v394_v54 }
 0x2c7   :  { %v1930_v2 = vmul.f32 -1.442695, %v950_v37 }
 0x2c8   :  { %v2021_v47 = vpop.eup %2020 }
 0x2c9   :  { %v2023_v48 = vpop.eup %2022  ;;  %v954_v63 = vadd.f32 1.0, %v2021_v47  ;;  %2024 = vpow2.f32 %v1930_v2 }
 0x2ca   :  { %v973_v50 = vadd.f32 1.0, %v2023_v48 }
 0x2cb   :  { %2026 = vrcp.f32 %v954_v63  ;;  %v966_v32 = vand.u32 2147483648, %v954_v63  ;;  %v964_v37 = vand.u32 2147483647, %v954_v63  ;;  %vm960_vm11 = vweird.f32 %v954_v63 }
 0x2cc   :  { %2028 = vrcp.f32 %v973_v50  ;;  %v985_v35 = vand.u32 2147483648, %v973_v50  ;;  %v983_v47 = vand.u32 2147483647, %v973_v50  ;;  %vm979_vm12 = vweird.f32 %v973_v50 }
 0x2cd   :  { %v967_v52 = vor.u32 1.1754944e-38, %v966_v32  ;;  %vm965_vm15 = vcmp.eq.f32.partialorder %v964_v37, 8.507059e+37 }
 0x2ce   :  { %vm984_vm0 = vcmp.eq.f32.partialorder %v983_v47, 8.507059e+37 }
 0x2cf   :  { %v2025_v18 = vpop.eup %2024 }
 0x2d0   :  { %v993_v62 = vadd.f32 1.0, %v2025_v18 }
 0x2d1   :  { %v2027_v6 = vpop.eup %2026 }
 0x2d2   :  { %v2029_v13 = vpop.eup %2028  ;;  %v956_v16 = vmul.f32 %v2027_v6, %v954_v63  ;;  %2030 = vrcp.f32 %v993_v62  ;;  %vm961_vm9 = vweird.f32 %v2027_v6  ;;  %v1005_v32 = vand.u32 2147483648, %v993_v62 }
 0x2d3   :  { %v975_v17 = vmul.f32 %v2029_v13, %v973_v50  ;;  %2032 = vtanh.f32 %v949_v9  ;;  %vm980_vm10 = vweird.f32 %v2029_v13  ;;  %vm962_vm13 = vmor %vm960_vm11, %vm961_vm9  ;;  %vm999_vm2 = vweird.f32 %v993_v62 }
 0x2d4   :  { %v957_v26 = vsub.f32 1.0, %v956_v16  ;;  %vm981_vm14 = vmor %vm979_vm12, %vm980_vm10  ;;  %v986_v16 = vor.u32 1.1754944e-38, %v985_v35  ;;  %v1006_v37 = vor.u32 1.1754944e-38, %v1005_v32  ;;  %v3206_v32 = vld [vmem:[#allocation5 + $0x48] sm:$0xff] }
 0x2d5   :  { %v976_v31 = vsub.f32 1.0, %v975_v17  ;;  %3693 = vst [vmem:[#allocation24_spill] sm:$0xff] %v3206_v32 }
 0x2d6   :  { %v958_v36 = vmul.f32 %v2027_v6, %v957_v26 }
 0x2d7   :  { %v977_v2 = vmul.f32 %v2029_v13, %v976_v31 }
 0x2d8   :  { %v2031_v48 = vpop.eup %2030  ;;  %v959_v55 = vadd.f32 %v2027_v6, %v958_v36 }
 0x2d9   :  { %v978_v18 = vadd.f32 %v2029_v13, %v977_v2  ;;  %v995_v54 = vmul.f32 %v2031_v48, %v993_v62  ;;  %v2033_v9 = vpop.eup %2032  ;;  %vm1000_vm1 = vweird.f32 %v2031_v48 }
 0x2da   :  { %v963_v17 = vsel %vm962_vm13, %v2027_v6, %v959_v55  ;;  %v1003_v6 = vand.u32 2147483647, %v993_v62  ;;  %vm1001_vm3 = vmor %vm999_vm2, %vm1000_vm1  ;;  %v3149_v62 = vld [vmem:[#allocation5 + $0x150] sm:$0xff] }
 0x2db   :  { %v968_v1 = vsel %vm965_vm15, %v967_v52, %v963_v17  ;;  %v982_v26 = vsel %vm981_vm14, %v2029_v13, %v978_v18  ;;  %v996_v45 = vsub.f32 1.0, %v995_v54  ;;  %v3161_v55 = vld [vmem:[#allocation5 + $0x110] sm:$0xff]  ;;  %v3186_v17 = vld [vmem:[#allocation5 + $0x88] sm:$0xff] }
 0x2dc   :  { %v987_v31 = vsel %vm984_vm0, %v986_v16, %v982_v26  ;;  %v1010_v3 = vmul.f32 %v2033_v9, %v968_v1  ;;  %vm1004_vm4 = vcmp.eq.f32.partialorder %v1003_v6, 8.507059e+37  ;;  %v3143_v1 = vld [vmem:[#allocation5 + $0x170] sm:$0xff]  ;;  %v3182_v16 = vld [vmem:[#allocation5 + $0xb8] sm:$0xff]  ;;  %3687 = vst [vmem:[#allocation25_spill] sm:$0xff] %v3186_v17 }
 0x2dd   :  { %v1009_v59 = vmul.f32 %v987_v31, %v2955_v40  ;;  %v997_v36 = vmul.f32 %v2031_v48, %v996_v45  ;;  %v3119_v45 = vld [vmem:[#allocation5 + $0x1f0] sm:$0xff]  ;;  %3686 = vst [vmem:[#allocation30_spill] sm:$0xff] %v3182_v16  ;;  %v3192_v26 = vld [vmem:[#allocation5 + $0x98] sm:$0xff]  ;;  %v3196_v31 = vld [vmem:[#allocation5 + $0x68] sm:$0xff] }
 0x2de   :  { %v3137_v40 = vld [vmem:[#allocation5 + $0x190] sm:$0xff]  ;;  %3689 = vst [vmem:[#allocation23_spill] sm:$0xff] %v3192_v26 }
 0x2df   :  { %v3108_v63 = vadd.f32 %v1010_v3, %v1009_v59  ;;  %v998_v50 = vadd.f32 %v2031_v48, %v997_v36  ;;  %v3125_v59 = vld [vmem:[#allocation5 + $0x1d0] sm:$0xff]  ;;  %3690 = vst [vmem:[#allocation31_spill] sm:$0xff] %v3196_v31 }
 0x2e0   :  { %v3131_v3 = vld [vmem:[#allocation5 + $0x1b0] sm:$0xff] }
 0x2e1   :  { %2034 = vtanh.f32 %v3108_v63  ;;  %v1002_v35 = vsel %vm1001_vm3, %v2031_v48, %v998_v50  ;;  %v3155_v48 = vld [vmem:[#allocation5 + $0x130] sm:$0xff]  ;;  %v3202_v50 = vld [vmem:[#allocation5 + $0x78] sm:$0xff] }
 0x2e2   :  { %v1007_v2 = vsel %vm1004_vm4, %v1006_v37, %v1002_v35  ;;  %v3167_v52 = vld [vmem:[#allocation5 + $0xf0] sm:$0xff]  ;;  %3692 = vst [vmem:[#allocation17_spill] sm:$0xff] %v3202_v50  ;;  %v3212_v35 = vld [vmem:[#allocation5 + $0x58] sm:$0xff]  ;;  %v3216_v37 = vld [vmem:[#allocation5 + $0x28] sm:$0xff] }
 0x2e3   :  { %v3173_v18 = vld [vmem:[#allocation5 + $0xd0] sm:$0xff]  ;;  %3695 = vst [vmem:[#allocation28_spill] sm:$0xff] %v3212_v35 }
 0x2e4   :  { %3684 = vst [vmem:[#allocation15_spill] sm:$0xff] %v3173_v18  ;;  %v3179_v54 = vld [vmem:[#allocation5 + $0xb0] sm:$0xff] }
 0x2e5   :  { %3685 = vst [vmem:[#allocation21_spill] sm:$0xff] %v3179_v54  ;;  %v3189_v9 = vld [vmem:[#allocation5 + $0x90] sm:$0xff] }
 0x2e6   :  { %3688 = vst [vmem:[#allocation16_spill] sm:$0xff] %v3189_v9  ;;  %v3199_v36 = vld [vmem:[#allocation5 + $0x70] sm:$0xff] }
 0x2e7   :  { %v2035_v13 = vpop.eup %2034  ;;  %3691 = vst [vmem:[#allocation27_spill] sm:$0xff] %v3199_v36  ;;  %v3209_v6 = vld [vmem:[#allocation5 + $0x50] sm:$0xff] }
 0x2e8   :  { %v3111_v47 = vmul.f32 %v2035_v13, %v1007_v2  ;;  %3694 = vst [vmem:[#allocation32_spill] sm:$0xff] %v3209_v6  ;;  %v3219_v13 = vld [vmem:[#allocation5 + $0x30] sm:$0xff]  ;;  %v3222_v2 = vld [vmem:[#allocation5 + $0x38] sm:$0xff] }
 0x2e9   :  { %3696 = vst [vmem:[#allocation33_spill] sm:$0xff] %v3216_v37 }
 0x2ea   :  { %3683 = vst [vmem:[#allocation22_spill] sm:$0xff] %v3111_v47  ;;  %1038 = vmatmul.f32.vlgmr.msrb.gmra.mxu0 %v3111_v47  ;;  %1058 = vmatmul.f32.vlgmr.msrb.gmra.mxu1 %v3111_v47 }
 0x2eb   :  { %1078 = vmatmul.f32.vlgmr.msrb.gmra.mxu2 %v3111_v47  ;;  %1098 = vmatmul.f32.vlgmr.msrb.gmra.mxu3 %v3111_v47  ;;  %3697 = vst [vmem:[#allocation38_spill] sm:$0xff] %v3219_v13  ;;  %v3226_v47 = vld [vmem:[#allocation5 + $0x8] sm:$0xff] }
 0x2ec   :  { %1332 = vmatpush.msrb.mxu0 %v2964_v30  ;;  %1352 = vmatpush.msrb.mxu1 %v2967_v0  ;;  %3698 = vst [vmem:[#allocation39_spill] sm:$0xff] %v3222_v2 }
 0x2ed   :  { %1372 = vmatpush.msrb.mxu2 %v3119_v45  ;;  %1392 = vmatpush.msrb.mxu3 %v2971_v10  ;;  %3699 = vst [vmem:[#allocation44_spill] sm:$0xff] %v3226_v47 }
 0x2ee   :  { %1333 = vmatpush.msrb.mxu0 %v2974_v23  ;;  %1353 = vmatpush.msrb.mxu1 %v2977_v33 }
 0x2ef   :  { %1373 = vmatpush.msrb.mxu2 %v3125_v59  ;;  %1393 = vmatpush.msrb.mxu3 %v2981_v39 }
 0x2f0   :  { %1334 = vmatpush.msrb.mxu0 %v2984_v20  ;;  %1354 = vmatpush.msrb.mxu1 %v2987_v19 }
 0x2f1   :  { %1374 = vmatpush.msrb.mxu2 %v3131_v3  ;;  %1394 = vmatpush.msrb.mxu3 %v2991_v27 }
 0x2f2   :  { %1335 = vmatpush.msrb.mxu0 %v2994_v28  ;;  %1355 = vmatpush.msrb.mxu1 %v2997_v44 }
 0x2f3   :  { %1375 = vmatpush.msrb.mxu2 %v3137_v40  ;;  %1395 = vmatpush.msrb.mxu3 %v3001_v43 }
 0x2f4   :  { %1336 = vmatpush.msrb.mxu0 %v3004_v24  ;;  %1356 = vmatpush.msrb.mxu1 %v3007_v29 }
 0x2f5   :  { %1376 = vmatpush.msrb.mxu2 %v3143_v1  ;;  %1396 = vmatpush.msrb.mxu3 %v3011_v42 }
 0x2f6   :  { %1337 = vmatpush.msrb.mxu0 %v3014_v53  ;;  %1357 = vmatpush.msrb.mxu1 %v3017_v38 }
 0x2f7   :  { %1377 = vmatpush.msrb.mxu2 %v3149_v62  ;;  %1397 = vmatpush.msrb.mxu3 %v3021_v56 }
 0x2f8   :  { %1338 = vmatpush.msrb.mxu0 %v3024_v7  ;;  %1358 = vmatpush.msrb.mxu1 %v3027_v41 }
 0x2f9   :  { %1378 = vmatpush.msrb.mxu2 %v3155_v48  ;;  %1398 = vmatpush.msrb.mxu3 %v3031_v58 }
 0x2fa   :  { %1339 = vmatpush.msrb.mxu0 %v3034_v49  ;;  %1359 = vmatpush.msrb.mxu1 %v3037_v51 }
 0x2fb   :  { %1379 = vmatpush.msrb.mxu2 %v3161_v55  ;;  %1399 = vmatpush.msrb.mxu3 %v3041_v22 }
 0x2fc   :  { %1340 = vmatpush.msrb.mxu0 %v3044_v15  ;;  %1360 = vmatpush.msrb.mxu1 %v3047_v57 }
 0x2fd   :  { %1380 = vmatpush.msrb.mxu2 %v3167_v52  ;;  %1400 = vmatpush.msrb.mxu3 %v3051_v14 }
 0x2fe   :  { %1341 = vmatpush.msrb.mxu0 %v3054_v34  ;;  %1361 = vmatpush.msrb.mxu1 %v3057_v61 }
 0x2ff   :  { %1381 = vmatpush.msrb.mxu2 %v3173_v18  ;;  %1401 = vmatpush.msrb.mxu3 %v3061_v12 }
 0x300   :  { %1342 = vmatpush.msrb.mxu0 %v3064_v4  ;;  %1362 = vmatpush.msrb.mxu1 %v3067_v8 }
 0x301   :  { %1382 = vmatpush.msrb.mxu2 %v3179_v54  ;;  %1402 = vmatpush.msrb.mxu3 %v3182_v16 }
 0x302   :  { %1343 = vmatpush.msrb.mxu0 %v3072_v11  ;;  %1363 = vmatpush.msrb.mxu1 %v3186_v17 }
 0x303   :  { %1383 = vmatpush.msrb.mxu2 %v3189_v9  ;;  %1403 = vmatpush.msrb.mxu3 %v3192_v26 }
 0x304   :  { %1344 = vmatpush.msrb.mxu0 %v3078_v21  ;;  %1364 = vmatpush.msrb.mxu1 %v3196_v31  ;;  %v3704_v31 = vld [vmem:[#allocation50_spill] sm:$0xff] }
 0x305   :  { %1384 = vmatpush.msrb.mxu2 %v3199_v36  ;;  %1404 = vmatpush.msrb.mxu3 %v3202_v50 }
 0x306   :  { %1345 = vmatpush.msrb.mxu0 %v3084_v46  ;;  %1365 = vmatpush.msrb.mxu1 %v3206_v32  ;;  %v3703_v46 = vld [vmem:[#allocation45_spill] sm:$0xff] }
 0x307   :  { %1385 = vmatpush.msrb.mxu2 %v3209_v6  ;;  %1405 = vmatpush.msrb.mxu3 %v3212_v35  ;;  %v3229_v35 = vld [vmem:[#allocation5 + $0x10] sm:$0xff] }
 0x308   :  { %1346 = vmatpush.msrb.mxu0 %v3090_v25  ;;  %1366 = vmatpush.msrb.mxu1 %v3216_v37  ;;  %3700 = vst [vmem:[#allocation40_spill] sm:$0xff] %v3229_v35  ;;  %v3232_v25 = vld [vmem:[#allocation5 + $0x18] sm:$0xff] }
 0x309   :  { %1386 = vmatpush.msrb.mxu2 %v3219_v13  ;;  %1406 = vmatpush.msrb.mxu3 %v3222_v2  ;;  %3701 = vst [vmem:[#allocation41_spill] sm:$0xff] %v3232_v25  ;;  %v3702_v13 = vld [vmem:[#allocation10_spill] sm:$0xff] }
 0x30a   :  { %1347 = vmatpush.msrb.mxu0 %v3096_v5  ;;  %1367 = vmatpush.msrb.mxu1 %v3226_v47  ;;  %v315_v37 = vadd.f32 %v3702_v13, %v3664_v60 }
 0x30b   :  { %1387 = vmatpush.msrb.mxu2 %v3229_v35  ;;  %1407 = vmatpush.msrb.mxu3 %v3232_v25 }
 0x367   :  { %v1039_v6 = vpop.f32.mrf.mxu0  ;;  %v1059_v32 = vpop.f32.mrf.mxu1 }
 0x368   :  { %v1102_v2 = vadd.f32 %v1039_v6, %v315_v37  ;;  %v1103_v5 = vadd.f32 %v1059_v32, %v3703_v46  ;;  %v3705_v6 = vld [vmem:[#allocation61_spill] sm:$0xff]  ;;  %v3706_v37 = vld [vmem:[#allocation46_spill] sm:$0xff] }
 0x369   :  { %v397_v46 = vadd.f32 %v3706_v37, %v3705_v6 }
 0x36a   :  { %v1931_v50 = vmul.f32 -1.442695, %v1102_v2  ;;  %v1932_v36 = vmul.f32 -1.442695, %v1103_v5 }
 0x36c   :  { %2036 = vpow2.f32 %v1931_v50 }
 0x36d   :  { %2038 = vpow2.f32 %v1932_v36 }
 0x36e   :  { %v1099_v47 = vpop.f32.mrf.mxu3  ;;  %v1079_v60 = vpop.f32.mrf.mxu2 }
 0x36f   :  { %v1105_v21 = vadd.f32 %v1099_v47, %v3704_v31  ;;  %v1104_v50 = vadd.f32 %v1079_v60, %v397_v46 }
 0x371   :  { %v1933_v35 = vmul.f32 -1.442695, %v1105_v21 }
 0x372   :  { %v2037_v26 = vpop.eup %2036 }
 0x373   :  { %v2039_v9 = vpop.eup %2038  ;;  %v1109_v17 = vadd.f32 1.0, %v2037_v26  ;;  %2040 = vpow2.f32 %v1933_v35 }
 0x374   :  { %v1128_v25 = vadd.f32 1.0, %v2039_v9 }
 0x375   :  { %2042 = vrcp.f32 %v1109_v17  ;;  %v1121_v11 = vand.u32 2147483648, %v1109_v17  ;;  %v1119_v35 = vand.u32 2147483647, %v1109_v17  ;;  %vm1115_vm7 = vweird.f32 %v1109_v17 }
 0x376   :  { %2044 = vrcp.f32 %v1128_v25  ;;  %v1140_v26 = vand.u32 2147483648, %v1128_v25  ;;  %v1138_v54 = vand.u32 2147483647, %v1128_v25  ;;  %vm1134_vm8 = vweird.f32 %v1128_v25 }
 0x377   :  { %v1122_v60 = vor.u32 1.1754944e-38, %v1121_v11  ;;  %vm1120_vm11 = vcmp.eq.f32.partialorder %v1119_v35, 8.507059e+37 }
 0x378   :  { %vm1139_vm12 = vcmp.eq.f32.partialorder %v1138_v54, 8.507059e+37 }
 0x379   :  { %v2041_v13 = vpop.eup %2040 }
 0x37a   :  { %v1148_v32 = vadd.f32 1.0, %v2041_v13 }
 0x37b   :  { %v2043_v5 = vpop.eup %2042 }
 0x37c   :  { %v2045_v36 = vpop.eup %2044  ;;  %v1111_v2 = vmul.f32 %v2043_v5, %v1109_v17  ;;  %2046 = vrcp.f32 %v1148_v32  ;;  %vm1116_vm5 = vweird.f32 %v2043_v5  ;;  %vm1154_vm14 = vweird.f32 %v1148_v32 }
 0x37d   :  { %v1130_v47 = vmul.f32 %v2045_v36, %v1128_v25  ;;  %2048 = vtanh.f32 %v1104_v50  ;;  %vm1135_vm6 = vweird.f32 %v2045_v36  ;;  %vm1117_vm9 = vmor %vm1115_vm7, %vm1116_vm5  ;;  %v1160_v25 = vand.u32 2147483648, %v1148_v32 }
 0x37e   :  { %v1112_v21 = vsub.f32 1.0, %v1111_v2  ;;  %vm1136_vm10 = vmor %vm1134_vm8, %vm1135_vm6  ;;  %v1141_v2 = vor.u32 1.1754944e-38, %v1140_v26 }
 0x37f   :  { %v1131_v31 = vsub.f32 1.0, %v1130_v47  ;;  %v1161_v26 = vor.u32 1.1754944e-38, %v1160_v25  ;;  %v3726_v25 = vld [vmem:[#allocation19_spill] sm:$0xff] }
 0x380   :  { %v1113_v9 = vmul.f32 %v2043_v5, %v1112_v21 }
 0x381   :  { %v1132_v16 = vmul.f32 %v2045_v36, %v1131_v31 }
 0x382   :  { %v2047_v8 = vpop.eup %2046  ;;  %v1114_v37 = vadd.f32 %v2043_v5, %v1113_v9 }
 0x383   :  { %v1133_v13 = vadd.f32 %v2045_v36, %v1132_v16  ;;  %v1150_v46 = vmul.f32 %v2047_v8, %v1148_v32  ;;  %v2049_v50 = vpop.eup %2048  ;;  %vm1155_vm13 = vweird.f32 %v2047_v8  ;;  %v1158_v16 = vand.u32 2147483647, %v1148_v32  ;;  %v3714_v32 = vld [vmem:[#allocation26_spill] sm:$0xff] }
 0x384   :  { %v1118_v47 = vsel %vm1117_vm9, %v2043_v5, %v1114_v37  ;;  %vm1156_vm15 = vmor %vm1154_vm14, %vm1155_vm13  ;;  %v3715_v37 = vld [vmem:[#allocation25_spill] sm:$0xff] }
 0x385   :  { %v1123_v6 = vsel %vm1120_vm11, %v1122_v60, %v1118_v47  ;;  %v1137_v21 = vsel %vm1136_vm10, %v2045_v36, %v1133_v13  ;;  %v1151_v4 = vsub.f32 1.0, %v1150_v46  ;;  %vm1159_vm0 = vcmp.eq.f32.partialorder %v1158_v16, 8.507059e+37  ;;  %v3716_v60 = vld [vmem:[#allocation16_spill] sm:$0xff]  ;;  %v3717_v13 = vld [vmem:[#allocation23_spill] sm:$0xff]  ;;  %v3727_v16 = vld [vmem:[#allocation33_spill] sm:$0xff] }
 0x386   :  { %v1142_v31 = vsel %vm1139_vm12, %v1141_v2, %v1137_v21  ;;  %v1165_v12 = vmul.f32 %v2049_v50, %v1123_v6  ;;  %v3713_v6 = vld [vmem:[#allocation30_spill] sm:$0xff]  ;;  %v3718_v46 = vld [vmem:[#allocation20_spill] sm:$0xff]  ;;  %v3719_v2 = vld [vmem:[#allocation31_spill] sm:$0xff] }
 0x387   :  { %v1164_v18 = vmul.f32 %v1142_v31, %v3108_v63  ;;  %v1152_v9 = vmul.f32 %v2047_v8, %v1151_v4  ;;  %v3709_v4 = vld [vmem:[#allocation12_spill] sm:$0xff]  ;;  %v3711_v63 = vld [vmem:[#allocation18_spill] sm:$0xff]  ;;  %v3720_v47 = vld [vmem:[#allocation27_spill] sm:$0xff] }
 0x388   :  { %v3721_v50 = vld [vmem:[#allocation17_spill] sm:$0xff]  ;;  %v3722_v21 = vld [vmem:[#allocation14_spill] sm:$0xff]  ;;  %v3723_v31 = vld [vmem:[#allocation24_spill] sm:$0xff] }
 0x389   :  { %v3242_v17 = vadd.f32 %v1165_v12, %v1164_v18  ;;  %v1153_v11 = vadd.f32 %v2047_v8, %v1152_v9  ;;  %v3708_v12 = vld [vmem:[#allocation15_spill] sm:$0xff]  ;;  %v3712_v18 = vld [vmem:[#allocation21_spill] sm:$0xff]  ;;  %v3724_v9 = vld [vmem:[#allocation32_spill] sm:$0xff] }
 0x38b   :  { %2050 = vtanh.f32 %v3242_v17  ;;  %v1157_v5 = vsel %vm1156_vm15, %v2047_v8, %v1153_v11  ;;  %v3710_v8 = vld [vmem:[#allocation13_spill] sm:$0xff]  ;;  %v3725_v11 = vld [vmem:[#allocation28_spill] sm:$0xff] }
 0x38c   :  { %v1162_v36 = vsel %vm1159_vm0, %v1161_v26, %v1157_v5  ;;  %v3728_v5 = vld [vmem:[#allocation38_spill] sm:$0xff]  ;;  %v3729_v26 = vld [vmem:[#allocation39_spill] sm:$0xff] }
 0x391   :  { %v2051_v54 = vpop.eup %2050 }
 0x392   :  { %v3245_v35 = vmul.f32 %v2051_v54, %v1162_v36  ;;  %v3730_v54 = vld [vmem:[#allocation29_spill] sm:$0xff]  ;;  %v3731_v36 = vld [vmem:[#allocation44_spill] sm:$0xff] }
 0x394   :  { %3707 = vst [vmem:[#allocation42_spill] sm:$0xff] %v3245_v35  ;;  %1193 = vmatmul.f32.vlgmr.msra.gmra.mxu0 %v3245_v35  ;;  %1213 = vmatmul.f32.vlgmr.msra.gmra.mxu1 %v3245_v35 }
 0x395   :  { %1233 = vmatmul.f32.vlgmr.msra.gmra.mxu2 %v3245_v35  ;;  %1253 = vmatmul.f32.vlgmr.msra.gmra.mxu3 %v3245_v35  ;;  %v3732_v35 = vld [vmem:[#allocation40_spill] sm:$0xff] }
 0x396   :  { %1487 = vmatpush.msra.mxu0 %v2964_v30  ;;  %1507 = vmatpush.msra.mxu1 %v2967_v0 }
 0x397   :  { %1527 = vmatpush.msra.mxu2 %v3119_v45  ;;  %1547 = vmatpush.msra.mxu3 %v2971_v10 }
 0x398   :  { %1488 = vmatpush.msra.mxu0 %v2974_v23  ;;  %1508 = vmatpush.msra.mxu1 %v2977_v33 }
 0x399   :  { %1528 = vmatpush.msra.mxu2 %v3125_v59  ;;  %1548 = vmatpush.msra.mxu3 %v2981_v39 }
 0x39a   :  { %1489 = vmatpush.msra.mxu0 %v2984_v20  ;;  %1509 = vmatpush.msra.mxu1 %v2987_v19 }
 0x39b   :  { %1529 = vmatpush.msra.mxu2 %v3131_v3  ;;  %1549 = vmatpush.msra.mxu3 %v2991_v27 }
 0x39c   :  { %1490 = vmatpush.msra.mxu0 %v2994_v28  ;;  %1510 = vmatpush.msra.mxu1 %v2997_v44 }
 0x39d   :  { %1530 = vmatpush.msra.mxu2 %v3137_v40  ;;  %1550 = vmatpush.msra.mxu3 %v3001_v43 }
 0x39e   :  { %1491 = vmatpush.msra.mxu0 %v3004_v24  ;;  %1511 = vmatpush.msra.mxu1 %v3007_v29 }
 0x39f   :  { %1531 = vmatpush.msra.mxu2 %v3143_v1  ;;  %1551 = vmatpush.msra.mxu3 %v3011_v42 }
 0x3a0   :  { %1492 = vmatpush.msra.mxu0 %v3014_v53  ;;  %1512 = vmatpush.msra.mxu1 %v3017_v38 }
 0x3a1   :  { %1532 = vmatpush.msra.mxu2 %v3149_v62  ;;  %1552 = vmatpush.msra.mxu3 %v3021_v56 }
 0x3a2   :  { %1493 = vmatpush.msra.mxu0 %v3024_v7  ;;  %1513 = vmatpush.msra.mxu1 %v3027_v41 }
 0x3a3   :  { %1533 = vmatpush.msra.mxu2 %v3155_v48  ;;  %1553 = vmatpush.msra.mxu3 %v3031_v58 }
 0x3a4   :  { %1494 = vmatpush.msra.mxu0 %v3034_v49  ;;  %1514 = vmatpush.msra.mxu1 %v3037_v51 }
 0x3a5   :  { %1534 = vmatpush.msra.mxu2 %v3161_v55  ;;  %1554 = vmatpush.msra.mxu3 %v3041_v22 }
 0x3a6   :  { %1495 = vmatpush.msra.mxu0 %v3044_v15  ;;  %1515 = vmatpush.msra.mxu1 %v3047_v57 }
 0x3a7   :  { %1535 = vmatpush.msra.mxu2 %v3167_v52  ;;  %1555 = vmatpush.msra.mxu3 %v3051_v14 }
 0x3a8   :  { %1496 = vmatpush.msra.mxu0 %v3054_v34  ;;  %1516 = vmatpush.msra.mxu1 %v3057_v61 }
 0x3a9   :  { %1536 = vmatpush.msra.mxu2 %v3708_v12  ;;  %1556 = vmatpush.msra.mxu3 %v3709_v4 }
 0x3aa   :  { %1497 = vmatpush.msra.mxu0 %v3710_v8  ;;  %1517 = vmatpush.msra.mxu1 %v3711_v63 }
 0x3ab   :  { %1537 = vmatpush.msra.mxu2 %v3712_v18  ;;  %1557 = vmatpush.msra.mxu3 %v3713_v6 }
 0x3ac   :  { %1498 = vmatpush.msra.mxu0 %v3714_v32  ;;  %1518 = vmatpush.msra.mxu1 %v3715_v37 }
 0x3ad   :  { %1538 = vmatpush.msra.mxu2 %v3716_v60  ;;  %1558 = vmatpush.msra.mxu3 %v3717_v13 }
 0x3ae   :  { %1499 = vmatpush.msra.mxu0 %v3718_v46  ;;  %1519 = vmatpush.msra.mxu1 %v3719_v2 }
 0x3af   :  { %1539 = vmatpush.msra.mxu2 %v3720_v47  ;;  %1559 = vmatpush.msra.mxu3 %v3721_v50  ;;  %v3734_v50 = vld [vmem:[#allocation34_spill] sm:$0xff]  ;;  %v3735_v47 = vld [vmem:[#allocation48_spill] sm:$0xff] }
 0x3b0   :  { %1500 = vmatpush.msra.mxu0 %v3722_v21  ;;  %1520 = vmatpush.msra.mxu1 %v3723_v31  ;;  %v3733_v21 = vld [vmem:[#allocation41_spill] sm:$0xff] }
 0x3b1   :  { %1540 = vmatpush.msra.mxu2 %v3724_v9  ;;  %1560 = vmatpush.msra.mxu3 %v3725_v11 }
 0x3b2   :  { %1501 = vmatpush.msra.mxu0 %v3726_v25  ;;  %1521 = vmatpush.msra.mxu1 %v3727_v16 }
 0x3b3   :  { %1541 = vmatpush.msra.mxu2 %v3728_v5  ;;  %1561 = vmatpush.msra.mxu3 %v3729_v26  ;;  %v3736_v26 = vld [vmem:[#allocation53_spill] sm:$0xff] }
 0x3b4   :  { %1502 = vmatpush.msra.mxu0 %v3730_v54  ;;  %1522 = vmatpush.msra.mxu1 %v3731_v36 }
 0x3b5   :  { %1542 = vmatpush.msra.mxu2 %v3732_v35  ;;  %1562 = vmatpush.msra.mxu3 %v3733_v21 }
 0x411   :  { %v1194_v31 = vpop.f32.mrf.mxu0  ;;  %v1214_v9 = vpop.f32.mrf.mxu1 }
 0x412   :  { %v1257_v11 = vadd.f32 %v1194_v31, %v3734_v50  ;;  %v1258_v25 = vadd.f32 %v1214_v9, %v3735_v47  ;;  %v3737_v50 = vld [vmem:[#allocation61_spill] sm:$0xff] }
 0x413   :  { %v3738_v31 = vld [vmem:[#allocation49_spill] sm:$0xff] }
 0x414   :  { %v1934_v2 = vmul.f32 -1.442695, %v1257_v11  ;;  %v1935_v16 = vmul.f32 -1.442695, %v1258_v25  ;;  %v400_v47 = vadd.f32 %v3738_v31, %v3737_v50 }
 0x416   :  { %2052 = vpow2.f32 %v1934_v2 }
 0x417   :  { %2054 = vpow2.f32 %v1935_v16 }
 0x418   :  { %v1254_v5 = vpop.f32.mrf.mxu3  ;;  %v1234_v21 = vpop.f32.mrf.mxu2 }
 0x419   :  { %v1260_v46 = vadd.f32 %v1254_v5, %v3736_v26  ;;  %v1259_v2 = vadd.f32 %v1234_v21, %v400_v47 }
 0x41b   :  { %v1936_v54 = vmul.f32 -1.442695, %v1260_v46 }
 0x41c   :  { %v2053_v13 = vpop.eup %2052 }
 0x41d   :  { %v2055_v36 = vpop.eup %2054  ;;  %v1264_v60 = vadd.f32 1.0, %v2053_v13  ;;  %2056 = vpow2.f32 %v1936_v54 }
 0x41e   :  { %v1283_v35 = vadd.f32 1.0, %v2055_v36 }
 0x41f   :  { %2058 = vrcp.f32 %v1264_v60  ;;  %v1276_v32 = vand.u32 2147483648, %v1264_v60  ;;  %v1274_v36 = vand.u32 2147483647, %v1264_v60  ;;  %vm1270_vm3 = vweird.f32 %v1264_v60 }
 0x420   :  { %2060 = vrcp.f32 %v1283_v35  ;;  %v1295_v13 = vand.u32 2147483648, %v1283_v35  ;;  %v1293_v18 = vand.u32 2147483647, %v1283_v35  ;;  %vm1289_vm4 = vweird.f32 %v1283_v35 }
 0x421   :  { %vm1275_vm7 = vcmp.eq.f32.partialorder %v1274_v36, 8.507059e+37 }
 0x422   :  { %vm1294_vm8 = vcmp.eq.f32.partialorder %v1293_v18, 8.507059e+37 }
 0x423   :  { %v2057_v37 = vpop.eup %2056 }
 0x424   :  { %v1303_v9 = vadd.f32 1.0, %v2057_v37  ;;  %v1277_v37 = vor.u32 1.1754944e-38, %v1276_v32 }
 0x425   :  { %v2059_v11 = vpop.eup %2058 }
 0x426   :  { %v2061_v25 = vpop.eup %2060  ;;  %v1266_v16 = vmul.f32 %v2059_v11, %v1264_v60  ;;  %2062 = vrcp.f32 %v1303_v9  ;;  %vm1271_vm1 = vweird.f32 %v2059_v11  ;;  %vm1309_vm10 = vweird.f32 %v1303_v9 }
 0x427   :  { %v1285_v5 = vmul.f32 %v2061_v25, %v1283_v35  ;;  %2064 = vtanh.f32 %v1259_v2  ;;  %vm1290_vm2 = vweird.f32 %v2061_v25  ;;  %vm1272_vm5 = vmor %vm1270_vm3, %vm1271_vm1  ;;  %v1313_v32 = vand.u32 2147483647, %v1303_v9 }
 0x428   :  { %v1267_v46 = vsub.f32 1.0, %v1266_v16  ;;  %vm1291_vm6 = vmor %vm1289_vm4, %vm1290_vm2  ;;  %v1296_v16 = vor.u32 1.1754944e-38, %v1295_v13 }
 0x429   :  { %v1286_v26 = vsub.f32 1.0, %v1285_v5  ;;  %vm1314_vm12 = vcmp.eq.f32.partialorder %v1313_v32, 8.507059e+37 }
 0x42a   :  { %v1268_v54 = vmul.f32 %v2059_v11, %v1267_v46 }
 0x42b   :  { %v1287_v6 = vmul.f32 %v2061_v25, %v1286_v26 }
 0x42c   :  { %v2063_v63 = vpop.eup %2062  ;;  %v1269_v31 = vadd.f32 %v2059_v11, %v1268_v54 }
 0x42d   :  { %v1288_v21 = vadd.f32 %v2061_v25, %v1287_v6  ;;  %v1305_v47 = vmul.f32 %v2063_v63, %v1303_v9  ;;  %v2065_v2 = vpop.eup %2064  ;;  %vm1310_vm9 = vweird.f32 %v2063_v63  ;;  %v1315_v6 = vand.u32 2147483648, %v1303_v9  ;;  %v3768_v9 = vld [vmem:[#allocation61_spill] sm:$0xff] }
 0x42e   :  { %v1273_v5 = vsel %vm1272_vm5, %v2059_v11, %v1269_v31  ;;  %vm1311_vm11 = vmor %vm1309_vm10, %vm1310_vm9  ;;  %v3769_v31 = vld [vmem:[#allocation52_spill] sm:$0xff] }
 0x42f   :  { %v1278_v50 = vsel %vm1275_vm7, %v1277_v37, %v1273_v5  ;;  %v1292_v46 = vsel %vm1291_vm6, %v2061_v25, %v1288_v21  ;;  %v1306_v8 = vsub.f32 1.0, %v1305_v47  ;;  %v1316_v13 = vor.u32 1.1754944e-38, %v1315_v6 }
 0x430   :  { %v1297_v26 = vsel %vm1294_vm8, %v1296_v16, %v1292_v46  ;;  %v1320_v4 = vmul.f32 %v2065_v2, %v1278_v50  ;;  %v403_v37 = vadd.f32 %v3769_v31, %v3768_v9 }
 0x431   :  { %v1319_v12 = vmul.f32 %v1297_v26, %v3242_v17  ;;  %v1307_v54 = vmul.f32 %v2063_v63, %v1306_v8 }
 0x433   :  { %v3321_v60 = vadd.f32 %v1320_v4, %v1319_v12  ;;  %v1308_v35 = vadd.f32 %v2063_v63, %v1307_v54 }
 0x435   :  { %2066 = vtanh.f32 %v3321_v60  ;;  %v1312_v11 = vsel %vm1311_vm11, %v2063_v63, %v1308_v35 }
 0x436   :  { %v1317_v25 = vsel %vm1314_vm12, %v1316_v13, %v1312_v11 }
 0x43b   :  { %v2067_v18 = vpop.eup %2066 }
 0x43c   :  { %v3324_v36 = vmul.f32 %v2067_v18, %v1317_v25 }
 0x43e   :  { %1348 = vmatmul.f32.vlgmr.msrb.gmra.mxu0 %v3324_v36  ;;  %1368 = vmatmul.f32.vlgmr.msrb.gmra.mxu1 %v3324_v36 }
 0x43f   :  { %1388 = vmatmul.f32.vlgmr.msrb.gmra.mxu2 %v3324_v36  ;;  %1408 = vmatmul.f32.vlgmr.msrb.gmra.mxu3 %v3324_v36 }
 0x440   :  { %1642 = vmatpush.msrb.mxu0 %v2964_v30  ;;  %1662 = vmatpush.msrb.mxu1 %v2967_v0  ;;  %v3739_v30 = vld [vmem:[#allocation15_spill] sm:$0xff]  ;;  %v3740_v0 = vld [vmem:[#allocation12_spill] sm:$0xff] }
 0x441   :  { %1682 = vmatpush.msrb.mxu2 %v3119_v45  ;;  %1702 = vmatpush.msrb.mxu3 %v2971_v10  ;;  %v3741_v10 = vld [vmem:[#allocation13_spill] sm:$0xff] }
 0x442   :  { %1643 = vmatpush.msrb.mxu0 %v2974_v23  ;;  %1663 = vmatpush.msrb.mxu1 %v2977_v33  ;;  %v3742_v23 = vld [vmem:[#allocation18_spill] sm:$0xff]  ;;  %v3743_v33 = vld [vmem:[#allocation21_spill] sm:$0xff] }
 0x443   :  { %1683 = vmatpush.msrb.mxu2 %v3125_v59  ;;  %1703 = vmatpush.msrb.mxu3 %v2981_v39  ;;  %v3744_v39 = vld [vmem:[#allocation30_spill] sm:$0xff]  ;;  %v3766_v59 = vld [vmem:[#allocation51_spill] sm:$0xff] }
 0x444   :  { %1644 = vmatpush.msrb.mxu0 %v2984_v20  ;;  %1664 = vmatpush.msrb.mxu1 %v2987_v19  ;;  %v3745_v20 = vld [vmem:[#allocation26_spill] sm:$0xff]  ;;  %v3746_v19 = vld [vmem:[#allocation25_spill] sm:$0xff] }
 0x445   :  { %1684 = vmatpush.msrb.mxu2 %v3131_v3  ;;  %1704 = vmatpush.msrb.mxu3 %v2991_v27  ;;  %v3747_v27 = vld [vmem:[#allocation16_spill] sm:$0xff] }
 0x446   :  { %1645 = vmatpush.msrb.mxu0 %v2994_v28  ;;  %1665 = vmatpush.msrb.mxu1 %v2997_v44  ;;  %v3748_v28 = vld [vmem:[#allocation23_spill] sm:$0xff]  ;;  %v3749_v44 = vld [vmem:[#allocation20_spill] sm:$0xff] }
 0x447   :  { %1685 = vmatpush.msrb.mxu2 %v3137_v40  ;;  %1705 = vmatpush.msrb.mxu3 %v3001_v43  ;;  %v3750_v43 = vld [vmem:[#allocation31_spill] sm:$0xff] }
 0x448   :  { %1646 = vmatpush.msrb.mxu0 %v3004_v24  ;;  %1666 = vmatpush.msrb.mxu1 %v3007_v29  ;;  %v3751_v24 = vld [vmem:[#allocation27_spill] sm:$0xff]  ;;  %v3752_v29 = vld [vmem:[#allocation17_spill] sm:$0xff] }
 0x449   :  { %1686 = vmatpush.msrb.mxu2 %v3143_v1  ;;  %1706 = vmatpush.msrb.mxu3 %v3011_v42  ;;  %v3753_v42 = vld [vmem:[#allocation14_spill] sm:$0xff] }
 0x44a   :  { %1647 = vmatpush.msrb.mxu0 %v3014_v53  ;;  %1667 = vmatpush.msrb.mxu1 %v3017_v38  ;;  %v3754_v53 = vld [vmem:[#allocation24_spill] sm:$0xff] }
 0x44b   :  { %1687 = vmatpush.msrb.mxu2 %v3149_v62  ;;  %1707 = vmatpush.msrb.mxu3 %v3021_v56  ;;  %v3755_v38 = vld [vmem:[#allocation32_spill] sm:$0xff] }
 0x44c   :  { %1648 = vmatpush.msrb.mxu0 %v3024_v7  ;;  %1668 = vmatpush.msrb.mxu1 %v3027_v41  ;;  %v3756_v56 = vld [vmem:[#allocation28_spill] sm:$0xff]  ;;  %v3757_v7 = vld [vmem:[#allocation19_spill] sm:$0xff]  ;;  %v3758_v41 = vld [vmem:[#allocation33_spill] sm:$0xff] }
 0x44d   :  { %1688 = vmatpush.msrb.mxu2 %v3155_v48  ;;  %1708 = vmatpush.msrb.mxu3 %v3031_v58  ;;  %v3759_v58 = vld [vmem:[#allocation38_spill] sm:$0xff]  ;;  %v3767_v48 = vld [vmem:[#allocation56_spill] sm:$0xff] }
 0x44e   :  { %1649 = vmatpush.msrb.mxu0 %v3034_v49  ;;  %1669 = vmatpush.msrb.mxu1 %v3037_v51  ;;  %v3760_v49 = vld [vmem:[#allocation39_spill] sm:$0xff]  ;;  %v3761_v51 = vld [vmem:[#allocation29_spill] sm:$0xff] }
 0x44f   :  { %1689 = vmatpush.msrb.mxu2 %v3161_v55  ;;  %1709 = vmatpush.msrb.mxu3 %v3041_v22  ;;  %v3762_v22 = vld [vmem:[#allocation44_spill] sm:$0xff] }
 0x450   :  { %1650 = vmatpush.msrb.mxu0 %v3044_v15  ;;  %1670 = vmatpush.msrb.mxu1 %v3047_v57  ;;  %v3763_v15 = vld [vmem:[#allocation40_spill] sm:$0xff]  ;;  %v3764_v57 = vld [vmem:[#allocation41_spill] sm:$0xff] }
 0x451   :  { %1690 = vmatpush.msrb.mxu2 %v3167_v52  ;;  %1710 = vmatpush.msrb.mxu3 %v3051_v14 }
 0x452   :  { %1651 = vmatpush.msrb.mxu0 %v3054_v34  ;;  %1671 = vmatpush.msrb.mxu1 %v3057_v61  ;;  %v3765_v61 = vld [vmem:[#allocation36_spill] sm:$0xff] }
 0x453   :  { %1691 = vmatpush.msrb.mxu2 %v3739_v30  ;;  %1711 = vmatpush.msrb.mxu3 %v3740_v0 }
 0x454   :  { %1652 = vmatpush.msrb.mxu0 %v3741_v10  ;;  %1672 = vmatpush.msrb.mxu1 %v3742_v23 }
 0x455   :  { %1692 = vmatpush.msrb.mxu2 %v3743_v33  ;;  %1712 = vmatpush.msrb.mxu3 %v3744_v39 }
 0x456   :  { %1653 = vmatpush.msrb.mxu0 %v3745_v20  ;;  %1673 = vmatpush.msrb.mxu1 %v3746_v19 }
 0x457   :  { %1693 = vmatpush.msrb.mxu2 %v3747_v27  ;;  %1713 = vmatpush.msrb.mxu3 %v3748_v28 }
 0x458   :  { %1654 = vmatpush.msrb.mxu0 %v3749_v44  ;;  %1674 = vmatpush.msrb.mxu1 %v3750_v43 }
 0x459   :  { %1694 = vmatpush.msrb.mxu2 %v3751_v24  ;;  %1714 = vmatpush.msrb.mxu3 %v3752_v29 }
 0x45a   :  { %1655 = vmatpush.msrb.mxu0 %v3753_v42  ;;  %1675 = vmatpush.msrb.mxu1 %v3754_v53 }
 0x45b   :  { %1695 = vmatpush.msrb.mxu2 %v3755_v38  ;;  %1715 = vmatpush.msrb.mxu3 %v3756_v56 }
 0x45c   :  { %1656 = vmatpush.msrb.mxu0 %v3757_v7  ;;  %1676 = vmatpush.msrb.mxu1 %v3758_v41 }
 0x45d   :  { %1696 = vmatpush.msrb.mxu2 %v3759_v58  ;;  %1716 = vmatpush.msrb.mxu3 %v3760_v49 }
 0x45e   :  { %1657 = vmatpush.msrb.mxu0 %v3761_v51  ;;  %1677 = vmatpush.msrb.mxu1 %v3762_v22  ;;  %v1814_v22 = vld [vmem:[#allocation7 + $0x70] sm:$0xff] }
 0x45f   :  { %1697 = vmatpush.msrb.mxu2 %v3763_v15  ;;  %1717 = vmatpush.msrb.mxu3 %v3764_v57  ;;  %v1813_v15 = vld [vmem:[#allocation7 + $0x68] sm:$0xff]  ;;  %v1812_v57 = vld [vmem:[#allocation7 + $0x60] sm:$0xff] }
 0x4bb   :  { %v1349_v14 = vpop.f32.mrf.mxu0  ;;  %v1369_v34 = vpop.f32.mrf.mxu1 }
 0x4bc   :  { %v1412_v45 = vadd.f32 %v1349_v14, %v3765_v61  ;;  %v1413_v3 = vadd.f32 %v1369_v34, %v3766_v59  ;;  %v1811_v14 = vld [vmem:[#allocation7 + $0x58] sm:$0xff]  ;;  %v3770_v59 = vld [vmem:[#allocation35_spill] sm:$0xff] }
 0x4be   :  { %v1937_v40 = vmul.f32 -1.442695, %v1412_v45  ;;  %v1938_v1 = vmul.f32 -1.442695, %v1413_v3  ;;  %v1810_v45 = vld [vmem:[#allocation7 + $0x50] sm:$0xff] }
 0x4c0   :  { %2068 = vpow2.f32 %v1937_v40  ;;  %v3771_v40 = vld [vmem:[#allocation54_spill] sm:$0xff] }
 0x4c1   :  { %2070 = vpow2.f32 %v1938_v1 }
 0x4c2   :  { %v1409_v62 = vpop.f32.mrf.mxu3  ;;  %v1389_v63 = vpop.f32.mrf.mxu2 }
 0x4c3   :  { %v1415_v55 = vadd.f32 %v1409_v62, %v3767_v48  ;;  %v1414_v16 = vadd.f32 %v1389_v63, %v403_v37  ;;  %v1809_v62 = vld [vmem:[#allocation7 + $0x48] sm:$0xff]  ;;  %v1804_v37 = vld [vmem:[#allocation7 + $0x20] sm:$0xff] }
 0x4c5   :  { %v1939_v52 = vmul.f32 -1.442695, %v1415_v55 }
 0x4c6   :  { %v2069_v17 = vpop.eup %2068 }
 0x4c7   :  { %v2071_v12 = vpop.eup %2070  ;;  %v1419_v4 = vadd.f32 1.0, %v2069_v17  ;;  %2072 = vpow2.f32 %v1939_v52  ;;  %v1808_v52 = vld [vmem:[#allocation7 + $0x40] sm:$0xff]  ;;  %v1807_v17 = vld [vmem:[#allocation7 + $0x38] sm:$0xff] }
 0x4c8   :  { %v1438_v8 = vadd.f32 1.0, %v2071_v12  ;;  %v1806_v12 = vld [vmem:[#allocation7 + $0x30] sm:$0xff] }
 0x4c9   :  { %2074 = vrcp.f32 %v1419_v4  ;;  %v1431_v35 = vand.u32 2147483648, %v1419_v4  ;;  %v1429_v11 = vand.u32 2147483647, %v1419_v4  ;;  %vm1425_vm15 = vweird.f32 %v1419_v4 }
 0x4ca   :  { %2076 = vrcp.f32 %v1438_v8  ;;  %v1450_v6 = vand.u32 2147483648, %v1438_v8  ;;  %v1448_v18 = vand.u32 2147483647, %v1438_v8  ;;  %vm1444_vm0 = vweird.f32 %v1438_v8 }
 0x4cb   :  { %v1432_v0 = vor.u32 1.1754944e-38, %v1431_v35  ;;  %vm1430_vm3 = vcmp.eq.f32.partialorder %v1429_v11, 8.507059e+37  ;;  %v1800_v11 = vld [vmem:[#allocation7] sm:$0xff] }
 0x4cc   :  { %v1451_v33 = vor.u32 1.1754944e-38, %v1450_v6  ;;  %vm1449_vm4 = vcmp.eq.f32.partialorder %v1448_v18, 8.507059e+37  ;;  %v3773_v6 = vld [vmem:[#allocation55_spill] sm:$0xff] }
 0x4cd   :  { %v2073_v50 = vpop.eup %2072 }
 0x4ce   :  { %v1458_v21 = vadd.f32 1.0, %v2073_v50  ;;  %v1805_v50 = vld [vmem:[#allocation7 + $0x28] sm:$0xff] }
 0x4cf   :  { %v2075_v47 = vpop.eup %2074 }
 0x4d0   :  { %v2077_v5 = vpop.eup %2076  ;;  %v1421_v2 = vmul.f32 %v2075_v47, %v1419_v4  ;;  %2078 = vrcp.f32 %v1458_v21  ;;  %vm1426_vm13 = vweird.f32 %v2075_v47  ;;  %v1470_v38 = vand.u32 2147483648, %v1458_v21 }
 0x4d1   :  { %v1440_v46 = vmul.f32 %v2077_v5, %v1438_v8  ;;  %2080 = vtanh.f32 %v1414_v16  ;;  %vm1445_vm14 = vweird.f32 %v2077_v5  ;;  %vm1427_vm1 = vmor %vm1425_vm15, %vm1426_vm13  ;;  %vm1464_vm6 = vweird.f32 %v1458_v21  ;;  %v3772_v8 = vld [vmem:[#allocation59_spill] sm:$0xff] }
 0x4d2   :  { %v1422_v26 = vsub.f32 1.0, %v1421_v2  ;;  %vm1446_vm2 = vmor %vm1444_vm0, %vm1445_vm14  ;;  %v1468_v56 = vand.u32 2147483647, %v1458_v21  ;;  %v1471_v41 = vor.u32 1.1754944e-38, %v1470_v38  ;;  %v1803_v2 = vld [vmem:[#allocation7 + $0x18] sm:$0xff] }
 0x4d3   :  { %v1441_v54 = vsub.f32 1.0, %v1440_v46  ;;  %v1802_v46 = vld [vmem:[#allocation7 + $0x10] sm:$0xff] }
 0x4d4   :  { %v1423_v32 = vmul.f32 %v2075_v47, %v1422_v26  ;;  %vm1469_vm8 = vcmp.eq.f32.partialorder %v1468_v56, 8.507059e+37  ;;  %v1801_v26 = vld [vmem:[#allocation7 + $0x8] sm:$0xff] }
 0x4d5   :  { %v1442_v13 = vmul.f32 %v2077_v5, %v1441_v54 }
 0x4d6   :  { %v2079_v25 = vpop.eup %2078  ;;  %v1424_v30 = vadd.f32 %v2075_v47, %v1423_v32  ;;  %v406_v32 = vadd.f32 %v3773_v6, %v3768_v9 }
 0x4d7   :  { %v1443_v10 = vadd.f32 %v2077_v5, %v1442_v13  ;;  %v1460_v23 = vmul.f32 %v2079_v25, %v1458_v21  ;;  %v2081_v20 = vpop.eup %2080  ;;  %vm1465_vm5 = vweird.f32 %v2079_v25 }
 0x4d8   :  { %v1428_v39 = vsel %vm1427_vm1, %v2075_v47, %v1424_v30  ;;  %vm1466_vm7 = vmor %vm1464_vm6, %vm1465_vm5 }
 0x4d9   :  { %v1433_v19 = vsel %vm1430_vm3, %v1432_v0, %v1428_v39  ;;  %v1447_v27 = vsel %vm1446_vm2, %v2077_v5, %v1443_v10  ;;  %v1461_v28 = vsub.f32 1.0, %v1460_v23 }
 0x4da   :  { %v1452_v44 = vsel %vm1449_vm4, %v1451_v33, %v1447_v27  ;;  %v1475_v43 = vmul.f32 %v2081_v20, %v1433_v19 }
 0x4db   :  { %v1474_v24 = vmul.f32 %v1452_v44, %v3321_v60  ;;  %v1462_v29 = vmul.f32 %v2079_v25, %v1461_v28  ;;  %v1815_v60 = vld [vmem:[#allocation7 + $0x78] sm:$0xff] }
 0x4dd   :  { %v3400_v42 = vadd.f32 %v1475_v43, %v1474_v24  ;;  %v1463_v53 = vadd.f32 %v2079_v25, %v1462_v29 }
 0x4df   :  { %2082 = vtanh.f32 %v3400_v42  ;;  %v1467_v7 = vsel %vm1466_vm7, %v2079_v25, %v1463_v53 }
 0x4e0   :  { %v1472_v49 = vsel %vm1469_vm8, %v1471_v41, %v1467_v7 }
 0x4e5   :  { %v2083_v58 = vpop.eup %2082 }
 0x4e6   :  { %v3403_v51 = vmul.f32 %v2083_v58, %v1472_v49 }
 0x4e8   :  { %1503 = vmatmul.f32.vlgmr.msra.gmra.mxu0 %v3403_v51  ;;  %1523 = vmatmul.f32.vlgmr.msra.gmra.mxu1 %v3403_v51 }
 0x4e9   :  { %1543 = vmatmul.f32.vlgmr.msra.gmra.mxu2 %v3403_v51  ;;  %1563 = vmatmul.f32.vlgmr.msra.gmra.mxu3 %v3403_v51 }
 0x4ea   :  { %1820 = vmatpush.msra.mxu0 %v1815_v60 }
 0x4ec   :  { %1821 = vmatpush.msra.mxu0 %v1814_v22 }
 0x4ee   :  { %1822 = vmatpush.msra.mxu0 %v1813_v15 }
 0x4f0   :  { %1823 = vmatpush.msra.mxu0 %v1812_v57 }
 0x4f2   :  { %1824 = vmatpush.msra.mxu0 %v1811_v14 }
 0x4f4   :  { %1825 = vmatpush.msra.mxu0 %v1810_v45 }
 0x4f6   :  { %1826 = vmatpush.msra.mxu0 %v1809_v62 }
 0x4f8   :  { %1827 = vmatpush.msra.mxu0 %v1808_v52  ;;  %v3776_v52 = vld [vmem:[#allocation22_spill] sm:$0xff] }
 0x4fa   :  { %1828 = vmatpush.msra.mxu0 %v1807_v17  ;;  %v3777_v17 = vld [vmem:[#allocation42_spill] sm:$0xff] }
 0x4fc   :  { %1829 = vmatpush.msra.mxu0 %v1806_v12 }
 0x4fe   :  { %1830 = vmatpush.msra.mxu0 %v1805_v50  ;;  %v3779_v50 = vld [vmem:[#allocation57_spill] sm:$0xff] }
 0x500   :  { %1831 = vmatpush.msra.mxu0 %v1804_v37 }
 0x502   :  { %1832 = vmatpush.msra.mxu0 %v1803_v2 }
 0x504   :  { %1833 = vmatpush.msra.mxu0 %v1802_v46 }
 0x506   :  { %1834 = vmatpush.msra.mxu0 %v1801_v26 }
 0x508   :  { %1835 = vmatpush.msra.mxu0 %v1800_v11 }
 0x565   :  { %v1504_v34 = vpop.f32.mrf.mxu0  ;;  %v1524_v61 = vpop.f32.mrf.mxu1 }
 0x566   :  { %v1567_v3 = vadd.f32 %v1504_v34, %v3770_v59  ;;  %v1568_v1 = vadd.f32 %v1524_v61, %v3771_v40 }
 0x568   :  { %v1940_v48 = vmul.f32 -1.442695, %v1567_v3  ;;  %v1941_v55 = vmul.f32 -1.442695, %v1568_v1 }
 0x56a   :  { %2084 = vpow2.f32 %v1940_v48 }
 0x56b   :  { %2086 = vpow2.f32 %v1941_v55  ;;  %v3775_v55 = vld [vmem:[#allocation11_spill] sm:$0xff] }
 0x56c   :  { %v1564_v4 = vpop.f32.mrf.mxu3  ;;  %v1544_v54 = vpop.f32.mrf.mxu2 }
 0x56d   :  { %v1570_v63 = vadd.f32 %v1564_v4, %v3772_v8  ;;  %v1569_v25 = vadd.f32 %v1544_v54, %v406_v32  ;;  %v3778_v8 = vld [vmem:[#allocation37_spill] sm:$0xff] }
 0x56f   :  { %v1942_v31 = vmul.f32 -1.442695, %v1570_v63 }
 0x570   :  { %v2085_v21 = vpop.eup %2084 }
 0x571   :  { %v2087_v47 = vpop.eup %2086  ;;  %v1574_v16 = vadd.f32 1.0, %v2085_v21  ;;  %2088 = vpow2.f32 %v1942_v31 }
 0x572   :  { %v1593_v5 = vadd.f32 1.0, %v2087_v47  ;;  %v3429_v47 = vld [vmem:[%s3482_s9] ss:$0 sm:$0xff] }
 0x573   :  { %2090 = vrcp.f32 %v1574_v16  ;;  %v1586_v39 = vand.u32 2147483648, %v1574_v16  ;;  %v1584_v27 = vand.u32 2147483647, %v1574_v16  ;;  %vm1580_vm11 = vweird.f32 %v1574_v16 }
 0x574   :  { %2092 = vrcp.f32 %v1593_v5  ;;  %v1605_v20 = vand.u32 2147483648, %v1593_v5  ;;  %v1603_v44 = vand.u32 2147483647, %v1593_v5  ;;  %vm1599_vm12 = vweird.f32 %v1593_v5 }
 0x575   :  { %v1587_v29 = vor.u32 1.1754944e-38, %v1586_v39  ;;  %vm1585_vm15 = vcmp.eq.f32.partialorder %v1584_v27, 8.507059e+37 }
 0x576   :  { %v1606_v56 = vor.u32 1.1754944e-38, %v1605_v20  ;;  %vm1604_vm0 = vcmp.eq.f32.partialorder %v1603_v44, 8.507059e+37 }
 0x577   :  { %v2089_v35 = vpop.eup %2088 }
 0x578   :  { %v1613_v13 = vadd.f32 1.0, %v2089_v35 }
 0x579   :  { %v2091_v18 = vpop.eup %2090 }
 0x57a   :  { %v2093_v30 = vpop.eup %2092  ;;  %v1576_v0 = vmul.f32 %v2091_v18, %v1574_v16  ;;  %2094 = vrcp.f32 %v1613_v13  ;;  %vm1581_vm9 = vweird.f32 %v2091_v18  ;;  %v1625_v45 = vand.u32 2147483648, %v1613_v13 }
 0x57b   :  { %v1595_v10 = vmul.f32 %v2093_v30, %v1593_v5  ;;  %2096 = vtanh.f32 %v1569_v25  ;;  %vm1600_vm10 = vweird.f32 %v2093_v30  ;;  %vm1582_vm13 = vmor %vm1580_vm11, %vm1581_vm9  ;;  %vm1619_vm2 = vweird.f32 %v1613_v13  ;;  %v3781_v25 = vld [vmem:[#allocation58_spill] sm:$0xff] }
 0x57c   :  { %v1577_v23 = vsub.f32 1.0, %v1576_v0  ;;  %vm1601_vm14 = vmor %vm1599_vm12, %vm1600_vm10  ;;  %v1623_v59 = vand.u32 2147483647, %v1613_v13  ;;  %v1626_v40 = vor.u32 1.1754944e-38, %v1625_v45 }
 0x57d   :  { %v1596_v33 = vsub.f32 1.0, %v1595_v10 }
 0x57e   :  { %v1578_v19 = vmul.f32 %v2091_v18, %v1577_v23  ;;  %vm1624_vm4 = vcmp.eq.f32.partialorder %v1623_v59, 8.507059e+37 }
 0x57f   :  { %v1597_v28 = vmul.f32 %v2093_v30, %v1596_v33 }
 0x580   :  { %v2095_v43 = vpop.eup %2094  ;;  %v1579_v24 = vadd.f32 %v2091_v18, %v1578_v19 }
 0x581   :  { %v1598_v53 = vadd.f32 %v2093_v30, %v1597_v28  ;;  %v1615_v38 = vmul.f32 %v2095_v43, %v1613_v13  ;;  %v2097_v41 = vpop.eup %2096  ;;  %vm1620_vm1 = vweird.f32 %v2095_v43 }
 0x582   :  { %v1583_v7 = vsel %vm1582_vm13, %v2091_v18, %v1579_v24  ;;  %vm1621_vm3 = vmor %vm1619_vm2, %vm1620_vm1 }
 0x583   :  { %v1588_v58 = vsel %vm1585_vm15, %v1587_v29, %v1583_v7  ;;  %v1602_v49 = vsel %vm1601_vm14, %v2093_v30, %v1598_v53  ;;  %v1616_v60 = vsub.f32 1.0, %v1615_v38  ;;  %v409_v30 = vadd.f32 %v3781_v25, %v3768_v9 }
 0x584   :  { %v1607_v22 = vsel %vm1604_vm0, %v1606_v56, %v1602_v49  ;;  %v1630_v15 = vmul.f32 %v2097_v41, %v1588_v58 }
 0x585   :  { %v1629_v57 = vmul.f32 %v1607_v22, %v3400_v42  ;;  %v1617_v14 = vmul.f32 %v2095_v43, %v1616_v60  ;;  %v3774_v42 = vld [vmem:[#allocation62_spill] sm:$0xff] }
 0x587   :  { %v3415_v34 = vadd.f32 %v1630_v15, %v1629_v57  ;;  %v1618_v61 = vadd.f32 %v2095_v43, %v1617_v14 }
 0x589   :  { %2098 = vtanh.f32 %v3415_v34  ;;  %v1622_v3 = vsel %vm1621_vm3, %v2095_v43, %v1618_v61 }
 0x58a   :  { %v1627_v62 = vsel %vm1624_vm4, %v1626_v40, %v1622_v3 }
 0x58f   :  { %v2099_v1 = vpop.eup %2098 }
 0x590   :  { %v1633_v48 = vmul.f32 %v2099_v1, %v1627_v62 }
 0x592   :  { %1658 = vmatmul.f32.vlgmr.msrb.gmra.mxu0 %v1633_v48  ;;  %1678 = vmatmul.f32.vlgmr.msrb.gmra.mxu1 %v1633_v48 }
 0x593   :  { %1698 = vmatmul.f32.vlgmr.msrb.gmra.mxu2 %v1633_v48  ;;  %1718 = vmatmul.f32.vlgmr.msrb.gmra.mxu3 %v1633_v48 }
 0x59a   :  { %1836 = vmatmul.f32.vlgmr.msra.gmra.mxu0 %v3774_v42 }
 0x5a2   :  { %1839 = vmatmul.f32.gmra.mxu0 %v3775_v55 }
 0x5aa   :  { %1842 = vmatmul.f32.gmra.mxu0 %v3776_v52 }
 0x5b2   :  { %1845 = vmatmul.f32.gmra.mxu0 %v3777_v17 }
 0x5ba   :  { %1848 = vmatmul.f32.gmra.mxu0 %v3324_v36  ;;  %v3780_v36 = vld [vmem:[#allocation60_spill] sm:$0xff] }
 0x5c2   :  { %1851 = vmatmul.f32.gmra.mxu0 %v3403_v51 }
 0x5ca   :  { %1854 = vmatmul.f32.gmra.mxu0 %v1633_v48 }
 0x60f   :  { %v1659_v12 = vpop.f32.mrf.mxu0  ;;  %v1679_v4 = vpop.f32.mrf.mxu1 }
 0x610   :  { %v1722_v63 = vadd.f32 %v1659_v12, %v3778_v8  ;;  %v1723_v31 = vadd.f32 %v1679_v4, %v3779_v50 }
 0x612   :  { %v1943_v37 = vmul.f32 -1.442695, %v1722_v63  ;;  %v1944_v21 = vmul.f32 -1.442695, %v1723_v31 }
 0x614   :  { %2100 = vpow2.f32 %v1943_v37 }
 0x615   :  { %2102 = vpow2.f32 %v1944_v21 }
 0x616   :  { %v1719_v16 = vpop.f32.mrf.mxu3  ;;  %v1699_v11 = vpop.f32.mrf.mxu2 }
 0x617   :  { %v1725_v5 = vadd.f32 %v1719_v16, %v3780_v36  ;;  %v1837_v51 = vpop.f32.mrf.mxu0  ;;  %v1724_v23 = vadd.f32 %v1699_v11, %v409_v30 }
 0x618   :  { %v1838_v2 = vadd.f32 %v3429_v47, %v1837_v51 }
 0x619   :  { %v1945_v46 = vmul.f32 -1.442695, %v1725_v5 }
 0x61a   :  { %v2101_v26 = vpop.eup %2100  ;;  %1861 = vst [vmem:[%s3483_s10] sm:$0xff] %v1838_v2 }
 0x61b   :  { %v2103_v54 = vpop.eup %2102  ;;  %v1729_v35 = vadd.f32 1.0, %v2101_v26  ;;  %2104 = vpow2.f32 %v1945_v46 }
 0x61c   :  { %v1748_v6 = vadd.f32 1.0, %v2103_v54 }
 0x61d   :  { %2106 = vrcp.f32 %v1729_v35  ;;  %v1739_v28 = vand.u32 2147483647, %v1729_v35  ;;  %v1741_v44 = vand.u32 2147483648, %v1729_v35  ;;  %vm1735_vm7 = vweird.f32 %v1729_v35 }
 0x61e   :  { %2108 = vrcp.f32 %v1748_v6  ;;  %v1760_v24 = vand.u32 2147483648, %v1748_v6  ;;  %v1758_v38 = vand.u32 2147483647, %v1748_v6  ;;  %vm1754_vm8 = vweird.f32 %v1748_v6 }
 0x61f   :  { %v1840_v32 = vpop.f32.mrf.mxu0  ;;  %v1742_v41 = vor.u32 1.1754944e-38, %v1741_v44  ;;  %vm1740_vm11 = vcmp.eq.f32.partialorder %v1739_v28, 8.507059e+37 }
 0x620   :  { %v1841_v13 = vadd.f32 %v3429_v47, %v1840_v32  ;;  %v1761_v60 = vor.u32 1.1754944e-38, %v1760_v24  ;;  %vm1759_vm12 = vcmp.eq.f32.partialorder %v1758_v38, 8.507059e+37 }
 0x621   :  { %v2105_v18 = vpop.eup %2104 }
 0x622   :  { %v1768_v0 = vadd.f32 1.0, %v2105_v18  ;;  %1862 = vst [vmem:[%s3483_s10 + $0x8] sm:$0xff] %v1841_v13 }
 0x623   :  { %v2107_v10 = vpop.eup %2106 }
 0x624   :  { %v2109_v33 = vpop.eup %2108  ;;  %v1731_v39 = vmul.f32 %v2107_v10, %v1729_v35  ;;  %2110 = vrcp.f32 %v1768_v0  ;;  %vm1736_vm5 = vweird.f32 %v2107_v10  ;;  %v1780_v55 = vand.u32 2147483648, %v1768_v0 }
 0x625   :  { %v1750_v20 = vmul.f32 %v2109_v33, %v1748_v6  ;;  %2112 = vtanh.f32 %v1724_v23  ;;  %vm1755_vm6 = vweird.f32 %v2109_v33  ;;  %vm1737_vm9 = vmor %vm1735_vm7, %vm1736_vm5  ;;  %vm1774_vm14 = vweird.f32 %v1768_v0 }
 0x626   :  { %v1732_v19 = vsub.f32 1.0, %v1731_v39  ;;  %vm1756_vm10 = vmor %vm1754_vm8, %vm1755_vm6  ;;  %v1778_v52 = vand.u32 2147483647, %v1768_v0  ;;  %v1781_v12 = vor.u32 1.1754944e-38, %v1780_v55 }
 0x627   :  { %v1751_v27 = vsub.f32 1.0, %v1750_v20  ;;  %v1843_v43 = vpop.f32.mrf.mxu0 }
 0x628   :  { %v1733_v29 = vmul.f32 %v2107_v10, %v1732_v19  ;;  %v1844_v9 = vadd.f32 %v3429_v47, %v1843_v43  ;;  %vm1779_vm0 = vcmp.eq.f32.partialorder %v1778_v52, 8.507059e+37 }
 0x629   :  { %v1752_v53 = vmul.f32 %v2109_v33, %v1751_v27 }
 0x62a   :  { %v2111_v56 = vpop.eup %2110  ;;  %v1734_v7 = vadd.f32 %v2107_v10, %v1733_v29  ;;  %1863 = vst [vmem:[%s3483_s10 + $0x10] sm:$0xff] %v1844_v9 }
 0x62b   :  { %v1753_v58 = vadd.f32 %v2109_v33, %v1752_v53  ;;  %v1770_v49 = vmul.f32 %v2111_v56, %v1768_v0  ;;  %v2113_v15 = vpop.eup %2112  ;;  %vm1775_vm13 = vweird.f32 %v2111_v56 }
 0x62c   :  { %v1738_v22 = vsel %vm1737_vm9, %v2107_v10, %v1734_v7  ;;  %vm1776_vm15 = vmor %vm1774_vm14, %vm1775_vm13 }
 0x62d   :  { %v1743_v57 = vsel %vm1740_vm11, %v1742_v41, %v1738_v22  ;;  %v1757_v14 = vsel %vm1756_vm10, %v2109_v33, %v1753_v58  ;;  %v1771_v61 = vsub.f32 1.0, %v1770_v49 }
 0x62e   :  { %v1762_v45 = vsel %vm1759_vm12, %v1761_v60, %v1757_v14  ;;  %v1785_v59 = vmul.f32 %v2113_v15, %v1743_v57 }
 0x62f   :  { %v1784_v3 = vmul.f32 %v1762_v45, %v3415_v34  ;;  %v1846_v40 = vpop.f32.mrf.mxu0  ;;  %v1772_v1 = vmul.f32 %v2111_v56, %v1771_v61 }
 0x630   :  { %v1847_v62 = vadd.f32 %v3429_v47, %v1846_v40 }
 0x631   :  { %v1786_v48 = vadd.f32 %v1785_v59, %v1784_v3  ;;  %v1773_v42 = vadd.f32 %v2111_v56, %v1772_v1 }
 0x632   :  { %1864 = vst [vmem:[%s3483_s10 + $0x18] sm:$0xff] %v1847_v62 }
 0x633   :  { %1791 = vst [vmem:[%s3485_s12] sm:$0xff] %v1786_v48  ;;  %2114 = vtanh.f32 %v1786_v48  ;;  %v1777_v34 = vsel %vm1776_vm15, %v2111_v56, %v1773_v42 }
 0x634   :  { %v1782_v63 = vsel %vm1779_vm0, %v1781_v12, %v1777_v34 }
 0x637   :  { %v1849_v17 = vpop.f32.mrf.mxu0 }
 0x638   :  { %v1850_v4 = vadd.f32 %v3429_v47, %v1849_v17 }
 0x639   :  { %v2115_v8 = vpop.eup %2114 }
 0x63a   :  { %1865 = vst [vmem:[%s3483_s10 + $0x20] sm:$0xff] %v1850_v4  ;;  %v1788_v50 = vmul.f32 %v2115_v8, %v1782_v63 }
 0x63c   :  { %1790 = vst [vmem:[%s3484_s11] sm:$0xff] %v1788_v50  ;;  %1857 = vmatmul.f32.gmra.mxu0 %v1788_v50 }
 0x63f   :  { %v1852_v31 = vpop.f32.mrf.mxu0 }
 0x640   :  { %v1853_v37 = vadd.f32 %v3429_v47, %v1852_v31 }
 0x642   :  { %1866 = vst [vmem:[%s3483_s10 + $0x28] sm:$0xff] %v1853_v37 }
 0x647   :  { %v1855_v21 = vpop.f32.mrf.mxu0 }
 0x648   :  { %v1856_v16 = vadd.f32 %v3429_v47, %v1855_v21 }
 0x64a   :  { %1867 = vst [vmem:[%s3483_s10 + $0x30] sm:$0xff] %v1856_v16 }
 0x6b9   :  { %v1858_v36 = vpop.f32.mrf.mxu0 }
 0x6ba   :  { %v1859_v5 = vadd.f32 %v3429_v47, %v1858_v36 }
 0x6bc   :  { %1868 = vst [vmem:[%s3483_s10 + $0x38] sm:$0xff] %v1859_v5 }
 0x6bd   :  { %1881 = vsyncpa [#allocation4], 1 }
 0x6be   :  { %1882 = vsyncpa [#allocation6], 1 }

</bundles_post_ra>
